<compile_context>
chip_gen: v7x
topology: tpu7x:2x2x1
jax: 0.10.0
libtpu: 0.0.40
codegen_flags: <defaults>
</compile_context>

<pallas_src>
import functools

import jax
import jax.numpy as jnp
from jax import lax
from jax.experimental import pallas as pl
from jax.experimental.pallas import tpu as pltpu

F32_EPS = float(jnp.finfo(jnp.float32).eps)  # nn.RMSNorm(eps=None) default


def _vmem_limit_bytes():
    """~3/4 of physical VMEM: ~48 MiB on v7x (64 MiB), ~96 MiB on v5e/v6e."""
    try:
        cap = int(pltpu.get_tpu_info().vmem_capacity_bytes)
    except Exception:
        cap = 64 * 1024 * 1024
    return int(min(cap * 3 // 4, 100 * 1024 * 1024))


VMEM_LIMIT = _vmem_limit_bytes()


def _pick_row_tile(L):
    """Row (token) tile: prefer large multiples of 16 (bf16 sublane packing)."""
    for c in (1024, 512, 256, 128, 64, 32, 16):
        if c <= L and L % c == 0:
            return c
    return L  # small / odd L: full dim (block == full array dim is always legal)


def _pick_k_tile(K):
    """K (reduction) tile: multiple of 128 dividing K, else full K."""
    for c in (512, 256, 128):
        if K % c == 0:
            return c
    return K


# --------------------------------------------------------------------------
# Kernel 1: patch embed (Conv3d k=8 s=8 as matmul, K-tiled accumulator)
#           + patch RMSNorm (no affine) + precomputed pos-embed add
# --------------------------------------------------------------------------

def _patch_embed_kernel(xp_ref, wp_ref, pe_ref, o_ref, acc_ref):
    k = pl.program_id(2)

    @pl.when(k == 0)
    def _():
        acc_ref[...] = jnp.zeros_like(acc_ref)

    acc_ref[...] += jnp.dot(xp_ref[0], wp_ref[...],
                            preferred_element_type=jnp.float32)

    @pl.when(k == pl.num_programs(2) - 1)
    def _():
        t = acc_ref[...]
        inv = lax.rsqrt(jnp.mean(t * t, axis=-1, keepdims=True) + F32_EPS)
        o_ref[0] = (t * inv + pe_ref[...]).astype(o_ref.dtype)


def patch_embed_pallas(xp, w_patch, pe_proj):
    """xp: (B, L, K) bf16, w_patch: (K, E) bf16, pe_proj: (L, E) f32
    -> tok (B, L, E) f32 = rmsnorm(xp @ w_patch) + pe_proj."""
    B, L, K = xp.shape
    E = w_patch.shape[1]
    TL = _pick_row_tile(L)
    TK = _pick_k_tile(K)
    return pl.pallas_call(
        _patch_embed_kernel,
        out_shape=jax.ShapeDtypeStruct((B, L, E), jnp.float32),
        grid=(B, L // TL, K // TK),
        in_specs=[
            pl.BlockSpec((1, TL, TK), lambda b, l, k: (b, l, k)),
            pl.BlockSpec((TK, E), lambda b, l, k: (k, 0)),
            pl.BlockSpec((TL, E), lambda b, l, k: (l, 0)),
        ],
        out_specs=pl.BlockSpec((1, TL, E), lambda b, l, k: (b, l, 0)),
        scratch_shapes=[pltpu.VMEM((TL, E), jnp.float32)],
        compiler_params=pltpu.CompilerParams(
            dimension_semantics=("parallel", "parallel", "arbitrary"),
            vmem_limit_bytes=VMEM_LIMIT),
    )(xp, w_patch, pe_proj)


# --------------------------------------------------------------------------
# Kernel 2: fused transformer stack.  One grid step per batch element; all
#           blocks' weights are stacked on a leading axis and resident in
#           VMEM; the residual stream never leaves VMEM between blocks.
#           Per block: RMSNorm -> fused QKV -> attention (per-head scores)
#           -> concatenated out-proj -> residual; then RMSNorm -> MishGLU
#           (single 4E-wide lin1) -> lin2 -> residual.
# --------------------------------------------------------------------------

def _stack_kernel(x_ref, mha_nw_ref, wqkv_ref, bqkv_ref, wo_ref, bo_ref,
                  mlp_nw_ref, w1_ref, b1_ref, w2_ref, b2_ref, o_ref,
                  *, nblk, nheads, head_dim):
    x = x_ref[0]                                                   # (L, E) f32
    L, E = x.shape
    scale = 1.0 / (head_dim ** 0.5)

    # Static unroll over blocks (nblk = layers**2 is small); switch to
    # lax.fori_loop with dynamic ref indexing if nblk grows large.
    for blk in range(nblk):
        # ---------------- MHA ----------------
        inv = lax.rsqrt(jnp.mean(x * x, axis=-1, keepdims=True) + F32_EPS)
        nx = (x * inv * mha_nw_ref[blk]).astype(jnp.bfloat16)      # (L, E) bf16

        # fused QKV: columns are [q(E) | k(E) | v(E)], each head-major inside.
        qkv = jnp.dot(nx, wqkv_ref[blk],
                      preferred_element_type=jnp.float32) + bqkv_ref[blk]  # (L,3E)

        heads = []
        for h in range(nheads):                                    # static unroll
            lo = h * head_dim
            q = qkv[:, lo:lo + head_dim]
            k = qkv[:, E + lo:E + lo + head_dim]
            v = qkv[:, 2 * E + lo:2 * E + lo + head_dim]
            # scores: contract on head_dim without an explicit transpose
            s = lax.dot_general(q.astype(jnp.bfloat16), k.astype(jnp.bfloat16),
                                (((1,), (1,)), ((), ())),
                                preferred_element_type=jnp.float32) * scale
            s = s - jnp.max(s, axis=-1, keepdims=True)
            p = jnp.exp(s)
            p = p * pl.reciprocal(jnp.sum(p, axis=-1, keepdims=True), approx=True)
            heads.append(jnp.dot(p.astype(jnp.bfloat16), v.astype(jnp.bfloat16),
                                 preferred_element_type=jnp.float32))  # (L, Dh)
        attn = jnp.concatenate(heads, axis=-1).astype(jnp.bfloat16)    # (L, E)

        # single concatenated out-proj + residual
        x = x + jnp.dot(attn, wo_ref[blk],
                        preferred_element_type=jnp.float32) + bo_ref[blk]

        # ---------------- MLP (MishGLU) ----------------
        inv = lax.rsqrt(jnp.mean(x * x, axis=-1, keepdims=True) + F32_EPS)
        nx = (x * inv * mlp_nw_ref[blk]).astype(jnp.bfloat16)

        h12 = jnp.dot(nx, w1_ref[blk],
                      preferred_element_type=jnp.float32) + b1_ref[blk]    # (L, 4E)
        hc = h12.shape[-1] // 2
        x1 = h12[:, :hc]
        x2 = h12[:, hc:]
        # numerically stable softplus, then Mish(x1) * x2
        sp = jnp.log1p(jnp.exp(-jnp.abs(x1))) + jnp.maximum(x1, 0.0)
        g = (x1 * jnp.tanh(sp)) * x2                                       # (L, 2E)
        x = x + jnp.dot(g.astype(jnp.bfloat16), w2_ref[blk],
                        preferred_element_type=jnp.float32) + b2_ref[blk]

    o_ref[0] = x.astype(o_ref.dtype)


def _full_spec(a):
    nd = a.ndim
    return pl.BlockSpec(a.shape, lambda *_: (0,) * nd)


def transformer_stack_pallas(x, mha_nw, wqkv, bqkv, wo, bo,
                             mlp_nw, w1, b1, w2, b2, *, nheads, head_dim):
    """x: (B, L, E) f32 residual stream; all block weights stacked on axis 0."""
    B, L, E = x.shape
    nblk = wqkv.shape[0]
    # TODO(synk): for L beyond a few K tokens, add a query-parallel grid axis
    # with KV tiling / online softmax instead of the full (L, L) score matrix.
    kern = functools.partial(_stack_kernel, nblk=nblk,
                             nheads=nheads, head_dim=head_dim)
    weights = (mha_nw, wqkv, bqkv, wo, bo, mlp_nw, w1, b1, w2, b2)
    return pl.pallas_call(
        kern,
        out_shape=jax.ShapeDtypeStruct((B, L, E), jnp.float32),
        grid=(B,),
        in_specs=[pl.BlockSpec((1, L, E), lambda b: (b, 0, 0))]
                 + [_full_spec(a) for a in weights],
        out_specs=pl.BlockSpec((1, L, E), lambda b: (b, 0, 0)),
        compiler_params=pltpu.CompilerParams(
            dimension_semantics=("parallel",),
            vmem_limit_bytes=VMEM_LIMIT),
    )(x, *weights)


# --------------------------------------------------------------------------
# Kernel 3: out head: subtract precomputed pos-embed + out RMSNorm (no affine)
#           + ConvTranspose3d(k=s=(2,2,4))-as-matmul.
# --------------------------------------------------------------------------

def _out_head_kernel(x_ref, pe_ref, wdec_ref, o_ref):
    t = x_ref[0] - pe_ref[...]                                     # (TL, E) f32
    inv = lax.rsqrt(jnp.mean(t * t, axis=-1, keepdims=True) + F32_EPS)
    t = (t * inv).astype(jnp.bfloat16)
    o_ref[0] = jnp.dot(t, wdec_ref[...],
                       preferred_element_type=jnp.float32).astype(o_ref.dtype)


def out_head_pallas(x, pe_proj, w_dec):
    B, L, E = x.shape
    N = w_dec.shape[1]
    TL = _pick_row_tile(L)
    # TODO(synk): N = Cout*16 < 128 lanes -> masked stores; pad to 128 lanes if
    # the deconv output ever becomes store-bound.
    return pl.pallas_call(
        _out_head_kernel,
        out_shape=jax.ShapeDtypeStruct((B, L, N), jnp.float32),
        grid=(B, L // TL),
        in_specs=[
            pl.BlockSpec((1, TL, E), lambda b, l: (b, l, 0)),
            pl.BlockSpec((TL, E), lambda b, l: (l, 0)),
            pl.BlockSpec((E, N), lambda b, l: (0, 0)),
        ],
        out_specs=pl.BlockSpec((1, TL, N), lambda b, l: (b, l, 0)),
        compiler_params=pltpu.CompilerParams(
            dimension_semantics=("parallel", "parallel"),
            vmem_limit_bytes=VMEM_LIMIT),
    )(x, pe_proj, w_dec)


# ------------------------------ model (glue) -------------------------------

def sinusoidal_pos_embed(length, dim):
    assert dim % 2 == 0, "Dimension for sinusoidal embed must be even."
    position = jnp.arange(length, dtype=jnp.float32)[:, None]
    div_term = jnp.exp(jnp.arange(0, dim, 2, dtype=jnp.float32)
                       * -(jnp.log(10000.0) / dim))
    angles = position * div_term
    pe = jnp.zeros((length, dim), jnp.float32)
    pe = pe.at[:, 0::2].set(jnp.sin(angles))
    pe = pe.at[:, 1::2].set(jnp.cos(angles))
    return pe


class _KeyGen:
    def __init__(self, key):
        self._key = key

    def __call__(self):
        self._key, k = jax.random.split(self._key)
        return k


def init_params(key, p):
    """Weights stored pre-transposed (K-major), pre-fused (QKV / MishGLU lin1),
    stacked per block on a leading axis, and pre-cast to bf16 for the MXU.
    Biases / norm weights / pos_w: f32 (pos_w is only used in plain JAX now)."""
    E = p['embed_dim']
    Cin = p['in_channels']
    Cout = p['out_channels']
    n = p['layers']
    hd = p['head_dim']
    assert E % hd == 0
    nblk = n * n                      # n outer TransformerLayers x n repeats
    kg = _KeyGen(key)

    def w(shape, fan_in):
        return (jax.random.normal(kg(), shape, jnp.float32)
                / jnp.sqrt(jnp.float32(fan_in))).astype(jnp.bfloat16)

    def b(shape):
        return 0.01 * jax.random.normal(kg(), shape, jnp.float32)

    params = {
        'patch_w': w((Cin * 512, E), Cin * 512),            # Conv3d weight, (K, E)
        'pos_w': (jax.random.normal(kg(), (E, E), jnp.float32)
                  / jnp.sqrt(jnp.float32(E))),              # position_embed (f32, host-side)
        'deconv_w': w((E, Cout * 2 * 2 * 4), E),             # ConvTranspose3d, (E, Cout*16)
        # stacked transformer-block weights
        'mha_nw': jnp.ones((nblk, 1, E), jnp.float32),
        'wqkv': w((nblk, E, 3 * E), E),                      # fused in_proj^T: [q|k|v]
        'bqkv': b((nblk, 1, 3 * E)),
        'wo': w((nblk, E, E), E),                            # out_proj^T
        'bo': b((nblk, 1, E)),
        'mlp_nw': jnp.ones((nblk, 1, E), jnp.float32),
        'w1': w((nblk, E, 4 * E), E),                        # MishGLU lin1^T: [mish|gate]
        'b1': b((nblk, 1, 4 * E)),
        'w2': w((nblk, 2 * E, E), 2 * E),
        'b2': b((nblk, 1, E)),
    }
    return params


def vitseg_forward(params, x, p):
    B, Cin, D, H, W = x.shape
    assert D % 8 == 0 and H % 8 == 0 and W % 8 == 0
    E = p['embed_dim']
    hd = p['head_dim']
    nheads = E // hd
    Cout = p['out_channels']
    S1, S2, S3 = D // 8, H // 8, W // 8
    L = S1 * S2 * S3

    # --- patchify (plain-JAX layout glue), cast MXU operand to bf16 ---
    xp = x.reshape(B, Cin, S1, 8, S2, 8, S3, 8)
    xp = xp.transpose(0, 2, 4, 6, 1, 3, 5, 7).reshape(B, L, Cin * 512)
    xp = xp.astype(jnp.bfloat16)

    # precompute projected positional embedding once, in f32 (batch-independent)
    pe_proj = sinusoidal_pos_embed(L, E) @ params['pos_w']           # (L, E) f32

    # launch 1: Conv3d-as-matmul + patch RMSNorm + pos-embed add
    tok = patch_embed_pallas(xp, params['patch_w'], pe_proj)

    # launch 2: entire transformer stack fused (eval: dropout/sto-depth = identity)
    tok = transformer_stack_pallas(tok,
                                   params['mha_nw'], params['wqkv'], params['bqkv'],
                                   params['wo'], params['bo'],
                                   params['mlp_nw'], params['w1'], params['b1'],
                                   params['w2'], params['b2'],
                                   nheads=nheads, head_dim=hd)

    # launch 3: pos-embed subtract + out RMSNorm + ConvTranspose3d-as-matmul
    y = out_head_pallas(tok, pe_proj, params['deconv_w'])
    y = y.reshape(B, S1, S2, S3, Cout, 2, 2, 4)
    y = y.transpose(0, 4, 1, 5, 2, 6, 3, 7).reshape(B, Cout, 2 * S1, 2 * S2, 4 * S3)

    # TODO(synk): trilinear upsample (scale (4,4,2), align_corners=False) uses
    # jax.image.resize (half-pixel centers), not a Pallas kernel.
    y = jax.image.resize(y, (B, Cout, 8 * S1, 8 * S2, 8 * S3), method='trilinear')
    return y


# ---------------------------------- main -----------------------------------

if __name__ == "__main__":
    p = {
        'in_channels': 2,
        'out_channels': 3,
        'embed_dim': 32,
        'layers': 2,        # 2 outer layers x 2 repeats each = 4 blocks
        'head_dim': 16,
        'dropout': 0.0,
        'sto_depth': 0.0,
    }

    root = jax.random.PRNGKey(0)
    k_params, k_input = jax.random.split(root)
    params = init_params(k_params, p)

    # input: (B, C, D, H, W) with spatial dims multiples of 8
    x = jax.random.normal(k_input, (2, p['in_channels'], 16, 16, 16), jnp.float32)

    fwd = jax.jit(lambda prm, inp: vitseg_forward(prm, inp, p))
    out = fwd(params, x)
    jax.block_until_ready(out)

    expected = (2, p['out_channels'], 16, 16, 16)
    assert out.shape == expected, (out.shape, expected)
    assert jnp.all(jnp.isfinite(out))
    print("KERNEL_OK")
</pallas_src>

<mosaic_0001>
module attributes {stable_mosaic.version = 11 : i64} {
  func.func @_patch_embed_kernel(%arg0: i32, %arg1: i32, %arg2: i32, %arg3: memref<1x8x512xbf16, #tpu.memory_space<vmem>>, %arg4: memref<512x32xbf16, #tpu.memory_space<vmem>>, %arg5: memref<8x32xf32, #tpu.memory_space<vmem>>, %arg6: memref<1x8x32xf32, #tpu.memory_space<vmem>>, %arg7: memref<8x32xf32, #tpu.memory_space<vmem>>) attributes {dimension_semantics = [#tpu.dimension_semantics<parallel>, #tpu.dimension_semantics<parallel>, #tpu.dimension_semantics<arbitrary>], iteration_bounds = array<i64: 2, 1, 2>, scalar_prefetch = 0 : i64, scratch_operands = 1 : i64, tpu.core_type = #tpu.core_type<tc>, window_params = [{transform_indices = @transform_0, window_bounds = array<i64: 1, 8, 512>}, {transform_indices = @transform_1, window_bounds = array<i64: 512, 32>}, {transform_indices = @transform_2, window_bounds = array<i64: 8, 32>}, {transform_indices = @transform_3, window_bounds = array<i64: 1, 8, 32>}]} {
    %c0_i32 = arith.constant 0 : i32
    %0 = arith.cmpi eq, %arg2, %c0_i32 : i32
    %1 = arith.extui %0 : i1 to i32
    %c0_i32_0 = arith.constant 0 : i32
    %2 = arith.cmpi ne, %1, %c0_i32_0 : i32
    scf.if %2 {
      %cst_10 = arith.constant 0.000000e+00 : f32
      %13 = vector.broadcast %cst_10 : f32 to vector<8x32xf32>
      %c0_11 = arith.constant 0 : index
      %c0_12 = arith.constant 0 : index
      %14 = vector.load %arg7[%c0_11, %c0_12] : memref<8x32xf32, #tpu.memory_space<vmem>>, vector<8x32xf32>
      tpu.vector_store %arg7[%c0_11, %c0_12], %13 {strides = array<i32>} : memref<8x32xf32, #tpu.memory_space<vmem>>, vector<8x32xf32>,
    } else {
    }
    %c0 = arith.constant 0 : index
    %c0_1 = arith.constant 0 : index
    %3 = vector.load %arg7[%c0, %c0_1] : memref<8x32xf32, #tpu.memory_space<vmem>>, vector<8x32xf32>
    %c0_2 = arith.constant 0 : index
    %c0_3 = arith.constant 0 : index
    %c0_4 = arith.constant 0 : index
    %4 = vector.load %arg3[%c0_2, %c0_3, %c0_4] : memref<1x8x512xbf16, #tpu.memory_space<vmem>>, vector<1x8x512xbf16>
    %5 = vector.shape_cast %4 : vector<1x8x512xbf16> to vector<8x512xbf16>
    %c0_5 = arith.constant 0 : index
    %c0_6 = arith.constant 0 : index
    %6 = vector.load %arg4[%c0_5, %c0_6] : memref<512x32xbf16, #tpu.memory_space<vmem>>, vector<512x32xbf16>
    %cst = arith.constant dense<0.000000e+00> : vector<8x32xf32>
    %7 = tpu.matmul %5, %6, %cst {dimension_numbers = #tpu.dot_dimension_numbers<[1], [0], [0], [1], [0, 0, 1, 1], [], []>} : vector<8x512xbf16>, vector<512x32xbf16>, vector<8x32xf32> -> vector<8x32xf32>
    %8 = arith.addf %3, %7 : vector<8x32xf32>
    %c0_7 = arith.constant 0 : index
    %c0_8 = arith.constant 0 : index
    %9 = vector.load %arg7[%c0_7, %c0_8] : memref<8x32xf32, #tpu.memory_space<vmem>>, vector<8x32xf32>
    tpu.vector_store %arg7[%c0_7, %c0_8], %8 {strides = array<i32>} : memref<8x32xf32, #tpu.memory_space<vmem>>, vector<8x32xf32>,
    %c1_i32 = arith.constant 1 : i32
    %10 = arith.cmpi eq, %arg2, %c1_i32 : i32
    %11 = arith.extui %10 : i1 to i32
    %c0_i32_9 = arith.constant 0 : i32
    %12 = arith.cmpi ne, %11, %c0_i32_9 : i32
    scf.if %12 {
      %c0_10 = arith.constant 0 : index
      %c0_11 = arith.constant 0 : index
      %13 = vector.load %arg7[%c0_10, %c0_11] : memref<8x32xf32, #tpu.memory_space<vmem>>, vector<8x32xf32>
      %14 = arith.mulf %13, %13 : vector<8x32xf32>
      %cst_12 = arith.constant dense<0.000000e+00> : vector<8xf32>
      %15 = vector.multi_reduction <add>, %14, %cst_12 [1] : vector<8x32xf32> to vector<8xf32>
      %16 = vector.shape_cast %15 : vector<8xf32> to vector<8x1xf32>
      %cst_13 = arith.constant 3.200000e+01 : f32
      %17 = vector.broadcast %cst_13 : f32 to vector<8x1xf32>
      %18 = arith.divf %16, %17 : vector<8x1xf32>
      %cst_14 = arith.constant 1.1920929E-7 : f32
      %19 = vector.broadcast %cst_14 : f32 to vector<8x1xf32>
      %20 = arith.addf %18, %19 : vector<8x1xf32>
      %21 = math.rsqrt %20 : vector<8x1xf32>
      %22 = vector.broadcast %21 : vector<8x1xf32> to vector<8x32xf32>
      %23 = arith.mulf %13, %22 : vector<8x32xf32>
      %c0_15 = arith.constant 0 : index
      %c0_16 = arith.constant 0 : index
      %24 = vector.load %arg5[%c0_15, %c0_16] : memref<8x32xf32, #tpu.memory_space<vmem>>, vector<8x32xf32>
      %25 = arith.addf %23, %24 : vector<8x32xf32>
      %c0_17 = arith.constant 0 : index
      %c0_18 = arith.constant 0 : index
      %c0_19 = arith.constant 0 : index
      %26 = vector.load %arg6[%c0_17, %c0_18, %c0_19] : memref<1x8x32xf32, #tpu.memory_space<vmem>>, vector<1x8x32xf32>
      %27 = vector.shape_cast %26 : vector<1x8x32xf32> to vector<8x32xf32>
      %28 = vector.shape_cast %25 : vector<8x32xf32> to vector<1x8x32xf32>
      tpu.vector_store %arg6[%c0_17, %c0_18, %c0_19], %28 {strides = array<i32>} : memref<1x8x32xf32, #tpu.memory_space<vmem>>, vector<1x8x32xf32>,
    } else {
    }
    return
  }
  func.func @transform_0(%arg0: i32, %arg1: i32, %arg2: i32) -> (i32, i32, i32) {
    %c0_i32 = arith.constant 0 : i32
    return %arg0, %arg1, %arg2 : i32, i32, i32
  }
  func.func @transform_1(%arg0: i32, %arg1: i32, %arg2: i32) -> (i32, i32) {
    %c0_i32 = arith.constant 0 : i32
    %c0_i32_0 = arith.constant 0 : i32
    return %arg2, %c0_i32 : i32, i32
  }
  func.func @transform_2(%arg0: i32, %arg1: i32, %arg2: i32) -> (i32, i32) {
    %c0_i32 = arith.constant 0 : i32
    %c0_i32_0 = arith.constant 0 : i32
    return %arg1, %c0_i32 : i32, i32
  }
  func.func @transform_3(%arg0: i32, %arg1: i32, %arg2: i32) -> (i32, i32, i32) {
    %c0_i32 = arith.constant 0 : i32
    %c0_i32_0 = arith.constant 0 : i32
    return %arg0, %arg1, %c0_i32 : i32, i32, i32
  }
}

module attributes {stable_mosaic.version = 11 : i64} {
  func.func @_stack_kernel(%arg0: i32, %arg1: memref<1x8x32xf32, #tpu.memory_space<vmem>>, %arg2: memref<4x1x32xf32, #tpu.memory_space<vmem>>, %arg3: memref<4x32x96xbf16, #tpu.memory_space<vmem>>, %arg4: memref<4x1x96xf32, #tpu.memory_space<vmem>>, %arg5: memref<4x32x32xbf16, #tpu.memory_space<vmem>>, %arg6: memref<4x1x32xf32, #tpu.memory_space<vmem>>, %arg7: memref<4x1x32xf32, #tpu.memory_space<vmem>>, %arg8: memref<4x32x128xbf16, #tpu.memory_space<vmem>>, %arg9: memref<4x1x128xf32, #tpu.memory_space<vmem>>, %arg10: memref<4x64x32xbf16, #tpu.memory_space<vmem>>, %arg11: memref<4x1x32xf32, #tpu.memory_space<vmem>>, %arg12: memref<1x8x32xf32, #tpu.memory_space<vmem>>) attributes {dimension_semantics = [#tpu.dimension_semantics<parallel>], iteration_bounds = array<i64: 2>, scalar_prefetch = 0 : i64, scratch_operands = 0 : i64, tpu.core_type = #tpu.core_type<tc>, window_params = [{transform_indices = @transform_0, window_bounds = array<i64: 1, 8, 32>}, {pipeline_mode = #tpu.pipeline_mode<synchronous>, transform_indices = @transform_1, window_bounds = array<i64: 4, 1, 32>}, {pipeline_mode = #tpu.pipeline_mode<synchronous>, transform_indices = @transform_2, window_bounds = array<i64: 4, 32, 96>}, {pipeline_mode = #tpu.pipeline_mode<synchronous>, transform_indices = @transform_3, window_bounds = array<i64: 4, 1, 96>}, {pipeline_mode = #tpu.pipeline_mode<synchronous>, transform_indices = @transform_4, window_bounds = array<i64: 4, 32, 32>}, {pipeline_mode = #tpu.pipeline_mode<synchronous>, transform_indices = @transform_5, window_bounds = array<i64: 4, 1, 32>}, {pipeline_mode = #tpu.pipeline_mode<synchronous>, transform_indices = @transform_6, window_bounds = array<i64: 4, 1, 32>}, {pipeline_mode = #tpu.pipeline_mode<synchronous>, transform_indices = @transform_7, window_bounds = array<i64: 4, 32, 128>}, {pipeline_mode = #tpu.pipeline_mode<synchronous>, transform_indices = @transform_8, window_bounds = array<i64: 4, 1, 128>}, {pipeline_mode = #tpu.pipeline_mode<synchronous>, transform_indices = @transform_9, window_bounds = array<i64: 4, 64, 32>}, {pipeline_mode = #tpu.pipeline_mode<synchronous>, transform_indices = @transform_10, window_bounds = array<i64: 4, 1, 32>}, {transform_indices = @transform_11, window_bounds = array<i64: 1, 8, 32>}]} {
    %c0 = arith.constant 0 : index
    %c0_0 = arith.constant 0 : index
    %c0_1 = arith.constant 0 : index
    %0 = vector.load %arg1[%c0, %c0_0, %c0_1] : memref<1x8x32xf32, #tpu.memory_space<vmem>>, vector<1x8x32xf32>
    %1 = vector.shape_cast %0 : vector<1x8x32xf32> to vector<8x32xf32>
    %2 = arith.mulf %1, %1 : vector<8x32xf32>
    %cst = arith.constant dense<0.000000e+00> : vector<8xf32>
    %3 = vector.multi_reduction <add>, %2, %cst [1] : vector<8x32xf32> to vector<8xf32>
    %4 = vector.shape_cast %3 : vector<8xf32> to vector<8x1xf32>
    %cst_2 = arith.constant 3.200000e+01 : f32
    %5 = vector.broadcast %cst_2 : f32 to vector<8x1xf32>
    %6 = arith.divf %4, %5 : vector<8x1xf32>
    %cst_3 = arith.constant 1.1920929E-7 : f32
    %7 = vector.broadcast %cst_3 : f32 to vector<8x1xf32>
    %8 = arith.addf %6, %7 : vector<8x1xf32>
    %9 = math.rsqrt %8 : vector<8x1xf32>
    %10 = vector.broadcast %9 : vector<8x1xf32> to vector<8x32xf32>
    %11 = arith.mulf %1, %10 : vector<8x32xf32>
    %c0_4 = arith.constant 0 : index
    %c0_5 = arith.constant 0 : index
    %c0_6 = arith.constant 0 : index
    %12 = vector.load %arg2[%c0_4, %c0_5, %c0_6] : memref<4x1x32xf32, #tpu.memory_space<vmem>>, vector<1x1x32xf32>
    %13 = vector.shape_cast %12 : vector<1x1x32xf32> to vector<1x32xf32>
    %14 = vector.broadcast %13 : vector<1x32xf32> to vector<8x32xf32>
    %15 = arith.mulf %11, %14 : vector<8x32xf32>
    %16 = arith.truncf %15 : vector<8x32xf32> to vector<8x32xbf16>
    %c0_7 = arith.constant 0 : index
    %c0_8 = arith.constant 0 : index
    %c0_9 = arith.constant 0 : index
    %17 = vector.load %arg3[%c0_7, %c0_8, %c0_9] : memref<4x32x96xbf16, #tpu.memory_space<vmem>>, vector<1x32x96xbf16>
    %18 = vector.shape_cast %17 : vector<1x32x96xbf16> to vector<32x96xbf16>
    %cst_10 = arith.constant dense<0.000000e+00> : vector<8x96xf32>
    %19 = tpu.matmul %16, %18, %cst_10 {dimension_numbers = #tpu.dot_dimension_numbers<[1], [0], [0], [1], [0, 0, 1, 1], [], []>} : vector<8x32xbf16>, vector<32x96xbf16>, vector<8x96xf32> -> vector<8x96xf32>
    %c0_11 = arith.constant 0 : index
    %c0_12 = arith.constant 0 : index
    %c0_13 = arith.constant 0 : index
    %20 = vector.load %arg4[%c0_11, %c0_12, %c0_13] : memref<4x1x96xf32, #tpu.memory_space<vmem>>, vector<1x1x96xf32>
    %21 = vector.shape_cast %20 : vector<1x1x96xf32> to vector<1x96xf32>
    %22 = vector.broadcast %21 : vector<1x96xf32> to vector<8x96xf32>
    %23 = arith.addf %19, %22 : vector<8x96xf32>
    %24 = vector.extract_strided_slice %23 {offsets = [0, 0], sizes = [8, 16], strides = [1, 1]} : vector<8x96xf32> to vector<8x16xf32>
    %25 = vector.extract_strided_slice %23 {offsets = [0, 32], sizes = [8, 16], strides = [1, 1]} : vector<8x96xf32> to vector<8x16xf32>
    %26 = vector.extract_strided_slice %23 {offsets = [0, 64], sizes = [8, 16], strides = [1, 1]} : vector<8x96xf32> to vector<8x16xf32>
    %27 = arith.truncf %24 : vector<8x16xf32> to vector<8x16xbf16>
    %28 = arith.truncf %25 : vector<8x16xf32> to vector<8x16xbf16>
    %cst_14 = arith.constant dense<0.000000e+00> : vector<8x8xf32>
    %29 = tpu.matmul %27, %28, %cst_14 {dimension_numbers = #tpu.dot_dimension_numbers<[1], [1], [0], [0], [0, 0, 1, 0], [], []>} : vector<8x16xbf16>, vector<8x16xbf16>, vector<8x8xf32> -> vector<8x8xf32>
    %cst_15 = arith.constant 2.500000e-01 : f32
    %30 = vector.broadcast %cst_15 : f32 to vector<8x8xf32>
    %31 = arith.mulf %29, %30 : vector<8x8xf32>
    %cst_16 = arith.constant dense<0xFF800000> : vector<8xf32>
    %32 = vector.multi_reduction <maximumf>, %31, %cst_16 [1] : vector<8x8xf32> to vector<8xf32>
    %33 = vector.shape_cast %32 : vector<8xf32> to vector<8x1xf32>
    %34 = vector.broadcast %33 : vector<8x1xf32> to vector<8x8xf32>
    %35 = arith.subf %31, %34 : vector<8x8xf32>
    %36 = math.exp %35 : vector<8x8xf32>
    %cst_17 = arith.constant dense<0.000000e+00> : vector<8xf32>
    %37 = vector.multi_reduction <add>, %36, %cst_17 [1] : vector<8x8xf32> to vector<8xf32>
    %38 = vector.shape_cast %37 : vector<8xf32> to vector<8x1xf32>
    %39 = tpu.reciprocal %38 {approx = true} : vector<8x1xf32> -> vector<8x1xf32>
    %40 = vector.broadcast %39 : vector<8x1xf32> to vector<8x8xf32>
    %41 = arith.mulf %36, %40 : vector<8x8xf32>
    %42 = arith.truncf %41 : vector<8x8xf32> to vector<8x8xbf16>
    %43 = arith.truncf %26 : vector<8x16xf32> to vector<8x16xbf16>
    %cst_18 = arith.constant dense<0.000000e+00> : vector<8x16xf32>
    %44 = tpu.matmul %42, %43, %cst_18 {dimension_numbers = #tpu.dot_dimension_numbers<[1], [0], [0], [1], [0, 0, 1, 1], [], []>} : vector<8x8xbf16>, vector<8x16xbf16>, vector<8x16xf32> -> vector<8x16xf32>
    %45 = vector.extract_strided_slice %23 {offsets = [0, 16], sizes = [8, 16], strides = [1, 1]} : vector<8x96xf32> to vector<8x16xf32>
    %46 = vector.extract_strided_slice %23 {offsets = [0, 48], sizes = [8, 16], strides = [1, 1]} : vector<8x96xf32> to vector<8x16xf32>
    %47 = vector.extract_strided_slice %23 {offsets = [0, 80], sizes = [8, 16], strides = [1, 1]} : vector<8x96xf32> to vector<8x16xf32>
    %48 = arith.truncf %45 : vector<8x16xf32> to vector<8x16xbf16>
    %49 = arith.truncf %46 : vector<8x16xf32> to vector<8x16xbf16>
    %cst_19 = arith.constant dense<0.000000e+00> : vector<8x8xf32>
    %50 = tpu.matmul %48, %49, %cst_19 {dimension_numbers = #tpu.dot_dimension_numbers<[1], [1], [0], [0], [0, 0, 1, 0], [], []>} : vector<8x16xbf16>, vector<8x16xbf16>, vector<8x8xf32> -> vector<8x8xf32>
    %cst_20 = arith.constant 2.500000e-01 : f32
    %51 = vector.broadcast %cst_20 : f32 to vector<8x8xf32>
    %52 = arith.mulf %50, %51 : vector<8x8xf32>
    %cst_21 = arith.constant dense<0xFF800000> : vector<8xf32>
    %53 = vector.multi_reduction <maximumf>, %52, %cst_21 [1] : vector<8x8xf32> to vector<8xf32>
    %54 = vector.shape_cast %53 : vector<8xf32> to vector<8x1xf32>
    %55 = vector.broadcast %54 : vector<8x1xf32> to vector<8x8xf32>
    %56 = arith.subf %52, %55 : vector<8x8xf32>
    %57 = math.exp %56 : vector<8x8xf32>
    %cst_22 = arith.constant dense<0.000000e+00> : vector<8xf32>
    %58 = vector.multi_reduction <add>, %57, %cst_22 [1] : vector<8x8xf32> to vector<8xf32>
    %59 = vector.shape_cast %58 : vector<8xf32> to vector<8x1xf32>
    %60 = tpu.reciprocal %59 {approx = true} : vector<8x1xf32> -> vector<8x1xf32>
    %61 = vector.broadcast %60 : vector<8x1xf32> to vector<8x8xf32>
    %62 = arith.mulf %57, %61 : vector<8x8xf32>
    %63 = arith.truncf %62 : vector<8x8xf32> to vector<8x8xbf16>
    %64 = arith.truncf %47 : vector<8x16xf32> to vector<8x16xbf16>
    %cst_23 = arith.constant dense<0.000000e+00> : vector<8x16xf32>
    %65 = tpu.matmul %63, %64, %cst_23 {dimension_numbers = #tpu.dot_dimension_numbers<[1], [0], [0], [1], [0, 0, 1, 1], [], []>} : vector<8x8xbf16>, vector<8x16xbf16>, vector<8x16xf32> -> vector<8x16xf32>
    %66 = tpu.concatenate %44, %65 in 1 : vector<8x16xf32>, vector<8x16xf32> -> vector<8x32xf32>
    %67 = arith.truncf %66 : vector<8x32xf32> to vector<8x32xbf16>
    %c0_24 = arith.constant 0 : index
    %c0_25 = arith.constant 0 : index
    %c0_26 = arith.constant 0 : index
    %68 = vector.load %arg5[%c0_24, %c0_25, %c0_26] : memref<4x32x32xbf16, #tpu.memory_space<vmem>>, vector<1x32x32xbf16>
    %69 = vector.shape_cast %68 : vector<1x32x32xbf16> to vector<32x32xbf16>
    %cst_27 = arith.constant dense<0.000000e+00> : vector<8x32xf32>
    %70 = tpu.matmul %67, %69, %cst_27 {dimension_numbers = #tpu.dot_dimension_numbers<[1], [0], [0], [1], [0, 0, 1, 1], [], []>} : vector<8x32xbf16>, vector<32x32xbf16>, vector<8x32xf32> -> vector<8x32xf32>
    %71 = arith.addf %1, %70 : vector<8x32xf32>
    %c0_28 = arith.constant 0 : index
    %c0_29 = arith.constant 0 : index
    %c0_30 = arith.constant 0 : index
    %72 = vector.load %arg6[%c0_28, %c0_29, %c0_30] : memref<4x1x32xf32, #tpu.memory_space<vmem>>, vector<1x1x32xf32>
    %73 = vector.shape_cast %72 : vector<1x1x32xf32> to vector<1x32xf32>
    %74 = vector.broadcast %73 : vector<1x32xf32> to vector<8x32xf32>
    %75 = arith.addf %71, %74 : vector<8x32xf32>
    %76 = arith.mulf %75, %75 : vector<8x32xf32>
    %cst_31 = arith.constant dense<0.000000e+00> : vector<8xf32>
    %77 = vector.multi_reduction <add>, %76, %cst_31 [1] : vector<8x32xf32> to vector<8xf32>
    %78 = vector.shape_cast %77 : vector<8xf32> to vector<8x1xf32>
    %cst_32 = arith.constant 3.200000e+01 : f32
    %79 = vector.broadcast %cst_32 : f32 to vector<8x1xf32>
    %80 = arith.divf %78, %79 : vector<8x1xf32>
    %cst_33 = arith.constant 1.1920929E-7 : f32
    %81 = vector.broadcast %cst_33 : f32 to vector<8x1xf32>
    %82 = arith.addf %80, %81 : vector<8x1xf32>
    %83 = math.rsqrt %82 : vector<8x1xf32>
    %84 = vector.broadcast %83 : vector<8x1xf32> to vector<8x32xf32>
    %85 = arith.mulf %75, %84 : vector<8x32xf32>
    %c0_34 = arith.constant 0 : index
    %c0_35 = arith.constant 0 : index
    %c0_36 = arith.constant 0 : index
    %86 = vector.load %arg7[%c0_34, %c0_35, %c0_36] : memref<4x1x32xf32, #tpu.memory_space<vmem>>, vector<1x1x32xf32>
    %87 = vector.shape_cast %86 : vector<1x1x32xf32> to vector<1x32xf32>
    %88 = vector.broadcast %87 : vector<1x32xf32> to vector<8x32xf32>
    %89 = arith.mulf %85, %88 : vector<8x32xf32>
    %90 = arith.truncf %89 : vector<8x32xf32> to vector<8x32xbf16>
    %c0_37 = arith.constant 0 : index
    %c0_38 = arith.constant 0 : index
    %c0_39 = arith.constant 0 : index
    %91 = vector.load %arg8[%c0_37, %c0_38, %c0_39] : memref<4x32x128xbf16, #tpu.memory_space<vmem>>, vector<1x32x128xbf16>
    %92 = vector.shape_cast %91 : vector<1x32x128xbf16> to vector<32x128xbf16>
    %cst_40 = arith.constant dense<0.000000e+00> : vector<8x128xf32>
    %93 = tpu.matmul %90, %92, %cst_40 {dimension_numbers = #tpu.dot_dimension_numbers<[1], [0], [0], [1], [0, 0, 1, 1], [], []>} : vector<8x32xbf16>, vector<32x128xbf16>, vector<8x128xf32> -> vector<8x128xf32>
    %c0_41 = arith.constant 0 : index
    %c0_42 = arith.constant 0 : index
    %c0_43 = arith.constant 0 : index
    %94 = vector.load %arg9[%c0_41, %c0_42, %c0_43] : memref<4x1x128xf32, #tpu.memory_space<vmem>>, vector<1x1x128xf32>
    %95 = vector.shape_cast %94 : vector<1x1x128xf32> to vector<1x128xf32>
    %96 = vector.broadcast %95 : vector<1x128xf32> to vector<8x128xf32>
    %97 = arith.addf %93, %96 : vector<8x128xf32>
    %98 = vector.extract_strided_slice %97 {offsets = [0, 0], sizes = [8, 64], strides = [1, 1]} : vector<8x128xf32> to vector<8x64xf32>
    %99 = vector.extract_strided_slice %97 {offsets = [0, 64], sizes = [8, 64], strides = [1, 1]} : vector<8x128xf32> to vector<8x64xf32>
    %100 = math.absf %98 : vector<8x64xf32>
    %cst_44 = arith.constant 0.000000e+00 : f32
    %101 = vector.broadcast %cst_44 : f32 to vector<8x64xf32>
    %102 = arith.subf %101, %100 : vector<8x64xf32>
    %103 = math.exp %102 : vector<8x64xf32>
    %104 = math.log1p %103 : vector<8x64xf32>
    %cst_45 = arith.constant 0.000000e+00 : f32
    %105 = vector.broadcast %cst_45 : f32 to vector<8x64xf32>
    %106 = arith.maximumf %98, %105 : vector<8x64xf32>
    %107 = arith.addf %104, %106 : vector<8x64xf32>
    %108 = math.tanh %107 : vector<8x64xf32>
    %109 = arith.mulf %98, %108 : vector<8x64xf32>
    %110 = arith.mulf %109, %99 : vector<8x64xf32>
    %111 = arith.truncf %110 : vector<8x64xf32> to vector<8x64xbf16>
    %c0_46 = arith.constant 0 : index
    %c0_47 = arith.constant 0 : index
    %c0_48 = arith.constant 0 : index
    %112 = vector.load %arg10[%c0_46, %c0_47, %c0_48] : memref<4x64x32xbf16, #tpu.memory_space<vmem>>, vector<1x64x32xbf16>
    %113 = vector.shape_cast %112 : vector<1x64x32xbf16> to vector<64x32xbf16>
    %cst_49 = arith.constant dense<0.000000e+00> : vector<8x32xf32>
    %114 = tpu.matmul %111, %113, %cst_49 {dimension_numbers = #tpu.dot_dimension_numbers<[1], [0], [0], [1], [0, 0, 1, 1], [], []>} : vector<8x64xbf16>, vector<64x32xbf16>, vector<8x32xf32> -> vector<8x32xf32>
    %115 = arith.addf %75, %114 : vector<8x32xf32>
    %c0_50 = arith.constant 0 : index
    %c0_51 = arith.constant 0 : index
    %c0_52 = arith.constant 0 : index
    %116 = vector.load %arg11[%c0_50, %c0_51, %c0_52] : memref<4x1x32xf32, #tpu.memory_space<vmem>>, vector<1x1x32xf32>
    %117 = vector.shape_cast %116 : vector<1x1x32xf32> to vector<1x32xf32>
    %118 = vector.broadcast %117 : vector<1x32xf32> to vector<8x32xf32>
    %119 = arith.addf %115, %118 : vector<8x32xf32>
    %120 = arith.mulf %119, %119 : vector<8x32xf32>
    %cst_53 = arith.constant dense<0.000000e+00> : vector<8xf32>
    %121 = vector.multi_reduction <add>, %120, %cst_53 [1] : vector<8x32xf32> to vector<8xf32>
    %122 = vector.shape_cast %121 : vector<8xf32> to vector<8x1xf32>
    %cst_54 = arith.constant 3.200000e+01 : f32
    %123 = vector.broadcast %cst_54 : f32 to vector<8x1xf32>
    %124 = arith.divf %122, %123 : vector<8x1xf32>
    %cst_55 = arith.constant 1.1920929E-7 : f32
    %125 = vector.broadcast %cst_55 : f32 to vector<8x1xf32>
    %126 = arith.addf %124, %125 : vector<8x1xf32>
    %127 = math.rsqrt %126 : vector<8x1xf32>
    %128 = vector.broadcast %127 : vector<8x1xf32> to vector<8x32xf32>
    %129 = arith.mulf %119, %128 : vector<8x32xf32>
    %c1 = arith.constant 1 : index
    %c0_56 = arith.constant 0 : index
    %c0_57 = arith.constant 0 : index
    %130 = vector.load %arg2[%c1, %c0_56, %c0_57] : memref<4x1x32xf32, #tpu.memory_space<vmem>>, vector<1x1x32xf32>
    %131 = vector.shape_cast %130 : vector<1x1x32xf32> to vector<1x32xf32>
    %132 = vector.broadcast %131 : vector<1x32xf32> to vector<8x32xf32>
    %133 = arith.mulf %129, %132 : vector<8x32xf32>
    %134 = arith.truncf %133 : vector<8x32xf32> to vector<8x32xbf16>
    %c1_58 = arith.constant 1 : index
    %c0_59 = arith.constant 0 : index
    %c0_60 = arith.constant 0 : index
    %135 = vector.load %arg3[%c1_58, %c0_59, %c0_60] : memref<4x32x96xbf16, #tpu.memory_space<vmem>>, vector<1x32x96xbf16>
    %136 = vector.shape_cast %135 : vector<1x32x96xbf16> to vector<32x96xbf16>
    %cst_61 = arith.constant dense<0.000000e+00> : vector<8x96xf32>
    %137 = tpu.matmul %134, %136, %cst_61 {dimension_numbers = #tpu.dot_dimension_numbers<[1], [0], [0], [1], [0, 0, 1, 1], [], []>} : vector<8x32xbf16>, vector<32x96xbf16>, vector<8x96xf32> -> vector<8x96xf32>
    %c1_62 = arith.constant 1 : index
    %c0_63 = arith.constant 0 : index
    %c0_64 = arith.constant 0 : index
    %138 = vector.load %arg4[%c1_62, %c0_63, %c0_64] : memref<4x1x96xf32, #tpu.memory_space<vmem>>, vector<1x1x96xf32>
    %139 = vector.shape_cast %138 : vector<1x1x96xf32> to vector<1x96xf32>
    %140 = vector.broadcast %139 : vector<1x96xf32> to vector<8x96xf32>
    %141 = arith.addf %137, %140 : vector<8x96xf32>
    %142 = vector.extract_strided_slice %141 {offsets = [0, 0], sizes = [8, 16], strides = [1, 1]} : vector<8x96xf32> to vector<8x16xf32>
    %143 = vector.extract_strided_slice %141 {offsets = [0, 32], sizes = [8, 16], strides = [1, 1]} : vector<8x96xf32> to vector<8x16xf32>
    %144 = vector.extract_strided_slice %141 {offsets = [0, 64], sizes = [8, 16], strides = [1, 1]} : vector<8x96xf32> to vector<8x16xf32>
    %145 = arith.truncf %142 : vector<8x16xf32> to vector<8x16xbf16>
    %146 = arith.truncf %143 : vector<8x16xf32> to vector<8x16xbf16>
    %cst_65 = arith.constant dense<0.000000e+00> : vector<8x8xf32>
    %147 = tpu.matmul %145, %146, %cst_65 {dimension_numbers = #tpu.dot_dimension_numbers<[1], [1], [0], [0], [0, 0, 1, 0], [], []>} : vector<8x16xbf16>, vector<8x16xbf16>, vector<8x8xf32> -> vector<8x8xf32>
    %cst_66 = arith.constant 2.500000e-01 : f32
    %148 = vector.broadcast %cst_66 : f32 to vector<8x8xf32>
    %149 = arith.mulf %147, %148 : vector<8x8xf32>
    %cst_67 = arith.constant dense<0xFF800000> : vector<8xf32>
    %150 = vector.multi_reduction <maximumf>, %149, %cst_67 [1] : vector<8x8xf32> to vector<8xf32>
    %151 = vector.shape_cast %150 : vector<8xf32> to vector<8x1xf32>
    %152 = vector.broadcast %151 : vector<8x1xf32> to vector<8x8xf32>
    %153 = arith.subf %149, %152 : vector<8x8xf32>
    %154 = math.exp %153 : vector<8x8xf32>
    %cst_68 = arith.constant dense<0.000000e+00> : vector<8xf32>
    %155 = vector.multi_reduction <add>, %154, %cst_68 [1] : vector<8x8xf32> to vector<8xf32>
    %156 = vector.shape_cast %155 : vector<8xf32> to vector<8x1xf32>
    %157 = tpu.reciprocal %156 {approx = true} : vector<8x1xf32> -> vector<8x1xf32>
    %158 = vector.broadcast %157 : vector<8x1xf32> to vector<8x8xf32>
    %159 = arith.mulf %154, %158 : vector<8x8xf32>
    %160 = arith.truncf %159 : vector<8x8xf32> to vector<8x8xbf16>
    %161 = arith.truncf %144 : vector<8x16xf32> to vector<8x16xbf16>
    %cst_69 = arith.constant dense<0.000000e+00> : vector<8x16xf32>
    %162 = tpu.matmul %160, %161, %cst_69 {dimension_numbers = #tpu.dot_dimension_numbers<[1], [0], [0], [1], [0, 0, 1, 1], [], []>} : vector<8x8xbf16>, vector<8x16xbf16>, vector<8x16xf32> -> vector<8x16xf32>
    %163 = vector.extract_strided_slice %141 {offsets = [0, 16], sizes = [8, 16], strides = [1, 1]} : vector<8x96xf32> to vector<8x16xf32>
    %164 = vector.extract_strided_slice %141 {offsets = [0, 48], sizes = [8, 16], strides = [1, 1]} : vector<8x96xf32> to vector<8x16xf32>
    %165 = vector.extract_strided_slice %141 {offsets = [0, 80], sizes = [8, 16], strides = [1, 1]} : vector<8x96xf32> to vector<8x16xf32>
    %166 = arith.truncf %163 : vector<8x16xf32> to vector<8x16xbf16>
    %167 = arith.truncf %164 : vector<8x16xf32> to vector<8x16xbf16>
    %cst_70 = arith.constant dense<0.000000e+00> : vector<8x8xf32>
    %168 = tpu.matmul %166, %167, %cst_70 {dimension_numbers = #tpu.dot_dimension_numbers<[1], [1], [0], [0], [0, 0, 1, 0], [], []>} : vector<8x16xbf16>, vector<8x16xbf16>, vector<8x8xf32> -> vector<8x8xf32>
    %cst_71 = arith.constant 2.500000e-01 : f32
    %169 = vector.broadcast %cst_71 : f32 to vector<8x8xf32>
    %170 = arith.mulf %168, %169 : vector<8x8xf32>
    %cst_72 = arith.constant dense<0xFF800000> : vector<8xf32>
    %171 = vector.multi_reduction <maximumf>, %170, %cst_72 [1] : vector<8x8xf32> to vector<8xf32>
    %172 = vector.shape_cast %171 : vector<8xf32> to vector<8x1xf32>
    %173 = vector.broadcast %172 : vector<8x1xf32> to vector<8x8xf32>
    %174 = arith.subf %170, %173 : vector<8x8xf32>
    %175 = math.exp %174 : vector<8x8xf32>
    %cst_73 = arith.constant dense<0.000000e+00> : vector<8xf32>
    %176 = vector.multi_reduction <add>, %175, %cst_73 [1] : vector<8x8xf32> to vector<8xf32>
    %177 = vector.shape_cast %176 : vector<8xf32> to vector<8x1xf32>
    %178 = tpu.reciprocal %177 {approx = true} : vector<8x1xf32> -> vector<8x1xf32>
    %179 = vector.broadcast %178 : vector<8x1xf32> to vector<8x8xf32>
    %180 = arith.mulf %175, %179 : vector<8x8xf32>
    %181 = arith.truncf %180 : vector<8x8xf32> to vector<8x8xbf16>
    %182 = arith.truncf %165 : vector<8x16xf32> to vector<8x16xbf16>
    %cst_74 = arith.constant dense<0.000000e+00> : vector<8x16xf32>
    %183 = tpu.matmul %181, %182, %cst_74 {dimension_numbers = #tpu.dot_dimension_numbers<[1], [0], [0], [1], [0, 0, 1, 1], [], []>} : vector<8x8xbf16>, vector<8x16xbf16>, vector<8x16xf32> -> vector<8x16xf32>
    %184 = tpu.concatenate %162, %183 in 1 : vector<8x16xf32>, vector<8x16xf32> -> vector<8x32xf32>
    %185 = arith.truncf %184 : vector<8x32xf32> to vector<8x32xbf16>
    %c1_75 = arith.constant 1 : index
    %c0_76 = arith.constant 0 : index
    %c0_77 = arith.constant 0 : index
    %186 = vector.load %arg5[%c1_75, %c0_76, %c0_77] : memref<4x32x32xbf16, #tpu.memory_space<vmem>>, vector<1x32x32xbf16>
    %187 = vector.shape_cast %186 : vector<1x32x32xbf16> to vector<32x32xbf16>
    %cst_78 = arith.constant dense<0.000000e+00> : vector<8x32xf32>
    %188 = tpu.matmul %185, %187, %cst_78 {dimension_numbers = #tpu.dot_dimension_numbers<[1], [0], [0], [1], [0, 0, 1, 1], [], []>} : vector<8x32xbf16>, vector<32x32xbf16>, vector<8x32xf32> -> vector<8x32xf32>
    %189 = arith.addf %119, %188 : vector<8x32xf32>
    %c1_79 = arith.constant 1 : index
    %c0_80 = arith.constant 0 : index
    %c0_81 = arith.constant 0 : index
    %190 = vector.load %arg6[%c1_79, %c0_80, %c0_81] : memref<4x1x32xf32, #tpu.memory_space<vmem>>, vector<1x1x32xf32>
    %191 = vector.shape_cast %190 : vector<1x1x32xf32> to vector<1x32xf32>
    %192 = vector.broadcast %191 : vector<1x32xf32> to vector<8x32xf32>
    %193 = arith.addf %189, %192 : vector<8x32xf32>
    %194 = arith.mulf %193, %193 : vector<8x32xf32>
    %cst_82 = arith.constant dense<0.000000e+00> : vector<8xf32>
    %195 = vector.multi_reduction <add>, %194, %cst_82 [1] : vector<8x32xf32> to vector<8xf32>
    %196 = vector.shape_cast %195 : vector<8xf32> to vector<8x1xf32>
    %cst_83 = arith.constant 3.200000e+01 : f32
    %197 = vector.broadcast %cst_83 : f32 to vector<8x1xf32>
    %198 = arith.divf %196, %197 : vector<8x1xf32>
    %cst_84 = arith.constant 1.1920929E-7 : f32
    %199 = vector.broadcast %cst_84 : f32 to vector<8x1xf32>
    %200 = arith.addf %198, %199 : vector<8x1xf32>
    %201 = math.rsqrt %200 : vector<8x1xf32>
    %202 = vector.broadcast %201 : vector<8x1xf32> to vector<8x32xf32>
    %203 = arith.mulf %193, %202 : vector<8x32xf32>
    %c1_85 = arith.constant 1 : index
    %c0_86 = arith.constant 0 : index
    %c0_87 = arith.constant 0 : index
    %204 = vector.load %arg7[%c1_85, %c0_86, %c0_87] : memref<4x1x32xf32, #tpu.memory_space<vmem>>, vector<1x1x32xf32>
    %205 = vector.shape_cast %204 : vector<1x1x32xf32> to vector<1x32xf32>
    %206 = vector.broadcast %205 : vector<1x32xf32> to vector<8x32xf32>
    %207 = arith.mulf %203, %206 : vector<8x32xf32>
    %208 = arith.truncf %207 : vector<8x32xf32> to vector<8x32xbf16>
    %c1_88 = arith.constant 1 : index
    %c0_89 = arith.constant 0 : index
    %c0_90 = arith.constant 0 : index
    %209 = vector.load %arg8[%c1_88, %c0_89, %c0_90] : memref<4x32x128xbf16, #tpu.memory_space<vmem>>, vector<1x32x128xbf16>
    %210 = vector.shape_cast %209 : vector<1x32x128xbf16> to vector<32x128xbf16>
    %cst_91 = arith.constant dense<0.000000e+00> : vector<8x128xf32>
    %211 = tpu.matmul %208, %210, %cst_91 {dimension_numbers = #tpu.dot_dimension_numbers<[1], [0], [0], [1], [0, 0, 1, 1], [], []>} : vector<8x32xbf16>, vector<32x128xbf16>, vector<8x128xf32> -> vector<8x128xf32>
    %c1_92 = arith.constant 1 : index
    %c0_93 = arith.constant 0 : index
    %c0_94 = arith.constant 0 : index
    %212 = vector.load %arg9[%c1_92, %c0_93, %c0_94] : memref<4x1x128xf32, #tpu.memory_space<vmem>>, vector<1x1x128xf32>
    %213 = vector.shape_cast %212 : vector<1x1x128xf32> to vector<1x128xf32>
    %214 = vector.broadcast %213 : vector<1x128xf32> to vector<8x128xf32>
    %215 = arith.addf %211, %214 : vector<8x128xf32>
    %216 = vector.extract_strided_slice %215 {offsets = [0, 0], sizes = [8, 64], strides = [1, 1]} : vector<8x128xf32> to vector<8x64xf32>
    %217 = vector.extract_strided_slice %215 {offsets = [0, 64], sizes = [8, 64], strides = [1, 1]} : vector<8x128xf32> to vector<8x64xf32>
    %218 = math.absf %216 : vector<8x64xf32>
    %cst_95 = arith.constant 0.000000e+00 : f32
    %219 = vector.broadcast %cst_95 : f32 to vector<8x64xf32>
    %220 = arith.subf %219, %218 : vector<8x64xf32>
    %221 = math.exp %220 : vector<8x64xf32>
    %222 = math.log1p %221 : vector<8x64xf32>
    %cst_96 = arith.constant 0.000000e+00 : f32
    %223 = vector.broadcast %cst_96 : f32 to vector<8x64xf32>
    %224 = arith.maximumf %216, %223 : vector<8x64xf32>
    %225 = arith.addf %222, %224 : vector<8x64xf32>
    %226 = math.tanh %225 : vector<8x64xf32>
    %227 = arith.mulf %216, %226 : vector<8x64xf32>
    %228 = arith.mulf %227, %217 : vector<8x64xf32>
    %229 = arith.truncf %228 : vector<8x64xf32> to vector<8x64xbf16>
    %c1_97 = arith.constant 1 : index
    %c0_98 = arith.constant 0 : index
    %c0_99 = arith.constant 0 : index
    %230 = vector.load %arg10[%c1_97, %c0_98, %c0_99] : memref<4x64x32xbf16, #tpu.memory_space<vmem>>, vector<1x64x32xbf16>
    %231 = vector.shape_cast %230 : vector<1x64x32xbf16> to vector<64x32xbf16>
    %cst_100 = arith.constant dense<0.000000e+00> : vector<8x32xf32>
    %232 = tpu.matmul %229, %231, %cst_100 {dimension_numbers = #tpu.dot_dimension_numbers<[1], [0], [0], [1], [0, 0, 1, 1], [], []>} : vector<8x64xbf16>, vector<64x32xbf16>, vector<8x32xf32> -> vector<8x32xf32>
    %233 = arith.addf %193, %232 : vector<8x32xf32>
    %c1_101 = arith.constant 1 : index
    %c0_102 = arith.constant 0 : index
    %c0_103 = arith.constant 0 : index
    %234 = vector.load %arg11[%c1_101, %c0_102, %c0_103] : memref<4x1x32xf32, #tpu.memory_space<vmem>>, vector<1x1x32xf32>
    %235 = vector.shape_cast %234 : vector<1x1x32xf32> to vector<1x32xf32>
    %236 = vector.broadcast %235 : vector<1x32xf32> to vector<8x32xf32>
    %237 = arith.addf %233, %236 : vector<8x32xf32>
    %238 = arith.mulf %237, %237 : vector<8x32xf32>
    %cst_104 = arith.constant dense<0.000000e+00> : vector<8xf32>
    %239 = vector.multi_reduction <add>, %238, %cst_104 [1] : vector<8x32xf32> to vector<8xf32>
    %240 = vector.shape_cast %239 : vector<8xf32> to vector<8x1xf32>
    %cst_105 = arith.constant 3.200000e+01 : f32
    %241 = vector.broadcast %cst_105 : f32 to vector<8x1xf32>
    %242 = arith.divf %240, %241 : vector<8x1xf32>
    %cst_106 = arith.constant 1.1920929E-7 : f32
    %243 = vector.broadcast %cst_106 : f32 to vector<8x1xf32>
    %244 = arith.addf %242, %243 : vector<8x1xf32>
    %245 = math.rsqrt %244 : vector<8x1xf32>
    %246 = vector.broadcast %245 : vector<8x1xf32> to vector<8x32xf32>
    %247 = arith.mulf %237, %246 : vector<8x32xf32>
    %c2 = arith.constant 2 : index
    %c0_107 = arith.constant 0 : index
    %c0_108 = arith.constant 0 : index
    %248 = vector.load %arg2[%c2, %c0_107, %c0_108] : memref<4x1x32xf32, #tpu.memory_space<vmem>>, vector<1x1x32xf32>
    %249 = vector.shape_cast %248 : vector<1x1x32xf32> to vector<1x32xf32>
    %250 = vector.broadcast %249 : vector<1x32xf32> to vector<8x32xf32>
    %251 = arith.mulf %247, %250 : vector<8x32xf32>
    %252 = arith.truncf %251 : vector<8x32xf32> to vector<8x32xbf16>
    %c2_109 = arith.constant 2 : index
    %c0_110 = arith.constant 0 : index
    %c0_111 = arith.constant 0 : index
    %253 = vector.load %arg3[%c2_109, %c0_110, %c0_111] : memref<4x32x96xbf16, #tpu.memory_space<vmem>>, vector<1x32x96xbf16>
    %254 = vector.shape_cast %253 : vector<1x32x96xbf16> to vector<32x96xbf16>
    %cst_112 = arith.constant dense<0.000000e+00> : vector<8x96xf32>
    %255 = tpu.matmul %252, %254, %cst_112 {dimension_numbers = #tpu.dot_dimension_numbers<[1], [0], [0], [1], [0, 0, 1, 1], [], []>} : vector<8x32xbf16>, vector<32x96xbf16>, vector<8x96xf32> -> vector<8x96xf32>
    %c2_113 = arith.constant 2 : index
    %c0_114 = arith.constant 0 : index
    %c0_115 = arith.constant 0 : index
    %256 = vector.load %arg4[%c2_113, %c0_114, %c0_115] : memref<4x1x96xf32, #tpu.memory_space<vmem>>, vector<1x1x96xf32>
    %257 = vector.shape_cast %256 : vector<1x1x96xf32> to vector<1x96xf32>
    %258 = vector.broadcast %257 : vector<1x96xf32> to vector<8x96xf32>
    %259 = arith.addf %255, %258 : vector<8x96xf32>
    %260 = vector.extract_strided_slice %259 {offsets = [0, 0], sizes = [8, 16], strides = [1, 1]} : vector<8x96xf32> to vector<8x16xf32>
    %261 = vector.extract_strided_slice %259 {offsets = [0, 32], sizes = [8, 16], strides = [1, 1]} : vector<8x96xf32> to vector<8x16xf32>
    %262 = vector.extract_strided_slice %259 {offsets = [0, 64], sizes = [8, 16], strides = [1, 1]} : vector<8x96xf32> to vector<8x16xf32>
    %263 = arith.truncf %260 : vector<8x16xf32> to vector<8x16xbf16>
    %264 = arith.truncf %261 : vector<8x16xf32> to vector<8x16xbf16>
    %cst_116 = arith.constant dense<0.000000e+00> : vector<8x8xf32>
    %265 = tpu.matmul %263, %264, %cst_116 {dimension_numbers = #tpu.dot_dimension_numbers<[1], [1], [0], [0], [0, 0, 1, 0], [], []>} : vector<8x16xbf16>, vector<8x16xbf16>, vector<8x8xf32> -> vector<8x8xf32>
    %cst_117 = arith.constant 2.500000e-01 : f32
    %266 = vector.broadcast %cst_117 : f32 to vector<8x8xf32>
    %267 = arith.mulf %265, %266 : vector<8x8xf32>
    %cst_118 = arith.constant dense<0xFF800000> : vector<8xf32>
    %268 = vector.multi_reduction <maximumf>, %267, %cst_118 [1] : vector<8x8xf32> to vector<8xf32>
    %269 = vector.shape_cast %268 : vector<8xf32> to vector<8x1xf32>
    %270 = vector.broadcast %269 : vector<8x1xf32> to vector<8x8xf32>
    %271 = arith.subf %267, %270 : vector<8x8xf32>
    %272 = math.exp %271 : vector<8x8xf32>
    %cst_119 = arith.constant dense<0.000000e+00> : vector<8xf32>
    %273 = vector.multi_reduction <add>, %272, %cst_119 [1] : vector<8x8xf32> to vector<8xf32>
    %274 = vector.shape_cast %273 : vector<8xf32> to vector<8x1xf32>
    %275 = tpu.reciprocal %274 {approx = true} : vector<8x1xf32> -> vector<8x1xf32>
    %276 = vector.broadcast %275 : vector<8x1xf32> to vector<8x8xf32>
    %277 = arith.mulf %272, %276 : vector<8x8xf32>
    %278 = arith.truncf %277 : vector<8x8xf32> to vector<8x8xbf16>
    %279 = arith.truncf %262 : vector<8x16xf32> to vector<8x16xbf16>
    %cst_120 = arith.constant dense<0.000000e+00> : vector<8x16xf32>
    %280 = tpu.matmul %278, %279, %cst_120 {dimension_numbers = #tpu.dot_dimension_numbers<[1], [0], [0], [1], [0, 0, 1, 1], [], []>} : vector<8x8xbf16>, vector<8x16xbf16>, vector<8x16xf32> -> vector<8x16xf32>
    %281 = vector.extract_strided_slice %259 {offsets = [0, 16], sizes = [8, 16], strides = [1, 1]} : vector<8x96xf32> to vector<8x16xf32>
    %282 = vector.extract_strided_slice %259 {offsets = [0, 48], sizes = [8, 16], strides = [1, 1]} : vector<8x96xf32> to vector<8x16xf32>
    %283 = vector.extract_strided_slice %259 {offsets = [0, 80], sizes = [8, 16], strides = [1, 1]} : vector<8x96xf32> to vector<8x16xf32>
    %284 = arith.truncf %281 : vector<8x16xf32> to vector<8x16xbf16>
    %285 = arith.truncf %282 : vector<8x16xf32> to vector<8x16xbf16>
    %cst_121 = arith.constant dense<0.000000e+00> : vector<8x8xf32>
    %286 = tpu.matmul %284, %285, %cst_121 {dimension_numbers = #tpu.dot_dimension_numbers<[1], [1], [0], [0], [0, 0, 1, 0], [], []>} : vector<8x16xbf16>, vector<8x16xbf16>, vector<8x8xf32> -> vector<8x8xf32>
    %cst_122 = arith.constant 2.500000e-01 : f32
    %287 = vector.broadcast %cst_122 : f32 to vector<8x8xf32>
    %288 = arith.mulf %286, %287 : vector<8x8xf32>
    %cst_123 = arith.constant dense<0xFF800000> : vector<8xf32>
    %289 = vector.multi_reduction <maximumf>, %288, %cst_123 [1] : vector<8x8xf32> to vector<8xf32>
    %290 = vector.shape_cast %289 : vector<8xf32> to vector<8x1xf32>
    %291 = vector.broadcast %290 : vector<8x1xf32> to vector<8x8xf32>
    %292 = arith.subf %288, %291 : vector<8x8xf32>
    %293 = math.exp %292 : vector<8x8xf32>
    %cst_124 = arith.constant dense<0.000000e+00> : vector<8xf32>
    %294 = vector.multi_reduction <add>, %293, %cst_124 [1] : vector<8x8xf32> to vector<8xf32>
    %295 = vector.shape_cast %294 : vector<8xf32> to vector<8x1xf32>
    %296 = tpu.reciprocal %295 {approx = true} : vector<8x1xf32> -> vector<8x1xf32>
    %297 = vector.broadcast %296 : vector<8x1xf32> to vector<8x8xf32>
    %298 = arith.mulf %293, %297 : vector<8x8xf32>
    %299 = arith.truncf %298 : vector<8x8xf32> to vector<8x8xbf16>
    %300 = arith.truncf %283 : vector<8x16xf32> to vector<8x16xbf16>
    %cst_125 = arith.constant dense<0.000000e+00> : vector<8x16xf32>
    %301 = tpu.matmul %299, %300, %cst_125 {dimension_numbers = #tpu.dot_dimension_numbers<[1], [0], [0], [1], [0, 0, 1, 1], [], []>} : vector<8x8xbf16>, vector<8x16xbf16>, vector<8x16xf32> -> vector<8x16xf32>
    %302 = tpu.concatenate %280, %301 in 1 : vector<8x16xf32>, vector<8x16xf32> -> vector<8x32xf32>
    %303 = arith.truncf %302 : vector<8x32xf32> to vector<8x32xbf16>
    %c2_126 = arith.constant 2 : index
    %c0_127 = arith.constant 0 : index
    %c0_128 = arith.constant 0 : index
    %304 = vector.load %arg5[%c2_126, %c0_127, %c0_128] : memref<4x32x32xbf16, #tpu.memory_space<vmem>>, vector<1x32x32xbf16>
    %305 = vector.shape_cast %304 : vector<1x32x32xbf16> to vector<32x32xbf16>
    %cst_129 = arith.constant dense<0.000000e+00> : vector<8x32xf32>
    %306 = tpu.matmul %303, %305, %cst_129 {dimension_numbers = #tpu.dot_dimension_numbers<[1], [0], [0], [1], [0, 0, 1, 1], [], []>} : vector<8x32xbf16>, vector<32x32xbf16>, vector<8x32xf32> -> vector<8x32xf32>
    %307 = arith.addf %237, %306 : vector<8x32xf32>
    %c2_130 = arith.constant 2 : index
    %c0_131 = arith.constant 0 : index
    %c0_132 = arith.constant 0 : index
    %308 = vector.load %arg6[%c2_130, %c0_131, %c0_132] : memref<4x1x32xf32, #tpu.memory_space<vmem>>, vector<1x1x32xf32>
    %309 = vector.shape_cast %308 : vector<1x1x32xf32> to vector<1x32xf32>
    %310 = vector.broadcast %309 : vector<1x32xf32> to vector<8x32xf32>
    %311 = arith.addf %307, %310 : vector<8x32xf32>
    %312 = arith.mulf %311, %311 : vector<8x32xf32>
    %cst_133 = arith.constant dense<0.000000e+00> : vector<8xf32>
    %313 = vector.multi_reduction <add>, %312, %cst_133 [1] : vector<8x32xf32> to vector<8xf32>
    %314 = vector.shape_cast %313 : vector<8xf32> to vector<8x1xf32>
    %cst_134 = arith.constant 3.200000e+01 : f32
    %315 = vector.broadcast %cst_134 : f32 to vector<8x1xf32>
    %316 = arith.divf %314, %315 : vector<8x1xf32>
    %cst_135 = arith.constant 1.1920929E-7 : f32
    %317 = vector.broadcast %cst_135 : f32 to vector<8x1xf32>
    %318 = arith.addf %316, %317 : vector<8x1xf32>
    %319 = math.rsqrt %318 : vector<8x1xf32>
    %320 = vector.broadcast %319 : vector<8x1xf32> to vector<8x32xf32>
    %321 = arith.mulf %311, %320 : vector<8x32xf32>
    %c2_136 = arith.constant 2 : index
    %c0_137 = arith.constant 0 : index
    %c0_138 = arith.constant 0 : index
    %322 = vector.load %arg7[%c2_136, %c0_137, %c0_138] : memref<4x1x32xf32, #tpu.memory_space<vmem>>, vector<1x1x32xf32>
    %323 = vector.shape_cast %322 : vector<1x1x32xf32> to vector<1x32xf32>
    %324 = vector.broadcast %323 : vector<1x32xf32> to vector<8x32xf32>
    %325 = arith.mulf %321, %324 : vector<8x32xf32>
    %326 = arith.truncf %325 : vector<8x32xf32> to vector<8x32xbf16>
    %c2_139 = arith.constant 2 : index
    %c0_140 = arith.constant 0 : index
    %c0_141 = arith.constant 0 : index
    %327 = vector.load %arg8[%c2_139, %c0_140, %c0_141] : memref<4x32x128xbf16, #tpu.memory_space<vmem>>, vector<1x32x128xbf16>
    %328 = vector.shape_cast %327 : vector<1x32x128xbf16> to vector<32x128xbf16>
    %cst_142 = arith.constant dense<0.000000e+00> : vector<8x128xf32>
    %329 = tpu.matmul %326, %328, %cst_142 {dimension_numbers = #tpu.dot_dimension_numbers<[1], [0], [0], [1], [0, 0, 1, 1], [], []>} : vector<8x32xbf16>, vector<32x128xbf16>, vector<8x128xf32> -> vector<8x128xf32>
    %c2_143 = arith.constant 2 : index
    %c0_144 = arith.constant 0 : index
    %c0_145 = arith.constant 0 : index
    %330 = vector.load %arg9[%c2_143, %c0_144, %c0_145] : memref<4x1x128xf32, #tpu.memory_space<vmem>>, vector<1x1x128xf32>
    %331 = vector.shape_cast %330 : vector<1x1x128xf32> to vector<1x128xf32>
    %332 = vector.broadcast %331 : vector<1x128xf32> to vector<8x128xf32>
    %333 = arith.addf %329, %332 : vector<8x128xf32>
    %334 = vector.extract_strided_slice %333 {offsets = [0, 0], sizes = [8, 64], strides = [1, 1]} : vector<8x128xf32> to vector<8x64xf32>
    %335 = vector.extract_strided_slice %333 {offsets = [0, 64], sizes = [8, 64], strides = [1, 1]} : vector<8x128xf32> to vector<8x64xf32>
    %336 = math.absf %334 : vector<8x64xf32>
    %cst_146 = arith.constant 0.000000e+00 : f32
    %337 = vector.broadcast %cst_146 : f32 to vector<8x64xf32>
    %338 = arith.subf %337, %336 : vector<8x64xf32>
    %339 = math.exp %338 : vector<8x64xf32>
    %340 = math.log1p %339 : vector<8x64xf32>
    %cst_147 = arith.constant 0.000000e+00 : f32
    %341 = vector.broadcast %cst_147 : f32 to vector<8x64xf32>
    %342 = arith.maximumf %334, %341 : vector<8x64xf32>
    %343 = arith.addf %340, %342 : vector<8x64xf32>
    %344 = math.tanh %343 : vector<8x64xf32>
    %345 = arith.mulf %334, %344 : vector<8x64xf32>
    %346 = arith.mulf %345, %335 : vector<8x64xf32>
    %347 = arith.truncf %346 : vector<8x64xf32> to vector<8x64xbf16>
    %c2_148 = arith.constant 2 : index
    %c0_149 = arith.constant 0 : index
    %c0_150 = arith.constant 0 : index
    %348 = vector.load %arg10[%c2_148, %c0_149, %c0_150] : memref<4x64x32xbf16, #tpu.memory_space<vmem>>, vector<1x64x32xbf16>
    %349 = vector.shape_cast %348 : vector<1x64x32xbf16> to vector<64x32xbf16>
    %cst_151 = arith.constant dense<0.000000e+00> : vector<8x32xf32>
    %350 = tpu.matmul %347, %349, %cst_151 {dimension_numbers = #tpu.dot_dimension_numbers<[1], [0], [0], [1], [0, 0, 1, 1], [], []>} : vector<8x64xbf16>, vector<64x32xbf16>, vector<8x32xf32> -> vector<8x32xf32>
    %351 = arith.addf %311, %350 : vector<8x32xf32>
    %c2_152 = arith.constant 2 : index
    %c0_153 = arith.constant 0 : index
    %c0_154 = arith.constant 0 : index
    %352 = vector.load %arg11[%c2_152, %c0_153, %c0_154] : memref<4x1x32xf32, #tpu.memory_space<vmem>>, vector<1x1x32xf32>
    %353 = vector.shape_cast %352 : vector<1x1x32xf32> to vector<1x32xf32>
    %354 = vector.broadcast %353 : vector<1x32xf32> to vector<8x32xf32>
    %355 = arith.addf %351, %354 : vector<8x32xf32>
    %356 = arith.mulf %355, %355 : vector<8x32xf32>
    %cst_155 = arith.constant dense<0.000000e+00> : vector<8xf32>
    %357 = vector.multi_reduction <add>, %356, %cst_155 [1] : vector<8x32xf32> to vector<8xf32>
    %358 = vector.shape_cast %357 : vector<8xf32> to vector<8x1xf32>
    %cst_156 = arith.constant 3.200000e+01 : f32
    %359 = vector.broadcast %cst_156 : f32 to vector<8x1xf32>
    %360 = arith.divf %358, %359 : vector<8x1xf32>
    %cst_157 = arith.constant 1.1920929E-7 : f32
    %361 = vector.broadcast %cst_157 : f32 to vector<8x1xf32>
    %362 = arith.addf %360, %361 : vector<8x1xf32>
    %363 = math.rsqrt %362 : vector<8x1xf32>
    %364 = vector.broadcast %363 : vector<8x1xf32> to vector<8x32xf32>
    %365 = arith.mulf %355, %364 : vector<8x32xf32>
    %c3 = arith.constant 3 : index
    %c0_158 = arith.constant 0 : index
    %c0_159 = arith.constant 0 : index
    %366 = vector.load %arg2[%c3, %c0_158, %c0_159] : memref<4x1x32xf32, #tpu.memory_space<vmem>>, vector<1x1x32xf32>
    %367 = vector.shape_cast %366 : vector<1x1x32xf32> to vector<1x32xf32>
    %368 = vector.broadcast %367 : vector<1x32xf32> to vector<8x32xf32>
    %369 = arith.mulf %365, %368 : vector<8x32xf32>
    %370 = arith.truncf %369 : vector<8x32xf32> to vector<8x32xbf16>
    %c3_160 = arith.constant 3 : index
    %c0_161 = arith.constant 0 : index
    %c0_162 = arith.constant 0 : index
    %371 = vector.load %arg3[%c3_160, %c0_161, %c0_162] : memref<4x32x96xbf16, #tpu.memory_space<vmem>>, vector<1x32x96xbf16>
    %372 = vector.shape_cast %371 : vector<1x32x96xbf16> to vector<32x96xbf16>
    %cst_163 = arith.constant dense<0.000000e+00> : vector<8x96xf32>
    %373 = tpu.matmul %370, %372, %cst_163 {dimension_numbers = #tpu.dot_dimension_numbers<[1], [0], [0], [1], [0, 0, 1, 1], [], []>} : vector<8x32xbf16>, vector<32x96xbf16>, vector<8x96xf32> -> vector<8x96xf32>
    %c3_164 = arith.constant 3 : index
    %c0_165 = arith.constant 0 : index
    %c0_166 = arith.constant 0 : index
    %374 = vector.load %arg4[%c3_164, %c0_165, %c0_166] : memref<4x1x96xf32, #tpu.memory_space<vmem>>, vector<1x1x96xf32>
    %375 = vector.shape_cast %374 : vector<1x1x96xf32> to vector<1x96xf32>
    %376 = vector.broadcast %375 : vector<1x96xf32> to vector<8x96xf32>
    %377 = arith.addf %373, %376 : vector<8x96xf32>
    %378 = vector.extract_strided_slice %377 {offsets = [0, 0], sizes = [8, 16], strides = [1, 1]} : vector<8x96xf32> to vector<8x16xf32>
    %379 = vector.extract_strided_slice %377 {offsets = [0, 32], sizes = [8, 16], strides = [1, 1]} : vector<8x96xf32> to vector<8x16xf32>
    %380 = vector.extract_strided_slice %377 {offsets = [0, 64], sizes = [8, 16], strides = [1, 1]} : vector<8x96xf32> to vector<8x16xf32>
    %381 = arith.truncf %378 : vector<8x16xf32> to vector<8x16xbf16>
    %382 = arith.truncf %379 : vector<8x16xf32> to vector<8x16xbf16>
    %cst_167 = arith.constant dense<0.000000e+00> : vector<8x8xf32>
    %383 = tpu.matmul %381, %382, %cst_167 {dimension_numbers = #tpu.dot_dimension_numbers<[1], [1], [0], [0], [0, 0, 1, 0], [], []>} : vector<8x16xbf16>, vector<8x16xbf16>, vector<8x8xf32> -> vector<8x8xf32>
    %cst_168 = arith.constant 2.500000e-01 : f32
    %384 = vector.broadcast %cst_168 : f32 to vector<8x8xf32>
    %385 = arith.mulf %383, %384 : vector<8x8xf32>
    %cst_169 = arith.constant dense<0xFF800000> : vector<8xf32>
    %386 = vector.multi_reduction <maximumf>, %385, %cst_169 [1] : vector<8x8xf32> to vector<8xf32>
    %387 = vector.shape_cast %386 : vector<8xf32> to vector<8x1xf32>
    %388 = vector.broadcast %387 : vector<8x1xf32> to vector<8x8xf32>
    %389 = arith.subf %385, %388 : vector<8x8xf32>
    %390 = math.exp %389 : vector<8x8xf32>
    %cst_170 = arith.constant dense<0.000000e+00> : vector<8xf32>
    %391 = vector.multi_reduction <add>, %390, %cst_170 [1] : vector<8x8xf32> to vector<8xf32>
    %392 = vector.shape_cast %391 : vector<8xf32> to vector<8x1xf32>
    %393 = tpu.reciprocal %392 {approx = true} : vector<8x1xf32> -> vector<8x1xf32>
    %394 = vector.broadcast %393 : vector<8x1xf32> to vector<8x8xf32>
    %395 = arith.mulf %390, %394 : vector<8x8xf32>
    %396 = arith.truncf %395 : vector<8x8xf32> to vector<8x8xbf16>
    %397 = arith.truncf %380 : vector<8x16xf32> to vector<8x16xbf16>
    %cst_171 = arith.constant dense<0.000000e+00> : vector<8x16xf32>
    %398 = tpu.matmul %396, %397, %cst_171 {dimension_numbers = #tpu.dot_dimension_numbers<[1], [0], [0], [1], [0, 0, 1, 1], [], []>} : vector<8x8xbf16>, vector<8x16xbf16>, vector<8x16xf32> -> vector<8x16xf32>
    %399 = vector.extract_strided_slice %377 {offsets = [0, 16], sizes = [8, 16], strides = [1, 1]} : vector<8x96xf32> to vector<8x16xf32>
    %400 = vector.extract_strided_slice %377 {offsets = [0, 48], sizes = [8, 16], strides = [1, 1]} : vector<8x96xf32> to vector<8x16xf32>
    %401 = vector.extract_strided_slice %377 {offsets = [0, 80], sizes = [8, 16], strides = [1, 1]} : vector<8x96xf32> to vector<8x16xf32>
    %402 = arith.truncf %399 : vector<8x16xf32> to vector<8x16xbf16>
    %403 = arith.truncf %400 : vector<8x16xf32> to vector<8x16xbf16>
    %cst_172 = arith.constant dense<0.000000e+00> : vector<8x8xf32>
    %404 = tpu.matmul %402, %403, %cst_172 {dimension_numbers = #tpu.dot_dimension_numbers<[1], [1], [0], [0], [0, 0, 1, 0], [], []>} : vector<8x16xbf16>, vector<8x16xbf16>, vector<8x8xf32> -> vector<8x8xf32>
    %cst_173 = arith.constant 2.500000e-01 : f32
    %405 = vector.broadcast %cst_173 : f32 to vector<8x8xf32>
    %406 = arith.mulf %404, %405 : vector<8x8xf32>
    %cst_174 = arith.constant dense<0xFF800000> : vector<8xf32>
    %407 = vector.multi_reduction <maximumf>, %406, %cst_174 [1] : vector<8x8xf32> to vector<8xf32>
    %408 = vector.shape_cast %407 : vector<8xf32> to vector<8x1xf32>
    %409 = vector.broadcast %408 : vector<8x1xf32> to vector<8x8xf32>
    %410 = arith.subf %406, %409 : vector<8x8xf32>
    %411 = math.exp %410 : vector<8x8xf32>
    %cst_175 = arith.constant dense<0.000000e+00> : vector<8xf32>
    %412 = vector.multi_reduction <add>, %411, %cst_175 [1] : vector<8x8xf32> to vector<8xf32>
    %413 = vector.shape_cast %412 : vector<8xf32> to vector<8x1xf32>
    %414 = tpu.reciprocal %413 {approx = true} : vector<8x1xf32> -> vector<8x1xf32>
    %415 = vector.broadcast %414 : vector<8x1xf32> to vector<8x8xf32>
    %416 = arith.mulf %411, %415 : vector<8x8xf32>
    %417 = arith.truncf %416 : vector<8x8xf32> to vector<8x8xbf16>
    %418 = arith.truncf %401 : vector<8x16xf32> to vector<8x16xbf16>
    %cst_176 = arith.constant dense<0.000000e+00> : vector<8x16xf32>
    %419 = tpu.matmul %417, %418, %cst_176 {dimension_numbers = #tpu.dot_dimension_numbers<[1], [0], [0], [1], [0, 0, 1, 1], [], []>} : vector<8x8xbf16>, vector<8x16xbf16>, vector<8x16xf32> -> vector<8x16xf32>
    %420 = tpu.concatenate %398, %419 in 1 : vector<8x16xf32>, vector<8x16xf32> -> vector<8x32xf32>
    %421 = arith.truncf %420 : vector<8x32xf32> to vector<8x32xbf16>
    %c3_177 = arith.constant 3 : index
    %c0_178 = arith.constant 0 : index
    %c0_179 = arith.constant 0 : index
    %422 = vector.load %arg5[%c3_177, %c0_178, %c0_179] : memref<4x32x32xbf16, #tpu.memory_space<vmem>>, vector<1x32x32xbf16>
    %423 = vector.shape_cast %422 : vector<1x32x32xbf16> to vector<32x32xbf16>
    %cst_180 = arith.constant dense<0.000000e+00> : vector<8x32xf32>
    %424 = tpu.matmul %421, %423, %cst_180 {dimension_numbers = #tpu.dot_dimension_numbers<[1], [0], [0], [1], [0, 0, 1, 1], [], []>} : vector<8x32xbf16>, vector<32x32xbf16>, vector<8x32xf32> -> vector<8x32xf32>
    %425 = arith.addf %355, %424 : vector<8x32xf32>
    %c3_181 = arith.constant 3 : index
    %c0_182 = arith.constant 0 : index
    %c0_183 = arith.constant 0 : index
    %426 = vector.load %arg6[%c3_181, %c0_182, %c0_183] : memref<4x1x32xf32, #tpu.memory_space<vmem>>, vector<1x1x32xf32>
    %427 = vector.shape_cast %426 : vector<1x1x32xf32> to vector<1x32xf32>
    %428 = vector.broadcast %427 : vector<1x32xf32> to vector<8x32xf32>
    %429 = arith.addf %425, %428 : vector<8x32xf32>
    %430 = arith.mulf %429, %429 : vector<8x32xf32>
    %cst_184 = arith.constant dense<0.000000e+00> : vector<8xf32>
    %431 = vector.multi_reduction <add>, %430, %cst_184 [1] : vector<8x32xf32> to vector<8xf32>
    %432 = vector.shape_cast %431 : vector<8xf32> to vector<8x1xf32>
    %cst_185 = arith.constant 3.200000e+01 : f32
    %433 = vector.broadcast %cst_185 : f32 to vector<8x1xf32>
    %434 = arith.divf %432, %433 : vector<8x1xf32>
    %cst_186 = arith.constant 1.1920929E-7 : f32
    %435 = vector.broadcast %cst_186 : f32 to vector<8x1xf32>
    %436 = arith.addf %434, %435 : vector<8x1xf32>
    %437 = math.rsqrt %436 : vector<8x1xf32>
    %438 = vector.broadcast %437 : vector<8x1xf32> to vector<8x32xf32>
    %439 = arith.mulf %429, %438 : vector<8x32xf32>
    %c3_187 = arith.constant 3 : index
    %c0_188 = arith.constant 0 : index
    %c0_189 = arith.constant 0 : index
    %440 = vector.load %arg7[%c3_187, %c0_188, %c0_189] : memref<4x1x32xf32, #tpu.memory_space<vmem>>, vector<1x1x32xf32>
    %441 = vector.shape_cast %440 : vector<1x1x32xf32> to vector<1x32xf32>
    %442 = vector.broadcast %441 : vector<1x32xf32> to vector<8x32xf32>
    %443 = arith.mulf %439, %442 : vector<8x32xf32>
    %444 = arith.truncf %443 : vector<8x32xf32> to vector<8x32xbf16>
    %c3_190 = arith.constant 3 : index
    %c0_191 = arith.constant 0 : index
    %c0_192 = arith.constant 0 : index
    %445 = vector.load %arg8[%c3_190, %c0_191, %c0_192] : memref<4x32x128xbf16, #tpu.memory_space<vmem>>, vector<1x32x128xbf16>
    %446 = vector.shape_cast %445 : vector<1x32x128xbf16> to vector<32x128xbf16>
    %cst_193 = arith.constant dense<0.000000e+00> : vector<8x128xf32>
    %447 = tpu.matmul %444, %446, %cst_193 {dimension_numbers = #tpu.dot_dimension_numbers<[1], [0], [0], [1], [0, 0, 1, 1], [], []>} : vector<8x32xbf16>, vector<32x128xbf16>, vector<8x128xf32> -> vector<8x128xf32>
    %c3_194 = arith.constant 3 : index
    %c0_195 = arith.constant 0 : index
    %c0_196 = arith.constant 0 : index
    %448 = vector.load %arg9[%c3_194, %c0_195, %c0_196] : memref<4x1x128xf32, #tpu.memory_space<vmem>>, vector<1x1x128xf32>
    %449 = vector.shape_cast %448 : vector<1x1x128xf32> to vector<1x128xf32>
    %450 = vector.broadcast %449 : vector<1x128xf32> to vector<8x128xf32>
    %451 = arith.addf %447, %450 : vector<8x128xf32>
    %452 = vector.extract_strided_slice %451 {offsets = [0, 0], sizes = [8, 64], strides = [1, 1]} : vector<8x128xf32> to vector<8x64xf32>
    %453 = vector.extract_strided_slice %451 {offsets = [0, 64], sizes = [8, 64], strides = [1, 1]} : vector<8x128xf32> to vector<8x64xf32>
    %454 = math.absf %452 : vector<8x64xf32>
    %cst_197 = arith.constant 0.000000e+00 : f32
    %455 = vector.broadcast %cst_197 : f32 to vector<8x64xf32>
    %456 = arith.subf %455, %454 : vector<8x64xf32>
    %457 = math.exp %456 : vector<8x64xf32>
    %458 = math.log1p %457 : vector<8x64xf32>
    %cst_198 = arith.constant 0.000000e+00 : f32
    %459 = vector.broadcast %cst_198 : f32 to vector<8x64xf32>
    %460 = arith.maximumf %452, %459 : vector<8x64xf32>
    %461 = arith.addf %458, %460 : vector<8x64xf32>
    %462 = math.tanh %461 : vector<8x64xf32>
    %463 = arith.mulf %452, %462 : vector<8x64xf32>
    %464 = arith.mulf %463, %453 : vector<8x64xf32>
    %465 = arith.truncf %464 : vector<8x64xf32> to vector<8x64xbf16>
    %c3_199 = arith.constant 3 : index
    %c0_200 = arith.constant 0 : index
    %c0_201 = arith.constant 0 : index
    %466 = vector.load %arg10[%c3_199, %c0_200, %c0_201] : memref<4x64x32xbf16, #tpu.memory_space<vmem>>, vector<1x64x32xbf16>
    %467 = vector.shape_cast %466 : vector<1x64x32xbf16> to vector<64x32xbf16>
    %cst_202 = arith.constant dense<0.000000e+00> : vector<8x32xf32>
    %468 = tpu.matmul %465, %467, %cst_202 {dimension_numbers = #tpu.dot_dimension_numbers<[1], [0], [0], [1], [0, 0, 1, 1], [], []>} : vector<8x64xbf16>, vector<64x32xbf16>, vector<8x32xf32> -> vector<8x32xf32>
    %469 = arith.addf %429, %468 : vector<8x32xf32>
    %c3_203 = arith.constant 3 : index
    %c0_204 = arith.constant 0 : index
    %c0_205 = arith.constant 0 : index
    %470 = vector.load %arg11[%c3_203, %c0_204, %c0_205] : memref<4x1x32xf32, #tpu.memory_space<vmem>>, vector<1x1x32xf32>
    %471 = vector.shape_cast %470 : vector<1x1x32xf32> to vector<1x32xf32>
    %472 = vector.broadcast %471 : vector<1x32xf32> to vector<8x32xf32>
    %473 = arith.addf %469, %472 : vector<8x32xf32>
    %c0_206 = arith.constant 0 : index
    %c0_207 = arith.constant 0 : index
    %c0_208 = arith.constant 0 : index
    %474 = vector.load %arg12[%c0_206, %c0_207, %c0_208] : memref<1x8x32xf32, #tpu.memory_space<vmem>>, vector<1x8x32xf32>
    %475 = vector.shape_cast %474 : vector<1x8x32xf32> to vector<8x32xf32>
    %476 = vector.shape_cast %473 : vector<8x32xf32> to vector<1x8x32xf32>
    tpu.vector_store %arg12[%c0_206, %c0_207, %c0_208], %476 {strides = array<i32>} : memref<1x8x32xf32, #tpu.memory_space<vmem>>, vector<1x8x32xf32>,
    return
  }
  func.func @transform_0(%arg0: i32) -> (i32, i32, i32) {
    %c0_i32 = arith.constant 0 : i32
    %c0_i32_0 = arith.constant 0 : i32
    %c0_i32_1 = arith.constant 0 : i32
    return %arg0, %c0_i32, %c0_i32_0 : i32, i32, i32
  }
  func.func @transform_1(%arg0: i32) -> (i32, i32, i32) {
    %c0_i32 = arith.constant 0 : i32
    %c0_i32_0 = arith.constant 0 : i32
    %c0_i32_1 = arith.constant 0 : i32
    %c0_i32_2 = arith.constant 0 : i32
    return %c0_i32, %c0_i32_0, %c0_i32_1 : i32, i32, i32
  }
  func.func @transform_2(%arg0: i32) -> (i32, i32, i32) {
    %c0_i32 = arith.constant 0 : i32
    %c0_i32_0 = arith.constant 0 : i32
    %c0_i32_1 = arith.constant 0 : i32
    %c0_i32_2 = arith.constant 0 : i32
    return %c0_i32, %c0_i32_0, %c0_i32_1 : i32, i32, i32
  }
  func.func @transform_3(%arg0: i32) -> (i32, i32, i32) {
    %c0_i32 = arith.constant 0 : i32
    %c0_i32_0 = arith.constant 0 : i32
    %c0_i32_1 = arith.constant 0 : i32
    %c0_i32_2 = arith.constant 0 : i32
    return %c0_i32, %c0_i32_0, %c0_i32_1 : i32, i32, i32
  }
  func.func @transform_4(%arg0: i32) -> (i32, i32, i32) {
    %c0_i32 = arith.constant 0 : i32
    %c0_i32_0 = arith.constant 0 : i32
    %c0_i32_1 = arith.constant 0 : i32
    %c0_i32_2 = arith.constant 0 : i32
    return %c0_i32, %c0_i32_0, %c0_i32_1 : i32, i32, i32
  }
  func.func @transform_5(%arg0: i32) -> (i32, i32, i32) {
    %c0_i32 = arith.constant 0 : i32
    %c0_i32_0 = arith.constant 0 : i32
    %c0_i32_1 = arith.constant 0 : i32
    %c0_i32_2 = arith.constant 0 : i32
    return %c0_i32, %c0_i32_0, %c0_i32_1 : i32, i32, i32
  }
  func.func @transform_6(%arg0: i32) -> (i32, i32, i32) {
    %c0_i32 = arith.constant 0 : i32
    %c0_i32_0 = arith.constant 0 : i32
    %c0_i32_1 = arith.constant 0 : i32
    %c0_i32_2 = arith.constant 0 : i32
    return %c0_i32, %c0_i32_0, %c0_i32_1 : i32, i32, i32
  }
  func.func @transform_7(%arg0: i32) -> (i32, i32, i32) {
    %c0_i32 = arith.constant 0 : i32
    %c0_i32_0 = arith.constant 0 : i32
    %c0_i32_1 = arith.constant 0 : i32
    %c0_i32_2 = arith.constant 0 : i32
    return %c0_i32, %c0_i32_0, %c0_i32_1 : i32, i32, i32
  }
  func.func @transform_8(%arg0: i32) -> (i32, i32, i32) {
    %c0_i32 = arith.constant 0 : i32
    %c0_i32_0 = arith.constant 0 : i32
    %c0_i32_1 = arith.constant 0 : i32
    %c0_i32_2 = arith.constant 0 : i32
    return %c0_i32, %c0_i32_0, %c0_i32_1 : i32, i32, i32
  }
  func.func @transform_9(%arg0: i32) -> (i32, i32, i32) {
    %c0_i32 = arith.constant 0 : i32
    %c0_i32_0 = arith.constant 0 : i32
    %c0_i32_1 = arith.constant 0 : i32
    %c0_i32_2 = arith.constant 0 : i32
    return %c0_i32, %c0_i32_0, %c0_i32_1 : i32, i32, i32
  }
  func.func @transform_10(%arg0: i32) -> (i32, i32, i32) {
    %c0_i32 = arith.constant 0 : i32
    %c0_i32_0 = arith.constant 0 : i32
    %c0_i32_1 = arith.constant 0 : i32
    %c0_i32_2 = arith.constant 0 : i32
    return %c0_i32, %c0_i32_0, %c0_i32_1 : i32, i32, i32
  }
  func.func @transform_11(%arg0: i32) -> (i32, i32, i32) {
    %c0_i32 = arith.constant 0 : i32
    %c0_i32_0 = arith.constant 0 : i32
    %c0_i32_1 = arith.constant 0 : i32
    return %arg0, %c0_i32, %c0_i32_0 : i32, i32, i32
  }
}

module attributes {stable_mosaic.version = 11 : i64} {
  func.func @_out_head_kernel(%arg0: i32, %arg1: i32, %arg2: memref<1x8x32xf32, #tpu.memory_space<vmem>>, %arg3: memref<8x32xf32, #tpu.memory_space<vmem>>, %arg4: memref<32x48xbf16, #tpu.memory_space<vmem>>, %arg5: memref<1x8x48xf32, #tpu.memory_space<vmem>>) attributes {dimension_semantics = [#tpu.dimension_semantics<parallel>, #tpu.dimension_semantics<parallel>], iteration_bounds = array<i64: 2, 1>, scalar_prefetch = 0 : i64, scratch_operands = 0 : i64, tpu.core_type = #tpu.core_type<tc>, window_params = [{transform_indices = @transform_0, window_bounds = array<i64: 1, 8, 32>}, {transform_indices = @transform_1, window_bounds = array<i64: 8, 32>}, {pipeline_mode = #tpu.pipeline_mode<synchronous>, transform_indices = @transform_2, window_bounds = array<i64: 32, 48>}, {transform_indices = @transform_3, window_bounds = array<i64: 1, 8, 48>}]} {
    %c0 = arith.constant 0 : index
    %c0_0 = arith.constant 0 : index
    %c0_1 = arith.constant 0 : index
    %0 = vector.load %arg2[%c0, %c0_0, %c0_1] : memref<1x8x32xf32, #tpu.memory_space<vmem>>, vector<1x8x32xf32>
    %1 = vector.shape_cast %0 : vector<1x8x32xf32> to vector<8x32xf32>
    %c0_2 = arith.constant 0 : index
    %c0_3 = arith.constant 0 : index
    %2 = vector.load %arg3[%c0_2, %c0_3] : memref<8x32xf32, #tpu.memory_space<vmem>>, vector<8x32xf32>
    %3 = arith.subf %1, %2 : vector<8x32xf32>
    %4 = arith.mulf %3, %3 : vector<8x32xf32>
    %cst = arith.constant dense<0.000000e+00> : vector<8xf32>
    %5 = vector.multi_reduction <add>, %4, %cst [1] : vector<8x32xf32> to vector<8xf32>
    %6 = vector.shape_cast %5 : vector<8xf32> to vector<8x1xf32>
    %cst_4 = arith.constant 3.200000e+01 : f32
    %7 = vector.broadcast %cst_4 : f32 to vector<8x1xf32>
    %8 = arith.divf %6, %7 : vector<8x1xf32>
    %cst_5 = arith.constant 1.1920929E-7 : f32
    %9 = vector.broadcast %cst_5 : f32 to vector<8x1xf32>
    %10 = arith.addf %8, %9 : vector<8x1xf32>
    %11 = math.rsqrt %10 : vector<8x1xf32>
    %12 = vector.broadcast %11 : vector<8x1xf32> to vector<8x32xf32>
    %13 = arith.mulf %3, %12 : vector<8x32xf32>
    %14 = arith.truncf %13 : vector<8x32xf32> to vector<8x32xbf16>
    %c0_6 = arith.constant 0 : index
    %c0_7 = arith.constant 0 : index
    %15 = vector.load %arg4[%c0_6, %c0_7] : memref<32x48xbf16, #tpu.memory_space<vmem>>, vector<32x48xbf16>
    %cst_8 = arith.constant dense<0.000000e+00> : vector<8x48xf32>
    %16 = tpu.matmul %14, %15, %cst_8 {dimension_numbers = #tpu.dot_dimension_numbers<[1], [0], [0], [1], [0, 0, 1, 1], [], []>} : vector<8x32xbf16>, vector<32x48xbf16>, vector<8x48xf32> -> vector<8x48xf32>
    %c0_9 = arith.constant 0 : index
    %c0_10 = arith.constant 0 : index
    %c0_11 = arith.constant 0 : index
    %17 = vector.load %arg5[%c0_9, %c0_10, %c0_11] : memref<1x8x48xf32, #tpu.memory_space<vmem>>, vector<1x8x48xf32>
    %18 = vector.shape_cast %17 : vector<1x8x48xf32> to vector<8x48xf32>
    %19 = vector.shape_cast %16 : vector<8x48xf32> to vector<1x8x48xf32>
    tpu.vector_store %arg5[%c0_9, %c0_10, %c0_11], %19 {strides = array<i32>} : memref<1x8x48xf32, #tpu.memory_space<vmem>>, vector<1x8x48xf32>,
    return
  }
  func.func @transform_0(%arg0: i32, %arg1: i32) -> (i32, i32, i32) {
    %c0_i32 = arith.constant 0 : i32
    %c0_i32_0 = arith.constant 0 : i32
    return %arg0, %arg1, %c0_i32 : i32, i32, i32
  }
  func.func @transform_1(%arg0: i32, %arg1: i32) -> (i32, i32) {
    %c0_i32 = arith.constant 0 : i32
    %c0_i32_0 = arith.constant 0 : i32
    return %arg1, %c0_i32 : i32, i32
  }
  func.func @transform_2(%arg0: i32, %arg1: i32) -> (i32, i32) {
    %c0_i32 = arith.constant 0 : i32
    %c0_i32_0 = arith.constant 0 : i32
    %c0_i32_1 = arith.constant 0 : i32
    return %c0_i32, %c0_i32_0 : i32, i32
  }
  func.func @transform_3(%arg0: i32, %arg1: i32) -> (i32, i32, i32) {
    %c0_i32 = arith.constant 0 : i32
    %c0_i32_0 = arith.constant 0 : i32
    return %arg0, %arg1, %c0_i32 : i32, i32, i32
  }
}

</mosaic_0001>

<bundles_post_ra>
// kernel: _lambda_.3
= control target key start
LH: loop header
LB: loop body
LE: loop exit
PB: predicated region body
PF: predicated region fallthrough
CT: control target
= control target key end

     0   :  { %s998_s12 = smov 0   ;;  %s1000_s13 = smov 0   ;;  %s1105_s0 = inlined_call_operand.vmem [shape: bf16[2,8,1024], index: 0, kind: input, shape index: {}]   ;;  %s1106_s1 = inlined_call_operand.vmem [shape: bf16[1024,32], index: 1, kind: input, shape index: {}]   ;;  %s1107_s2 = inlined_call_operand.vmem [shape: f32[8,32], index: 2, kind: input, shape index: {}]   ;;  %s1108_s3 = inlined_call_operand.vmem [shape: f32[2,8,32], index: 3, kind: output, shape index: {}]  }
   0x1   :  { %s1002_s14 = smov 0   ;;  %s1004_s15 = smov 0  }
   0x2   :  { %s1006_s16 = smov 0  }
   0x3 LB: > { %s25_s17 = sadd.s32 1, %s967_s14  ;;  %s32_s18 = sadd.s32 1, %s971_s15  ;;  %s975_s16 = sphi %s1006_s16, %s13_s16   ;;  %s971_s15 = sphi %s1004_s15, %s1112_s15   ;;  %s967_s14 = sphi %s1002_s14, %s1111_s14   ;;  %s963_s13 = sphi %s1000_s13, %s1110_s13   ;;  %s959_s12 = sphi %s998_s12, %s1109_s12  }
   0x4   : > { %p26_p0 = scmp.ge.s32.totalorder %s25_s17, 2  ;;  %p767_p1 = scmp.ge.s32.totalorder %s975_s16, 1 }
   0x5   : > { %p191_p2 = scmp.lt.s32.totalorder %s975_s16, 5 }
   0x6   : > { %s1114_s17 = smov (%p26_p0, %s25_s17), 0  ;;  %s1116_s18 = smov (!%p26_p0, %s32_s18), %s971_s15 }
   0x7   : > { %p192_p3 = pnand %p767_p1, %p191_p2  ;;  %p34_p4 = scmp.ge.s32.totalorder %s1116_s18, 2 }
   0x8   : > { %s768_s19 = sshll.u32 (!%p192_p3), %s959_s12, 2  ;;  %p235_p5 = scmp.lt.s32.totalorder (!%p192_p3), %s963_s13, 1 }
   0x9   : > { %s1118_s18 = smov (%p34_p4, %s1116_s18), 0  ;;  %195 = sbr.rel (%p192_p3) target bundleno = 455 (0x1c7), region = 32 }
   0xa   : > { %p239_p6 = scmp.lt.s32.totalorder (!%p192_p3), %s768_s19, 7  ;;  %s771_s20 = sshll.u32 (!%p192_p3), %s959_s12, 6 }
   0xb   : > { %p249_p7 = scmp.lt.s32.totalorder (!%p192_p3), %s771_s20, 127  ;;  %p774_p8 = scmp.ne.s32.totalorder (!%p192_p3), %s959_s12, 0 }
  0x10   : > { %s1120_s13 = smov (!%p235_p5, %s963_s13), 1  ;;  %s1122_s19 = smov (!%p239_p6, %s768_s19), 7 }
  0x11   : > { %s769_s21 = sshll.u32 %s1120_s13, 3  ;;  %s1124_s20 = smov (!%p249_p7, %s771_s20), 127  ;;  %vm270_vm0 = vcmask (!%p774_p8), 261120   ;;  %v977_v0 = vmov (!%p774_p8), 0.0  }
  0x12   : > { %s244_s22 = sadd.s32 %s769_s21, %s1122_s19  ;;  %s1035_s25 = scalar_lea.vmem %s1108_s3, %s769_s21  ;;  %271 = vst.msk [vmem:[#allocation2] sm:$0xff] (!%p774_p8), %vm270_vm0, %v977_v0 }
  0x13   : > { %s770_s26 = sshll.u32 %s244_s22, 2  ;;  %s772_s30 = sshll.u32 %s1124_s20, 2 }
  0x14   : > { %s1040_s29 = scalar_lea.vmem %s1105_s0, %s770_s26  ;;  %s1045_s6 = scalar_lea.vmem %s1106_s1, %s772_s30 }
  0x15   : > { %269 = sbr.rel (%p774_p8) target bundleno = 28 (0x1c), region = 36 }
  0x1c PF: > { %v899_v1 = vld [vmem:[%s1045_s6 + $0x40] sm:$0xff]   ;;  %v903_v5 = vld [vmem:[%s1045_s6 + $0x48] sm:$0xff]   ;;  %v907_v9 = vld [vmem:[%s1045_s6 + $0x50] sm:$0xff]   ;;  %vm626_vm1 = vcmask 261120   ;;  %p811_p9 = scmp.ne.s32.totalorder %s959_s12, 1 }
  0x1d   : > { %v900_v2 = vld [vmem:[%s1045_s6 + $0xc0] sm:$0xff]   ;;  %814 = vmatprep.subr.bf16.mxu0 %v899_v1  ;;  %v904_v6 = vld [vmem:[%s1045_s6 + $0xc8] sm:$0xff]   ;;  %v908_v10 = vld [vmem:[%s1045_s6 + $0xd0] sm:$0xff]  }
  0x1e   : > { %v901_v3 = vld [vmem:[%s1045_s6] sm:$0xff]   ;;  %836 = vmatprep.subr.bf16.mxu1 %v900_v2  ;;  %v905_v7 = vld [vmem:[%s1045_s6 + $0x8] sm:$0xff]   ;;  %v909_v11 = vld [vmem:[%s1045_s6 + $0x10] sm:$0xff]  }
  0x1f   : > { %v902_v4 = vld [vmem:[%s1045_s6 + $0x80] sm:$0xff]   ;;  %815 = vmatpush3.bf16.msra.mxu0 %v901_v3  ;;  %v906_v8 = vld [vmem:[%s1045_s6 + $0x88] sm:$0xff]   ;;  %v910_v12 = vld [vmem:[%s1045_s6 + $0x90] sm:$0xff]  }
  0x20   : > { %837 = vmatpush3.bf16.msra.mxu1 %v902_v4  ;;  %816 = vmatprep.subr.bf16.mxu0 %v903_v5  ;;  %v911_v13 = vld [vmem:[%s1045_s6 + $0x58] sm:$0xff]   ;;  %v915_v17 = vld [vmem:[%s1045_s6 + $0x60] sm:$0xff]   ;;  %v919_v21 = vld [vmem:[%s1045_s6 + $0x68] sm:$0xff]  }
  0x21   : > { %838 = vmatprep.subr.bf16.mxu1 %v904_v6  ;;  %v912_v14 = vld [vmem:[%s1045_s6 + $0xd8] sm:$0xff]   ;;  %v916_v18 = vld [vmem:[%s1045_s6 + $0xe0] sm:$0xff]   ;;  %v920_v22 = vld [vmem:[%s1045_s6 + $0xe8] sm:$0xff]  }
  0x22   : > { %v913_v15 = vld [vmem:[%s1045_s6 + $0x18] sm:$0xff]   ;;  %v917_v19 = vld [vmem:[%s1045_s6 + $0x20] sm:$0xff]   ;;  %v921_v23 = vld [vmem:[%s1045_s6 + $0x28] sm:$0xff]  }
  0x23   : > { %817 = vmatpush3.bf16.msra.mxu0 %v905_v7  ;;  %v914_v16 = vld [vmem:[%s1045_s6 + $0x98] sm:$0xff]   ;;  %v918_v20 = vld [vmem:[%s1045_s6 + $0xa0] sm:$0xff]   ;;  %v922_v24 = vld [vmem:[%s1045_s6 + $0xa8] sm:$0xff]  }
  0x24   : > { %839 = vmatpush3.bf16.msra.mxu1 %v906_v8  ;;  %818 = vmatprep.subr.bf16.mxu0 %v907_v9  ;;  %v923_v25 = vld [vmem:[%s1045_s6 + $0x70] sm:$0xff]   ;;  %v927_v29 = vld [vmem:[%s1045_s6 + $0x78] sm:$0xff]   ;;  %v273_v33 = vld [vmem:[%s1040_s29] sm:$0xff] }
  0x25   : > { %840 = vmatprep.subr.bf16.mxu1 %v908_v10  ;;  %v924_v26 = vld [vmem:[%s1045_s6 + $0xf0] sm:$0xff]   ;;  %v928_v30 = vld [vmem:[%s1045_s6 + $0xf8] sm:$0xff]   ;;  %v274_v34 = vld [vmem:[%s1040_s29 + $0x8] sm:$0xff]  ;;  %v775_v35 = vcombine.low %v273_v33, %v273_v33  ;;  %v776_v36 = vcombine.high %v273_v33, %v273_v33 }
  0x26   : > { %v925_v27 = vld [vmem:[%s1045_s6 + $0x30] sm:$0xff]   ;;  %v929_v31 = vld [vmem:[%s1045_s6 + $0x38] sm:$0xff]   ;;  %v777_v37 = vcombine.low %v274_v34, %v274_v34  ;;  %v778_v38 = vcombine.high %v274_v34, %v274_v34  ;;  %v272_v47 = vld [vmem:[#allocation2] sm:$0xff] }
  0x27   : > { %819 = vmatpush3.bf16.msra.mxu0 %v909_v11  ;;  %v926_v28 = vld [vmem:[%s1045_s6 + $0xb0] sm:$0xff]   ;;  %v930_v32 = vld [vmem:[%s1045_s6 + $0xb8] sm:$0xff]   ;;  %577 = vmatprep.mubr.bf16.mxu0 %v776_v36  ;;  %v642_v59 = vld [vmem:[%s1107_s2] sm:$0xff] (!%p811_p9) }
  0x28   : > { %841 = vmatpush3.bf16.msra.mxu1 %v910_v12  ;;  %820 = vmatprep.subr.bf16.mxu0 %v911_v13 }
  0x29   : > { %842 = vmatprep.subr.bf16.mxu1 %v912_v14  ;;  %617 = vmatprep.mubr.bf16.mxu1 %v778_v38 }
  0x2b   : > { %821 = vmatpush3.bf16.msra.mxu0 %v913_v15 }
  0x2c   : > { %843 = vmatpush3.bf16.msra.mxu1 %v914_v16  ;;  %822 = vmatprep.subr.bf16.mxu0 %v915_v17 }
  0x2d   : > { %844 = vmatprep.subr.bf16.mxu1 %v916_v18 }
  0x2f   : > { %823 = vmatpush3.bf16.msra.mxu0 %v917_v19 }
  0x30   : > { %845 = vmatpush3.bf16.msra.mxu1 %v918_v20  ;;  %824 = vmatprep.subr.bf16.mxu0 %v919_v21 }
  0x31   : > { %846 = vmatprep.subr.bf16.mxu1 %v920_v22 }
  0x33   : > { %825 = vmatpush3.bf16.msra.mxu0 %v921_v23 }
  0x34   : > { %847 = vmatpush3.bf16.msra.mxu1 %v922_v24  ;;  %826 = vmatprep.subr.bf16.mxu0 %v923_v25 }
  0x35   : > { %848 = vmatprep.subr.bf16.mxu1 %v924_v26 }
  0x37   : > { %827 = vmatpush3.bf16.msra.mxu0 %v925_v27 }
  0x38   : > { %849 = vmatpush3.bf16.msra.mxu1 %v926_v28  ;;  %828 = vmatprep.subr.bf16.mxu0 %v927_v29 }
  0x39   : > { %850 = vmatprep.subr.bf16.mxu1 %v928_v30 }
  0x3b   : > { %829 = vmatpush3.bf16.msra.mxu0 %v929_v31 }
  0x3c   : > { %851 = vmatpush3.bf16.msra.mxu1 %v930_v32 }
  0x3e   : > { %578 = vmatmul.mubr.bf16.vlgmr.msra.gmra.mrb[0].mxu0 %v775_v35 }
  0x3f   : > { %618 = vmatmul.mubr.bf16.vlgmr.msra.gmra.mrb[0].mxu1 %v777_v37 }
 0x111   : > { %v830_v39 = vpop.f32.mrb[0].mxu0 }
 0x112   : > { %v852_v40 = vpop.f32.mrb[0].mxu1  ;;  %v831_v41 = vpop.f32.mrb[1].mxu0 }
 0x113   : > { %v853_v42 = vpop.f32.mrb[1].mxu1  ;;  %v832_v43 = vadd.f32 %v831_v41, %v830_v39  ;;  %v833_v45 = vpop.f32.mrb[2].mxu0 }
 0x114   : > { %v854_v44 = vadd.f32 %v853_v42, %v852_v40  ;;  %v855_v46 = vpop.f32.mrb[2].mxu1  ;;  %v834_v48 = vpop.f32.mrb[3].mxu0  ;;  %631 = sbr.rel (%p811_p9) target bundleno = 455 (0x1c7), region = 40 }
 0x115   : > { %v856_v49 = vpop.f32.mrb[3].mxu1 }
 0x116   : > { %v620_v50 = vadd.f32 %v854_v44, %v832_v43 }
 0x118   : > { %v625_v51 = vadd.f32 %v620_v50, %v272_v47 }
 0x11a   : > { %627 = vst.msk [vmem:[#allocation2] sm:$0xff] %vm626_vm1, %v625_v51 }
 0x121   : > { %v632_v52 = vld [vmem:[#allocation2] sm:$0xff] }
 0x122   : > { %v633_v53 = vmul.f32 %v632_v52, %v632_v52 }
 0x124   : > { %v634_v54 = vsel %vm626_vm1, %v633_v53, 0.0 }
 0x125   : > { %635 = vadd.xlane.f32.xlu0 %v634_v54 }
 0x1b2   : > { %v636_v55 = vpop.xlane.xlu0 %635 }
 0x1b3   : > { %v638_v56 = vmul.f32 0.03125, %v636_v55 }
 0x1b5   : > { %v639_v57 = vadd.f32 1.1920929e-07, %v638_v56 }
 0x1b7   : > { %935 = vrsqrt.f32 %v639_v57 }
 0x1c1   : > { %v936_v58 = vpop.eup %935 }
 0x1c2   : > { %v641_v60 = vmul.f32 %v936_v58, %v632_v52 }
 0x1c4   : > { %v643_v61 = vadd.f32 %v642_v59, %v641_v60 }
 0x1c6   : > { %644 = vst.msk [vmem:[%s1035_s25] sm:$0xff] %vm626_vm1, %v643_v61 }
 0x1c7 PF: > { %s13_s16 = sadd.s32 1, %s975_s16   ;;  %s1109_s12 = smov %s967_s14 }
 0x1c8   : > { %p10_p10 = scmp.ge.s32.totalorder %s13_s16, 6   ;;  %s1110_s13 = smov %s971_s15 }
 0x1c9   : > { %s1111_s14 = smov %s1114_s17  ;;  %s1112_s15 = smov %s1118_s18 }
 0x1ca   :  { %12 = sbr.rel (!%p10_p10) target bundleno = 3 (0x3), region = 76 }

// kernel: _lambda_.5
= control target key start
LH: loop header
LB: loop body
LE: loop exit
PB: predicated region body
PF: predicated region fallthrough
CT: control target
= control target key end

     0   :  { %s480_s12 = smov 0   ;;  %s482_s13 = smov 0   ;;  %s524_s0 = inlined_call_operand.vmem [shape: f32[2,8,32], index: 0, kind: input, shape index: {}]   ;;  %s525_s1 = inlined_call_operand.vmem [shape: f32[8,32], index: 1, kind: input, shape index: {}]   ;;  %s526_s2 = inlined_call_operand.vmem [shape: bf16[32,48], index: 2, kind: input, shape index: {}]   ;;  %s527_s3 = inlined_call_operand.vmem [shape: f32[2,8,48], index: 3, kind: output, shape index: {}]  }
   0x1   :  { %s484_s14 = smov 0  }
   0x2 LB: > { %s25_s15 = sadd.s32 1, %s452_s13  ;;  %p385_p0 = scmp.ge.s32.totalorder %s456_s14, 1  ;;  %s456_s14 = sphi %s484_s14, %s13_s14   ;;  %s452_s13 = sphi %s482_s13, %s529_s13   ;;  %s448_s12 = sphi %s480_s12, %s528_s12  }
   0x3   : > { %p27_p1 = scmp.ge.s32.totalorder %s25_s15, 2  ;;  %p164_p2 = scmp.lt.s32.totalorder %s456_s14, 3 }
   0x5   : > { %s531_s15 = smov (%p27_p1, %s25_s15), 0  ;;  %p165_p3 = pnand %p385_p0, %p164_p2 }
   0x6   : > { %p196_p4 = scmp.lt.s32.totalorder (!%p165_p3), %s448_s12, 1  ;;  %v216_v0 = vld [vmem:[%s525_s1] sm:$0xff] (!%p165_p3)  ;;  %vm219_vm0 = vcmask (!%p165_p3), 261120   ;;  %v458_v6 = vmov (!%p165_p3), 0.0   ;;  %vm459_vm1 = vmmov (!%p165_p3), 0   ;;  %v431_v7 = vld [vmem:[%s526_s2 + $0x8] sm:$0xff] (!%p165_p3)  }
   0x7   : > { %168 = sbr.rel (%p165_p3) target bundleno = 399 (0x18f), region = 32  ;;  %v430_v5 = vld [vmem:[%s526_s2] sm:$0xff] (!%p165_p3)   ;;  %396 = vmatprep.subr.bf16.mxu0 (!%p165_p3), %v458_v6  ;;  %400 = vmatprep.mubr.msk.bf16.mxu0 (!%p165_p3), %vm459_vm1, %v458_v6  ;;  %vm288_vm2 = vcmask (!%p165_p3), 392192  }
   0x8   : > { %397 = vmatpush3.bf16.msra.mxu0 (!%p165_p3), %v430_v5 }
   0x9   : > { %398 = vmatprep.subr.bf16.mxu0 (!%p165_p3), %v458_v6 }
   0xc   : > { %399 = vmatpush3.bf16.msra.mxu0 (!%p165_p3), %v431_v7 }
   0xe   : > { %s533_s12 = smov (!%p196_p4, %s448_s12), 1 }
   0xf   : > { %s386_s16 = sshll.u32 %s533_s12, 3 }
  0x10   : > { %s202_s21 = scalar_lea.vmem %s524_s0, %s386_s16  ;;  %s213_s28 = scalar_lea.vmem %s527_s3, %s386_s16 }
  0x11   : > { %v215_v1 = vld [vmem:[%s202_s21] sm:$0xff] }
  0x12   : > { %v217_v2 = vsub.f32 %v215_v1, %v216_v0 }
  0x14   : > { %v218_v3 = vmul.f32 %v217_v2, %v217_v2 }
  0x16   : > { %v220_v4 = vsel %vm219_vm0, %v218_v3, 0.0 }
  0x17   : > { %221 = vadd.xlane.f32.xlu0 %v220_v4 }
  0xa4   : > { %v222_v8 = vpop.xlane.xlu0 %221 }
  0xa5   : > { %v224_v9 = vmul.f32 0.03125, %v222_v8 }
  0xa7   : > { %v225_v10 = vadd.f32 1.1920929e-07, %v224_v9 }
  0xa9   : > { %432 = vrsqrt.f32 %v225_v10 }
  0xb3   : > { %v433_v11 = vpop.eup %432 }
  0xb4   : > { %v227_v12 = vmul.f32 %v433_v11, %v217_v2 }
  0xb6   : > { %v228_v13 = vpack.c.bf16 %v227_v12, %v227_v12 }
  0xb8   : > { %401 = vmatmul.mubr.msk.bf16.vlgmr.msra.gmra.mrb[0].mxu0 %vm219_vm0, %v228_v13 }
 0x18b   : > { %v282_v14 = vpop.f32.mrb[0].mxu0 }
 0x18c   : > { %289 = vst.msk [vmem:[%s213_s28] sm:$0xff] %vm288_vm2, %v282_v14  ;;  %v402_v15 = vpop.f32.mrb[1].mxu0 }
 0x18d   : > { %v285_v16 = vpop.f32.mrb[2].mxu0 }
 0x18e   : > { %v403_v17 = vpop.f32.mrb[3].mxu0 }
 0x18f PF: > { %s13_s14 = sadd.s32 1, %s456_s14   ;;  %s528_s12 = smov %s452_s13 }
 0x190   : > { %p10_p5 = scmp.ge.s32.totalorder %s13_s14, 4   ;;  %s529_s13 = smov %s531_s15 }
 0x192   :  { %12 = sbr.rel (!%p10_p5) target bundleno = 2 (0x2), region = 65 }

// kernel: _lambda_.4
= control target key start
LH: loop header
LB: loop body
LE: loop exit
PB: predicated region body
PF: predicated region fallthrough
CT: control target
= control target key end

     0   :  { %s3465_s17 = smov 0   ;;  %s3954_s0 = inlined_call_operand.vmem [shape: f32[2,8,32], index: 0, kind: input, shape index: {}]   ;;  %s3955_s1 = inlined_call_operand.vmem [shape: f32[4,1,32], index: 1, kind: input, shape index: {}]   ;;  %s3956_s2 = inlined_call_operand.vmem [shape: bf16[4,32,96], index: 2, kind: input, shape index: {}]   ;;  %s3957_s3 = inlined_call_operand.vmem [shape: f32[4,1,96], index: 3, kind: input, shape index: {}]   ;;  %s3958_s4 = inlined_call_operand.vmem [shape: bf16[4,32,32], index: 4, kind: input, shape index: {}]   ;;  %s3959_s5 = inlined_call_operand.vmem [shape: f32[4,1,32], index: 5, kind: input, shape index: {}]   ;;  %s3960_s6 = inlined_call_operand.vmem [shape: f32[4,1,32], index: 6, kind: input, shape index: {}]   ;;  %s3961_s7 = inlined_call_operand.vmem [shape: bf16[4,32,128], index: 7, kind: input, shape index: {}]   ;;  %s3962_s8 = inlined_call_operand.vmem [shape: f32[4,1,128], index: 8, kind: input, shape index: {}]   ;;  %s3963_s9 = inlined_call_operand.vmem [shape: bf16[4,64,32], index: 9, kind: input, shape index: {}]   ;;  %s3964_s10 = inlined_call_operand.vmem [shape: f32[4,1,32], index: 10, kind: input, shape index: {}]   ;;  %s3965_s11 = inlined_call_operand.vmem [shape: f32[2,8,32], index: 11, kind: output, shape index: {}]  }
   0x1 LB: > { %s2750_s18 = sadd.s32 4294967295, %s3395_s17   ;;  %p2754_p0 = scmp.ge.s32.totalorder %s3395_s17, 1  ;;  %s3395_s17 = sphi %s3465_s17, %s21_s17  }
   0x2   : > { %p336_p1 = scmp.lt.s32.totalorder %s3395_s17, 3 }
   0x4   : > { %p337_p2 = pnand %p2754_p0, %p336_p1 }
   0x5   : > { %p374_p3 = scmp.lt.s32.totalorder (!%p337_p2), %s2750_s18, 1  ;;  %vm385_vm0 = vcmask (!%p337_p2), 261120   ;;  %v3277_v3 = vld [vmem:[%s3956_s2] sm:$0xff] (!%p337_p2)   ;;  %v3397_v4 = vmov (!%p337_p2), 0.0   ;;  %vm3398_vm1 = vmmov (!%p337_p2), 0   ;;  %v3278_v5 = vld [vmem:[%s3956_s2 + $0x8] sm:$0xff] (!%p337_p2)  }
   0x6   : > { %340 = sbr.rel (%p337_p2) target bundleno = 9235 (0x2413), region = 64  ;;  %3021 = vmatprep.subr.bf16.mxu1 (!%p337_p2), %v3397_v4  ;;  %3025 = vmatprep.mubr.msk.bf16.mxu1 (!%p337_p2), %vm3398_vm1, %v3397_v4  ;;  %v2757_v10 = vld [vmem:[%s3955_s1] ss:$0 sm:$0xff] (!%p337_p2)  ;;  %s3399_s12 = smov (!%p337_p2), 80   ;;  %vm473_vm2 = vcmask (!%p337_p2), 130048   ;;  %vm521_vm3 = vcmask (!%p337_p2), 64512  }
   0x7   : > { %3022 = vmatpush3.bf16.msra.mxu1 (!%p337_p2), %v3277_v3  ;;  %3035 = vmatprep.subr.bf16.mxu0 (!%p337_p2), %v3397_v4  ;;  %v2758_v14 = vld [vmem:[%s3957_s3] ss:$0 sm:$0xff] (!%p337_p2)  ;;  %s3400_s13 = smov (!%p337_p2), 96   ;;  %s3401_s14 = smov (!%p337_p2), 112   ;;  %vm539_vm4 = vcmask (!%p337_p2), 1043456   ;;  %v3280_v61 = vld [vmem:[%s3958_s4 + $0x8] sm:$0xff] (!%p337_p2)  }
   0x8   : > { %3023 = vmatprep.subr.bf16.mxu1 (!%p337_p2), %v3397_v4  ;;  %3037 = vmatprep.mubr.msk.bf16.mxu0 (!%p337_p2), %vm3398_vm1, %v3397_v4  ;;  %s3402_s15 = smov (!%p337_p2), 48   ;;  %s3403_s16 = smov (!%p337_p2), 64   ;;  %v3279_v60 = vld [vmem:[%s3958_s4] sm:$0xff] (!%p337_p2)   ;;  %vm906_vm6 = vcmask (!%p337_p2), 523264  }
   0x9   : > { %s3404_s24 = smov (!%p337_p2), 16  }
   0xb   : > { %3024 = vmatpush3.bf16.msra.mxu1 (!%p337_p2), %v3278_v5 }
   0xc   : > { %3029 = vmatprep.subr.bf16.mxu1 (!%p337_p2), %v3397_v4 }
   0xd   : > { %s3967_s18 = smov (!%p374_p3, %s2750_s18), 1 }
   0xe   : > { %s2755_s19 = sshll.u32 %s3967_s18, 3 }
   0xf   : > { %s377_s22 = scalar_lea.vmem %s3954_s0, %s2755_s19  ;;  %s381_s21 = scalar_lea.vmem %s3965_s11, %s2755_s19 }
  0x10   : > { %v3481_v0 = vld [vmem:[%s377_s22] sm:$0xff] }
  0x11   : > { %v384_v1 = vmul.f32 %v3481_v0, %v3481_v0 }
  0x13   : > { %v386_v2 = vsel %vm385_vm0, %v384_v1, 0.0 }
  0x14   : > { %387 = vadd.xlane.f32.xlu0 %v386_v2 }
  0xa1   : > { %v388_v6 = vpop.xlane.xlu0 %387 }
  0xa2   : > { %v390_v7 = vmul.f32 0.03125, %v388_v6 }
  0xa4   : > { %v391_v8 = vadd.f32 1.1920929e-07, %v390_v7 }
  0xa6   : > { %3317 = vrsqrt.f32 %v391_v8 }
  0xb0   : > { %v3318_v9 = vpop.eup %3317 }
  0xb1   : > { %v393_v11 = vmul.f32 %v3318_v9, %v3481_v0 }
  0xb3   : > { %v401_v12 = vmul.f32 %v2757_v10, %v393_v11 }
  0xb5   : > { %v402_v13 = vpack.c.bf16 %v401_v12, %v401_v12  ;;  %v2769_v12 = vld [vmem:[%s3959_s5] ss:$0 sm:$0xff] }
  0xb7   : > { %3026 = vmatmul.mubr.msk.bf16.vlgmr.msra.gmra.mrb[0].mxu1 %vm385_vm0, %v402_v13 }
  0xb8   : > { %3031 = vmatprep.mubr.msk.bf16.mxu1 %vm3398_vm1, %v3397_v4 }
 0x18a   : > { %v463_v15 = vpop.f32.mrb[0].mxu1 }
 0x18b   : > { %v464_v16 = vadd.f32 %v2758_v14, %v463_v15  ;;  %v3027_v17 = vpop.f32.mrb[1].mxu1 }
 0x18c   : > { %v466_v18 = vpop.f32.mrb[2].mxu1 }
 0x18d   : > { %v469_v19 = vpack.c.bf16 %v464_v16, %v464_v16  ;;  %v3028_v20 = vpop.f32.mrb[3].mxu1 }
 0x18e   : > { %v3281_v20 = vld [vmem:[%s3961_s7] sm:$0xff]  }
 0x18f   : > { %585 = vrot.lane.b32.xlu1 %v469_v19, %s3399_s12  ;;  %471 = vrot.lane.b32.xlu0 %v469_v19, %s3400_s13 }
 0x193   : > { %583 = vrot.lane.b32.xlu1 %v469_v19, %s3401_s14 }
 0x201   : > { %v472_v21 = vpop.permute.xlu0 %471  ;;  %v586_v23 = vpop.permute.xlu1 %585 }
 0x202   : > { %v478_v22 = vsel %vm473_vm2, %v472_v21, 0  ;;  %v591_v24 = vsel %vm473_vm2, %v586_v23, 0 }
 0x203   : > { %3030 = vmatpush3.bf16.xpose.msra.mxu1 %v478_v22 }
 0x204   : > { %3041 = vmatprep.subr.bf16.mxu1 %v3397_v4 }
 0x205   : > { %v584_v25 = vpop.permute.xlu1 %583 }
 0x20a   : > { %3032 = vmatmul.mubr.msk.bf16.vlgmr.msra.gmra.mrb[4].mxu1 %vm473_vm2, %v469_v19 }
 0x20b   : > { %3042 = vmatpush3.bf16.xpose.msra.mxu1 %v591_v24  ;;  %3043 = vmatprep.mubr.msk.bf16.mxu1 %vm3398_vm1, %v3397_v4 }
 0x20c   : > { %3053 = vmatprep.subr.bf16.mxu1 %v3397_v4 }
 0x212   : > { %3044 = vmatmul.mubr.msk.bf16.vlgmr.msra.gmra.mrb[8].mxu1 %vm473_vm2, %v584_v25  ;;  %v2770_v25 = vld [vmem:[%s3960_s6] ss:$0 sm:$0xff] }
 0x213   : > { %3057 = vmatprep.mubr.msk.bf16.mxu1 %vm3398_vm1, %v3397_v4  ;;  %3054 = vmatpush3.bf16.msra.mxu1 %v3279_v60 }
 0x214   : > { %3055 = vmatprep.subr.bf16.mxu1 %v3397_v4 }
 0x217   : > { %3056 = vmatpush3.bf16.msra.mxu1 %v3280_v61 }
 0x218   : > { %3069 = vmatprep.subr.bf16.mxu1 %v3397_v4 }
 0x2dd   : > { %v514_v26 = vpop.f32.mrb[4].mxu1 }
 0x2de   : > { %v520_v27 = vmul.f32 0.25, %v514_v26  ;;  %v3033_v28 = vpop.f32.mrb[5].mxu1 }
 0x2df   : > { %v517_v29 = vpop.f32.mrb[6].mxu1 }
 0x2e0   : > { %v3034_v30 = vpop.f32.mrb[7].mxu1  ;;  %v522_v31 = vsel %vm521_vm3, %v520_v27, -inf  ;;  %v3283_v29 = vld [vmem:[%s3963_s9] sm:$0xff]  }
 0x2e1   : > { %523 = vmax.xlane.f32.xlu1 %v522_v31  ;;  %v3284_v30 = vld [vmem:[%s3963_s9 + $0x8] sm:$0xff]   ;;  %v3285_v31 = vld [vmem:[%s3963_s9 + $0x10] sm:$0xff]  }
 0x2e5   : > { %v627_v32 = vpop.f32.mrb[8].mxu1 }
 0x2e6   : > { %v633_v33 = vmul.f32 0.25, %v627_v32  ;;  %v3045_v34 = vpop.f32.mrb[9].mxu1  ;;  %v3286_v32 = vld [vmem:[%s3963_s9 + $0x18] sm:$0xff]  }
 0x2e7   : > { %v630_v35 = vpop.f32.mrb[10].mxu1 }
 0x2e8   : > { %v3046_v36 = vpop.f32.mrb[11].mxu1  ;;  %v634_v37 = vsel %vm521_vm3, %v633_v33, -inf }
 0x2e9   : > { %635 = vmax.xlane.f32.xlu0 %v634_v37 }
 0x2ff   : > { %646 = vrot.lane.b32.xlu0 %v469_v19, %s3402_s15 }
 0x36e   : > { %v524_v38 = vpop.xlane.xlu1 %523 }
 0x36f   : > { %v525_v39 = vsub.f32 %v520_v27, %v524_v38 }
 0x371   : > { %v526_v40 = vmul.f32 1.442695, %v525_v39 }
 0x373   : > { %3319 = vpow2.f32 %v526_v40 }
 0x376   : > { %v636_v41 = vpop.xlane.xlu0 %635 }
 0x377   : > { %v637_v42 = vsub.f32 %v633_v33, %v636_v41  ;;  %v2771_v33 = vld [vmem:[%s3962_s8] ss:$0 sm:$0xff] }
 0x379   : > { %v638_v43 = vmul.f32 1.442695, %v637_v42 }
 0x37a   : > { %v647_v54 = vpop.permute.xlu0 %646 }
 0x37b   : > { %3321 = vpow2.f32 %v638_v43  ;;  %v652_v56 = vsel %vm539_vm4, %v647_v54, 0 }
 0x37d   : > { %v3320_v44 = vpop.eup %3319 }
 0x37e   : > { %v528_v45 = vsel %vm521_vm3, %v3320_v44, 0.0 }
 0x37f   : > { %529 = vadd.xlane.f32.xlu1 %v528_v45 }
 0x385   : > { %v3322_v46 = vpop.eup %3321 }
 0x386   : > { %v640_v47 = vsel %vm521_vm3, %v3322_v46, 0.0 }
 0x387   : > { %641 = vadd.xlane.f32.xlu1 %v640_v47 }
 0x398   : > { %534 = vrot.lane.b32.xlu1 %v469_v19, %s3403_s16 }
 0x40c   : > { %v530_v48 = vpop.xlane.xlu1 %529 }
 0x40d   : > { %3323 = vrcp.f32 %v530_v48 }
 0x414   : > { %v642_v49 = vpop.xlane.xlu1 %641 }
 0x415   : > { %3325 = vrcp.f32 %v642_v49 }
 0x417   : > { %v3324_v50 = vpop.eup %3323 }
 0x418   : > { %v535_v51 = vpop.permute.xlu1 %534  ;;  %v532_v52 = vmul.f32 %v3324_v50, %v3320_v44 }
 0x419   : > { %v541_v53 = vsel %vm539_vm4, %v535_v51, 0 }
 0x41a   : > { %3036 = vmatpush3.bf16.msra.mxu0 %v541_v53  ;;  %v533_v55 = vpack.c.bf16 %v532_v52, %v532_v52 }
 0x41b   : > { %3047 = vmatprep.subr.bf16.mxu0 %v3397_v4 }
 0x41d   : > { %3038 = vmatmul.mubr.msk.bf16.vlgmr.msra.gmra.mrb[0].mxu0 %vm521_vm3, %v533_v55 }
 0x41e   : > { %3048 = vmatpush3.bf16.msra.mxu0 %v652_v56  ;;  %3049 = vmatprep.mubr.msk.bf16.mxu0 %vm3398_vm1, %v3397_v4 }
 0x41f   : > { %v3326_v57 = vpop.eup %3325  ;;  %3061 = vmatprep.subr.bf16.mxu0 %v3397_v4 }
 0x420   : > { %v644_v58 = vmul.f32 %v3326_v57, %v3322_v46 }
 0x422   : > { %v645_v59 = vpack.c.bf16 %v644_v58, %v644_v58 }
 0x425   : > { %3050 = vmatmul.mubr.msk.bf16.vlgmr.msra.gmra.mrb[4].mxu0 %vm521_vm3, %v645_v59  ;;  %v2780_v59 = vld [vmem:[%s3964_s10] ss:$0 sm:$0xff] }
 0x426   : > { %3065 = vmatprep.mubr.msk.bf16.mxu0 %vm3398_vm1, %v3397_v4  ;;  %3062 = vmatpush3.bf16.msra.mxu0 %v3281_v20 }
 0x427   : > { %3063 = vmatprep.subr.bf16.mxu0 %v3397_v4 }
 0x4f0   : > { %v577_v62 = vpop.f32.mrb[0].mxu0 }
 0x4f1   : > { %v3039_v63 = vpop.f32.mrb[1].mxu0 }
 0x4f2   : > { %v580_v1 = vpop.f32.mrb[2].mxu0 }
 0x4f3   : > { %v3040_v2 = vpop.f32.mrb[3].mxu0 }
 0x4f8   : > { %v688_v3 = vpop.f32.mrb[4].mxu0 }
 0x4f9   : > { %695 = vrot.lane.b32.xlu1 %v688_v3, %s3404_s24  ;;  %v3051_v5 = vpop.f32.mrb[5].mxu0 }
 0x4fa   : > { %v691_v6 = vpop.f32.mrb[6].mxu0  ;;  %v3287_v5 = vld [vmem:[%s3956_s2 + $0x10] sm:$0xff]  }
 0x4fb   : > { %v3052_v7 = vpop.f32.mrb[7].mxu0  ;;  %v3288_v6 = vld [vmem:[%s3956_s2 + $0x18] sm:$0xff]  }
 0x56b   : > { %v696_v8 = vpop.permute.xlu1 %695 }
 0x56c   : > { %v698_v9 = vsel %vm473_vm2, %v577_v62, %v696_v8 }
 0x56d   : > { %v699_v10 = vpack.c.bf16 %v698_v9, %v698_v9 }
 0x56f   : > { %3058 = vmatmul.mubr.msk.bf16.vlgmr.msra.gmra.mrb[12].mxu1 %vm385_vm0, %v699_v10 }
 0x570   : > { %3077 = vmatprep.mubr.msk.bf16.mxu1 %vm3398_vm1, %v3397_v4  ;;  %3070 = vmatpush3.bf16.msra.mxu1 %v3283_v29 }
 0x571   : > { %3071 = vmatprep.subr.bf16.mxu1 %v3397_v4 }
 0x574   : > { %3072 = vmatpush3.bf16.msra.mxu1 %v3284_v30 }
 0x575   : > { %3073 = vmatprep.subr.bf16.mxu1 %v3397_v4 }
 0x578   : > { %3074 = vmatpush3.bf16.msra.mxu1 %v3285_v31 }
 0x579   : > { %3075 = vmatprep.subr.bf16.mxu1 %v3397_v4 }
 0x57c   : > { %3076 = vmatpush3.bf16.msra.mxu1 %v3286_v32 }
 0x57d   : > { %3095 = vmatprep.subr.bf16.mxu1 %v3397_v4 }
 0x642   : > { %v753_v11 = vpop.f32.mrb[12].mxu1 }
 0x643   : > { %v759_v13 = vadd.f32 %v753_v11, %v3481_v0  ;;  %v3059_v14 = vpop.f32.mrb[13].mxu1  ;;  %v3282_v0 = vld [vmem:[%s3961_s7 + $0x8] sm:$0xff]   ;;  %v2782_v11 = vld [vmem:[%s3955_s1 + $0x1] ss:$0 sm:$0xff] }
 0x644   : > { %v756_v15 = vpop.f32.mrb[14].mxu1  ;;  %3064 = vmatpush3.bf16.msra.mxu0 %v3282_v0 }
 0x645   : > { %v3556_v16 = vadd.f32 %v2769_v12, %v759_v13  ;;  %v3060_v17 = vpop.f32.mrb[15].mxu1  ;;  %3081 = vmatprep.subr.bf16.mxu0 %v3397_v4  ;;  %v2788_v15 = vld [vmem:[%s3957_s3 + $0x1] ss:$0 sm:$0xff] }
 0x647   : > { %v768_v18 = vmul.f32 %v3556_v16, %v3556_v16 }
 0x649   : > { %v769_v19 = vsel %vm385_vm0, %v768_v18, 0.0 }
 0x64a   : > { %770 = vadd.xlane.f32.xlu1 %v769_v19 }
 0x6d7   : > { %v771_v21 = vpop.xlane.xlu1 %770 }
 0x6d8   : > { %v772_v22 = vmul.f32 0.03125, %v771_v21 }
 0x6da   : > { %v773_v23 = vadd.f32 1.1920929e-07, %v772_v22 }
 0x6dc   : > { %3327 = vrsqrt.f32 %v773_v23 }
 0x6e6   : > { %v3328_v24 = vpop.eup %3327 }
 0x6e7   : > { %v775_v26 = vmul.f32 %v3328_v24, %v3556_v16 }
 0x6e9   : > { %v783_v27 = vmul.f32 %v2770_v25, %v775_v26 }
 0x6eb   : > { %v784_v28 = vpack.c.bf16 %v783_v27, %v783_v27 }
 0x6ed   : > { %3066 = vmatmul.mubr.msk.bf16.vlgmr.msra.gmra.mrb[8].mxu0 %vm385_vm0, %v784_v28 }
 0x6ee   : > { %3085 = vmatprep.mubr.msk.bf16.mxu0 %vm3398_vm1, %v3397_v4  ;;  %3082 = vmatpush3.bf16.msra.mxu0 %v3287_v5 }
 0x6ef   : > { %3083 = vmatprep.subr.bf16.mxu0 %v3397_v4 }
 0x6f2   : > { %3084 = vmatpush3.bf16.msra.mxu0 %v3288_v6 }
 0x6f3   : > { %3089 = vmatprep.subr.bf16.mxu0 %v3397_v4 }
 0x7c0   : > { %v845_v34 = vpop.f32.mrb[8].mxu0 }
 0x7c1   : > { %v846_v35 = vadd.f32 %v2771_v33, %v845_v34  ;;  %v3067_v36 = vpop.f32.mrb[9].mxu0 }
 0x7c2   : > { %v848_v37 = vpop.f32.mrb[10].mxu0 }
 0x7c3   : > { %869 = vrot.lane.b32.xlu0 %v846_v35, %s3403_s16  ;;  %v3068_v38 = vpop.f32.mrb[11].mxu0  ;;  %v851_v39 = vand.u32 2147483647, %v846_v35  ;;  %v864_v51 = vmax.f32 %v846_v35, 0.0 }
 0x7c5   : > { %v852_v40 = vsub.f32 0.0, %v851_v39 }
 0x7c7   : > { %v853_v41 = vmul.f32 1.442695, %v852_v40 }
 0x7c9   : > { %3329 = vpow2.f32 %v853_v41 }
 0x7d3   : > { %v3330_v42 = vpop.eup %3329 }
 0x7d4   : > { %v855_v43 = vadd.f32 1.0, %v3330_v42  ;;  %v858_v44 = vmul.f32 -0.5, %v3330_v42  ;;  %v861_v47 = vand.u32 2147483647, %v3330_v42 }
 0x7d6   : > { %3331 = vlog2.f32 %v855_v43  ;;  %v859_v46 = vadd.f32 1.0, %v858_v44  ;;  %vm862_vm5 = vcmp.lt.f32.partialorder %v861_v47, 0.0004427343 }
 0x7d8   : > { %v860_v49 = vmul.f32 %v3330_v42, %v859_v46 }
 0x7e0   : > { %v3332_v45 = vpop.eup %3331 }
 0x7e1   : > { %v857_v48 = vmul.f32 0.6931472, %v3332_v45 }
 0x7e3   : > { %v863_v50 = vsel %vm862_vm5, %v860_v49, %v857_v48 }
 0x7e4   : > { %v865_v52 = vadd.f32 %v864_v51, %v863_v50 }
 0x7e6   : > { %3333 = vtanh.f32 %v865_v52 }
 0x7f0   : > { %v3334_v53 = vpop.eup %3333 }
 0x7f1   : > { %v867_v54 = vmul.f32 %v3334_v53, %v846_v35 }
 0x835   : > { %v870_v55 = vpop.permute.xlu0 %869 }
 0x836   : > { %v872_v56 = vmul.f32 %v870_v55, %v867_v54 }
 0x838   : > { %v873_v57 = vpack.c.bf16 %v872_v56, %v872_v56 }
 0x83a   : > { %3078 = vmatmul.mubr.msk.bf16.vlgmr.msra.gmra.mrb[16].mxu1 %vm906_vm6, %v873_v57 }
 0x83b   : > { %3097 = vmatprep.mubr.msk.bf16.mxu1 %vm3398_vm1, %v3397_v4 }
 0x90d   : > { %v944_v58 = vpop.f32.mrb[16].mxu1 }
 0x90e   : > { %v950_v60 = vadd.f32 %v944_v58, %v3556_v16  ;;  %v3079_v61 = vpop.f32.mrb[17].mxu1 }
 0x90f   : > { %v947_v62 = vpop.f32.mrb[18].mxu1  ;;  %v3290_v61 = vld [vmem:[%s3958_s4 + $0x18] sm:$0xff]  }
 0x910   : > { %v3603_v63 = vadd.f32 %v2780_v59, %v950_v60  ;;  %v3080_v1 = vpop.f32.mrb[19].mxu1  ;;  %v3289_v60 = vld [vmem:[%s3958_s4 + $0x10] sm:$0xff]  }
 0x912   : > { %v959_v2 = vmul.f32 %v3603_v63, %v3603_v63 }
 0x914   : > { %v960_v3 = vsel %vm385_vm0, %v959_v2, 0.0 }
 0x915   : > { %961 = vadd.xlane.f32.xlu0 %v960_v3 }
 0x9a2   : > { %v962_v7 = vpop.xlane.xlu0 %961 }
 0x9a3   : > { %v963_v8 = vmul.f32 0.03125, %v962_v7 }
 0x9a5   : > { %v964_v9 = vadd.f32 1.1920929e-07, %v963_v8 }
 0x9a7   : > { %3335 = vrsqrt.f32 %v964_v9 }
 0x9b1   : > { %v3336_v10 = vpop.eup %3335 }
 0x9b2   : > { %v966_v12 = vmul.f32 %v3336_v10, %v3603_v63 }
 0x9b4   : > { %v975_v13 = vmul.f32 %v2782_v11, %v966_v12 }
 0x9b6   : > { %v976_v14 = vpack.c.bf16 %v975_v13, %v975_v13  ;;  %v2804_v13 = vld [vmem:[%s3959_s5 + $0x1] ss:$0 sm:$0xff] }
 0x9b8   : > { %3086 = vmatmul.mubr.msk.bf16.vlgmr.msra.gmra.mrb[12].mxu0 %vm385_vm0, %v976_v14 }
 0x9b9   : > { %3091 = vmatprep.mubr.msk.bf16.mxu0 %vm3398_vm1, %v3397_v4 }
 0xa8b   : > { %v1039_v16 = vpop.f32.mrb[12].mxu0 }
 0xa8c   : > { %v1040_v17 = vadd.f32 %v2788_v15, %v1039_v16  ;;  %v3087_v18 = vpop.f32.mrb[13].mxu0 }
 0xa8d   : > { %v1042_v19 = vpop.f32.mrb[14].mxu0 }
 0xa8e   : > { %v1045_v20 = vpack.c.bf16 %v1040_v17, %v1040_v17  ;;  %v3088_v0 = vpop.f32.mrb[15].mxu0 }
 0xa8f   : > { %v3291_v0 = vld [vmem:[%s3961_s7 + $0x10] sm:$0xff]  }
 0xa90   : > { %1158 = vrot.lane.b32.xlu0 %v1045_v20, %s3399_s12  ;;  %1047 = vrot.lane.b32.xlu1 %v1045_v20, %s3400_s13 }
 0xa94   : > { %1156 = vrot.lane.b32.xlu1 %v1045_v20, %s3401_s14 }
 0xb02   : > { %v1048_v21 = vpop.permute.xlu1 %1047  ;;  %v1159_v23 = vpop.permute.xlu0 %1158 }
 0xb03   : > { %v1053_v22 = vsel %vm473_vm2, %v1048_v21, 0  ;;  %v1164_v24 = vsel %vm473_vm2, %v1159_v23, 0 }
 0xb04   : > { %3090 = vmatpush3.bf16.xpose.msra.mxu0 %v1053_v22 }
 0xb05   : > { %3101 = vmatprep.subr.bf16.mxu0 %v3397_v4 }
 0xb06   : > { %v1157_v25 = vpop.permute.xlu1 %1156 }
 0xb0b   : > { %3092 = vmatmul.mubr.msk.bf16.vlgmr.msra.gmra.mrb[16].mxu0 %vm473_vm2, %v1045_v20 }
 0xb0c   : > { %3102 = vmatpush3.bf16.xpose.msra.mxu0 %v1164_v24  ;;  %3103 = vmatprep.mubr.msk.bf16.mxu0 %vm3398_vm1, %v3397_v4 }
 0xb0d   : > { %3113 = vmatprep.subr.bf16.mxu0 %v3397_v4 }
 0xb13   : > { %3104 = vmatmul.mubr.msk.bf16.vlgmr.msra.gmra.mrb[20].mxu0 %vm473_vm2, %v1157_v25  ;;  %v2806_v25 = vld [vmem:[%s3960_s6 + $0x1] ss:$0 sm:$0xff] }
 0xb14   : > { %3117 = vmatprep.mubr.msk.bf16.mxu0 %vm3398_vm1, %v3397_v4  ;;  %3114 = vmatpush3.bf16.msra.mxu0 %v3289_v60 }
 0xb15   : > { %3115 = vmatprep.subr.bf16.mxu0 %v3397_v4 }
 0xb18   : > { %3116 = vmatpush3.bf16.msra.mxu0 %v3290_v61 }
 0xb19   : > { %3129 = vmatprep.subr.bf16.mxu0 %v3397_v4 }
 0xbde   : > { %v1089_v26 = vpop.f32.mrb[16].mxu0 }
 0xbdf   : > { %v1095_v27 = vmul.f32 0.25, %v1089_v26  ;;  %v3093_v28 = vpop.f32.mrb[17].mxu0 }
 0xbe0   : > { %v1092_v29 = vpop.f32.mrb[18].mxu0 }
 0xbe1   : > { %v3094_v30 = vpop.f32.mrb[19].mxu0  ;;  %v1096_v31 = vsel %vm521_vm3, %v1095_v27, -inf  ;;  %v3293_v29 = vld [vmem:[%s3963_s9 + $0x20] sm:$0xff]  }
 0xbe2   : > { %1097 = vmax.xlane.f32.xlu1 %v1096_v31  ;;  %v3294_v30 = vld [vmem:[%s3963_s9 + $0x28] sm:$0xff]   ;;  %v3295_v31 = vld [vmem:[%s3963_s9 + $0x30] sm:$0xff]  }
 0xbe6   : > { %v1200_v32 = vpop.f32.mrb[20].mxu0 }
 0xbe7   : > { %v1206_v33 = vmul.f32 0.25, %v1200_v32  ;;  %v3105_v34 = vpop.f32.mrb[21].mxu0  ;;  %v3296_v32 = vld [vmem:[%s3963_s9 + $0x38] sm:$0xff]  }
 0xbe8   : > { %v1203_v35 = vpop.f32.mrb[22].mxu0 }
 0xbe9   : > { %v3106_v36 = vpop.f32.mrb[23].mxu0  ;;  %v1207_v37 = vsel %vm521_vm3, %v1206_v33, -inf }
 0xbea   : > { %1208 = vmax.xlane.f32.xlu0 %v1207_v37 }
 0xc6f   : > { %v1098_v38 = vpop.xlane.xlu1 %1097 }
 0xc70   : > { %v1099_v39 = vsub.f32 %v1095_v27, %v1098_v38 }
 0xc72   : > { %v1100_v40 = vmul.f32 1.442695, %v1099_v39 }
 0xc74   : > { %3337 = vpow2.f32 %v1100_v40 }
 0xc77   : > { %v1209_v41 = vpop.xlane.xlu0 %1208 }
 0xc78   : > { %v1210_v42 = vsub.f32 %v1206_v33, %v1209_v41  ;;  %v2812_v33 = vld [vmem:[%s3962_s8 + $0x1] ss:$0 sm:$0xff] }
 0xc7a   : > { %v1211_v43 = vmul.f32 1.442695, %v1210_v42 }
 0xc7c   : > { %3339 = vpow2.f32 %v1211_v43 }
 0xc7e   : > { %v3338_v44 = vpop.eup %3337 }
 0xc7f   : > { %v1102_v45 = vsel %vm521_vm3, %v3338_v44, 0.0 }
 0xc80   : > { %1103 = vadd.xlane.f32.xlu1 %v1102_v45 }
 0xc86   : > { %v3340_v46 = vpop.eup %3339 }
 0xc87   : > { %v1213_v47 = vsel %vm521_vm3, %v3340_v46, 0.0 }
 0xc88   : > { %1214 = vadd.xlane.f32.xlu0 %v1213_v47 }
 0xc91   : > { %1108 = vrot.lane.b32.xlu1 %v1045_v20, %s3403_s16 }
 0xc9e   : > { %1219 = vrot.lane.b32.xlu0 %v1045_v20, %s3402_s15 }
 0xd0d   : > { %v1104_v48 = vpop.xlane.xlu1 %1103 }
 0xd0e   : > { %3341 = vrcp.f32 %v1104_v48 }
 0xd11   : > { %v1109_v49 = vpop.permute.xlu1 %1108 }
 0xd12   : > { %v1114_v50 = vsel %vm539_vm4, %v1109_v49, 0 }
 0xd13   : > { %3096 = vmatpush3.bf16.msra.mxu1 %v1114_v50 }
 0xd14   : > { %3107 = vmatprep.subr.bf16.mxu1 %v3397_v4 }
 0xd15   : > { %v1215_v51 = vpop.xlane.xlu0 %1214 }
 0xd16   : > { %3343 = vrcp.f32 %v1215_v51 }
 0xd18   : > { %v3342_v52 = vpop.eup %3341 }
 0xd19   : > { %v1106_v53 = vmul.f32 %v3342_v52, %v3338_v44  ;;  %v1220_v54 = vpop.permute.xlu0 %1219 }
 0xd1a   : > { %v1225_v56 = vsel %vm539_vm4, %v1220_v54, 0 }
 0xd1b   : > { %v1107_v55 = vpack.c.bf16 %v1106_v53, %v1106_v53 }
 0xd1d   : > { %3098 = vmatmul.mubr.msk.bf16.vlgmr.msra.gmra.mrb[20].mxu1 %vm521_vm3, %v1107_v55 }
 0xd1e   : > { %3108 = vmatpush3.bf16.msra.mxu1 %v1225_v56  ;;  %3109 = vmatprep.mubr.msk.bf16.mxu1 %vm3398_vm1, %v3397_v4 }
 0xd1f   : > { %3121 = vmatprep.subr.bf16.mxu1 %v3397_v4 }
 0xd20   : > { %v3344_v57 = vpop.eup %3343 }
 0xd21   : > { %v1217_v58 = vmul.f32 %v3344_v57, %v3340_v46 }
 0xd23   : > { %v1218_v59 = vpack.c.bf16 %v1217_v58, %v1217_v58 }
 0xd25   : > { %3110 = vmatmul.mubr.msk.bf16.vlgmr.msra.gmra.mrb[24].mxu1 %vm521_vm3, %v1218_v59  ;;  %v2830_v59 = vld [vmem:[%s3964_s10 + $0x1] ss:$0 sm:$0xff] }
 0xd26   : > { %3125 = vmatprep.mubr.msk.bf16.mxu1 %vm3398_vm1, %v3397_v4  ;;  %3122 = vmatpush3.bf16.msra.mxu1 %v3291_v0 }
 0xd27   : > { %3123 = vmatprep.subr.bf16.mxu1 %v3397_v4 }
 0xdf0   : > { %v1150_v62 = vpop.f32.mrb[20].mxu1 }
 0xdf1   : > { %v3099_v1 = vpop.f32.mrb[21].mxu1 }
 0xdf2   : > { %v1153_v2 = vpop.f32.mrb[22].mxu1 }
 0xdf3   : > { %v3100_v3 = vpop.f32.mrb[23].mxu1 }
 0xdf8   : > { %v1261_v5 = vpop.f32.mrb[24].mxu1 }
 0xdf9   : > { %1268 = vrot.lane.b32.xlu1 %v1261_v5, %s3404_s24  ;;  %v3111_v6 = vpop.f32.mrb[25].mxu1 }
 0xdfa   : > { %v1264_v7 = vpop.f32.mrb[26].mxu1  ;;  %v3297_v6 = vld [vmem:[%s3956_s2 + $0x20] sm:$0xff]  }
 0xdfb   : > { %v3112_v8 = vpop.f32.mrb[27].mxu1  ;;  %v3298_v7 = vld [vmem:[%s3956_s2 + $0x28] sm:$0xff]  }
 0xe6b   : > { %v1269_v9 = vpop.permute.xlu1 %1268 }
 0xe6c   : > { %v1271_v10 = vsel %vm473_vm2, %v1150_v62, %v1269_v9 }
 0xe6d   : > { %v1272_v11 = vpack.c.bf16 %v1271_v10, %v1271_v10 }
 0xe6f   : > { %3118 = vmatmul.mubr.msk.bf16.vlgmr.msra.gmra.mrb[24].mxu0 %vm385_vm0, %v1272_v11 }
 0xe70   : > { %3137 = vmatprep.mubr.msk.bf16.mxu0 %vm3398_vm1, %v3397_v4  ;;  %3130 = vmatpush3.bf16.msra.mxu0 %v3293_v29 }
 0xe71   : > { %3131 = vmatprep.subr.bf16.mxu0 %v3397_v4 }
 0xe74   : > { %3132 = vmatpush3.bf16.msra.mxu0 %v3294_v30 }
 0xe75   : > { %3133 = vmatprep.subr.bf16.mxu0 %v3397_v4 }
 0xe78   : > { %3134 = vmatpush3.bf16.msra.mxu0 %v3295_v31 }
 0xe79   : > { %3135 = vmatprep.subr.bf16.mxu0 %v3397_v4 }
 0xe7c   : > { %3136 = vmatpush3.bf16.msra.mxu0 %v3296_v32 }
 0xe7d   : > { %3155 = vmatprep.subr.bf16.mxu0 %v3397_v4 }
 0xf42   : > { %v1327_v12 = vpop.f32.mrb[24].mxu0 }
 0xf43   : > { %v1333_v14 = vadd.f32 %v1327_v12, %v3603_v63  ;;  %v3119_v15 = vpop.f32.mrb[25].mxu0  ;;  %v3292_v63 = vld [vmem:[%s3961_s7 + $0x18] sm:$0xff]   ;;  %v2832_v12 = vld [vmem:[%s3955_s1 + $0x2] ss:$0 sm:$0xff] }
 0xf44   : > { %v1330_v16 = vpop.f32.mrb[26].mxu0  ;;  %3124 = vmatpush3.bf16.msra.mxu1 %v3292_v63 }
 0xf45   : > { %v3672_v17 = vadd.f32 %v2804_v13, %v1333_v14  ;;  %v3120_v18 = vpop.f32.mrb[27].mxu0  ;;  %3141 = vmatprep.subr.bf16.mxu1 %v3397_v4  ;;  %v2838_v16 = vld [vmem:[%s3957_s3 + $0x2] ss:$0 sm:$0xff] }
 0xf47   : > { %v1343_v19 = vmul.f32 %v3672_v17, %v3672_v17 }
 0xf49   : > { %v1344_v20 = vsel %vm385_vm0, %v1343_v19, 0.0 }
 0xf4a   : > { %1345 = vadd.xlane.f32.xlu1 %v1344_v20 }
 0xfd7   : > { %v1346_v21 = vpop.xlane.xlu1 %1345 }
 0xfd8   : > { %v1347_v22 = vmul.f32 0.03125, %v1346_v21 }
 0xfda   : > { %v1348_v23 = vadd.f32 1.1920929e-07, %v1347_v22 }
 0xfdc   : > { %3345 = vrsqrt.f32 %v1348_v23 }
 0xfe6   : > { %v3346_v24 = vpop.eup %3345 }
 0xfe7   : > { %v1350_v26 = vmul.f32 %v3346_v24, %v3672_v17 }
 0xfe9   : > { %v1359_v27 = vmul.f32 %v2806_v25, %v1350_v26 }
 0xfeb   : > { %v1360_v28 = vpack.c.bf16 %v1359_v27, %v1359_v27 }
 0xfed   : > { %3126 = vmatmul.mubr.msk.bf16.vlgmr.msra.gmra.mrb[28].mxu1 %vm385_vm0, %v1360_v28 }
 0xfee   : > { %3145 = vmatprep.mubr.msk.bf16.mxu1 %vm3398_vm1, %v3397_v4  ;;  %3142 = vmatpush3.bf16.msra.mxu1 %v3297_v6 }
 0xfef   : > { %3143 = vmatprep.subr.bf16.mxu1 %v3397_v4 }
 0xff2   : > { %3144 = vmatpush3.bf16.msra.mxu1 %v3298_v7 }
 0xff3   : > { %3149 = vmatprep.subr.bf16.mxu1 %v3397_v4 }
0x10c0   : > { %v1423_v34 = vpop.f32.mrb[28].mxu1 }
0x10c1   : > { %v1424_v35 = vadd.f32 %v2812_v33, %v1423_v34  ;;  %v3127_v36 = vpop.f32.mrb[29].mxu1 }
0x10c2   : > { %v1426_v37 = vpop.f32.mrb[30].mxu1 }
0x10c3   : > { %1447 = vrot.lane.b32.xlu0 %v1424_v35, %s3403_s16  ;;  %v3128_v38 = vpop.f32.mrb[31].mxu1  ;;  %v1429_v39 = vand.u32 2147483647, %v1424_v35  ;;  %v1442_v51 = vmax.f32 %v1424_v35, 0.0 }
0x10c5   : > { %v1430_v40 = vsub.f32 0.0, %v1429_v39 }
0x10c7   : > { %v1431_v41 = vmul.f32 1.442695, %v1430_v40 }
0x10c9   : > { %3347 = vpow2.f32 %v1431_v41 }
0x10d3   : > { %v3348_v42 = vpop.eup %3347 }
0x10d4   : > { %v1433_v43 = vadd.f32 1.0, %v3348_v42  ;;  %v1436_v44 = vmul.f32 -0.5, %v3348_v42  ;;  %v1439_v47 = vand.u32 2147483647, %v3348_v42 }
0x10d6   : > { %3349 = vlog2.f32 %v1433_v43  ;;  %v1437_v46 = vadd.f32 1.0, %v1436_v44  ;;  %vm1440_vm7 = vcmp.lt.f32.partialorder %v1439_v47, 0.0004427343 }
0x10d8   : > { %v1438_v49 = vmul.f32 %v3348_v42, %v1437_v46 }
0x10e0   : > { %v3350_v45 = vpop.eup %3349 }
0x10e1   : > { %v1435_v48 = vmul.f32 0.6931472, %v3350_v45 }
0x10e3   : > { %v1441_v50 = vsel %vm1440_vm7, %v1438_v49, %v1435_v48 }
0x10e4   : > { %v1443_v52 = vadd.f32 %v1442_v51, %v1441_v50 }
0x10e6   : > { %3351 = vtanh.f32 %v1443_v52 }
0x10f0   : > { %v3352_v53 = vpop.eup %3351 }
0x10f1   : > { %v1445_v54 = vmul.f32 %v3352_v53, %v1424_v35 }
0x1135   : > { %v1448_v55 = vpop.permute.xlu0 %1447 }
0x1136   : > { %v1450_v56 = vmul.f32 %v1448_v55, %v1445_v54 }
0x1138   : > { %v1451_v57 = vpack.c.bf16 %v1450_v56, %v1450_v56 }
0x113a   : > { %3138 = vmatmul.mubr.msk.bf16.vlgmr.msra.gmra.mrb[28].mxu0 %vm906_vm6, %v1451_v57 }
0x113b   : > { %3157 = vmatprep.mubr.msk.bf16.mxu0 %vm3398_vm1, %v3397_v4 }
0x120d   : > { %v1522_v58 = vpop.f32.mrb[28].mxu0 }
0x120e   : > { %v1528_v60 = vadd.f32 %v1522_v58, %v3672_v17  ;;  %v3139_v61 = vpop.f32.mrb[29].mxu0 }
0x120f   : > { %v1525_v62 = vpop.f32.mrb[30].mxu0  ;;  %v3300_v61 = vld [vmem:[%s3958_s4 + $0x28] sm:$0xff]  }
0x1210   : > { %v3719_v1 = vadd.f32 %v2830_v59, %v1528_v60  ;;  %v3140_v2 = vpop.f32.mrb[31].mxu0  ;;  %v3299_v60 = vld [vmem:[%s3958_s4 + $0x20] sm:$0xff]  }
0x1212   : > { %v1538_v3 = vmul.f32 %v3719_v1, %v3719_v1 }
0x1214   : > { %v1539_v5 = vsel %vm385_vm0, %v1538_v3, 0.0 }
0x1215   : > { %1540 = vadd.xlane.f32.xlu0 %v1539_v5 }
0x12a2   : > { %v1541_v8 = vpop.xlane.xlu0 %1540 }
0x12a3   : > { %v1542_v9 = vmul.f32 0.03125, %v1541_v8 }
0x12a5   : > { %v1543_v10 = vadd.f32 1.1920929e-07, %v1542_v9 }
0x12a7   : > { %3353 = vrsqrt.f32 %v1543_v10 }
0x12b1   : > { %v3354_v11 = vpop.eup %3353 }
0x12b2   : > { %v1545_v13 = vmul.f32 %v3354_v11, %v3719_v1 }
0x12b4   : > { %v1554_v14 = vmul.f32 %v2832_v12, %v1545_v13 }
0x12b6   : > { %v1555_v15 = vpack.c.bf16 %v1554_v14, %v1554_v14  ;;  %v2854_v14 = vld [vmem:[%s3959_s5 + $0x2] ss:$0 sm:$0xff] }
0x12b8   : > { %3146 = vmatmul.mubr.msk.bf16.vlgmr.msra.gmra.mrb[32].mxu1 %vm385_vm0, %v1555_v15 }
0x12b9   : > { %3151 = vmatprep.mubr.msk.bf16.mxu1 %vm3398_vm1, %v3397_v4 }
0x138b   : > { %v1618_v17 = vpop.f32.mrb[32].mxu1 }
0x138c   : > { %v1619_v18 = vadd.f32 %v2838_v16, %v1618_v17  ;;  %v3147_v19 = vpop.f32.mrb[33].mxu1 }
0x138d   : > { %v1621_v20 = vpop.f32.mrb[34].mxu1 }
0x138e   : > { %v1624_v0 = vpack.c.bf16 %v1619_v18, %v1619_v18  ;;  %v3148_v63 = vpop.f32.mrb[35].mxu1 }
0x138f   : > { %v3301_v63 = vld [vmem:[%s3961_s7 + $0x20] sm:$0xff]  }
0x1390   : > { %1737 = vrot.lane.b32.xlu0 %v1624_v0, %s3399_s12  ;;  %1626 = vrot.lane.b32.xlu1 %v1624_v0, %s3400_s13 }
0x1394   : > { %1735 = vrot.lane.b32.xlu1 %v1624_v0, %s3401_s14 }
0x1402   : > { %v1627_v21 = vpop.permute.xlu1 %1626  ;;  %v1738_v23 = vpop.permute.xlu0 %1737 }
0x1403   : > { %v1632_v22 = vsel %vm473_vm2, %v1627_v21, 0  ;;  %v1743_v24 = vsel %vm473_vm2, %v1738_v23, 0 }
0x1404   : > { %3150 = vmatpush3.bf16.xpose.msra.mxu1 %v1632_v22 }
0x1405   : > { %3161 = vmatprep.subr.bf16.mxu1 %v3397_v4 }
0x1406   : > { %v1736_v25 = vpop.permute.xlu1 %1735 }
0x140b   : > { %3152 = vmatmul.mubr.msk.bf16.vlgmr.msra.gmra.mrb[36].mxu1 %vm473_vm2, %v1624_v0 }
0x140c   : > { %3162 = vmatpush3.bf16.xpose.msra.mxu1 %v1743_v24  ;;  %3163 = vmatprep.mubr.msk.bf16.mxu1 %vm3398_vm1, %v3397_v4 }
0x140d   : > { %3173 = vmatprep.subr.bf16.mxu1 %v3397_v4 }
0x1413   : > { %3164 = vmatmul.mubr.msk.bf16.vlgmr.msra.gmra.mrb[40].mxu1 %vm473_vm2, %v1736_v25  ;;  %v2856_v25 = vld [vmem:[%s3960_s6 + $0x2] ss:$0 sm:$0xff] }
0x1414   : > { %3177 = vmatprep.mubr.msk.bf16.mxu1 %vm3398_vm1, %v3397_v4  ;;  %3174 = vmatpush3.bf16.msra.mxu1 %v3299_v60 }
0x1415   : > { %3175 = vmatprep.subr.bf16.mxu1 %v3397_v4 }
0x1418   : > { %3176 = vmatpush3.bf16.msra.mxu1 %v3300_v61 }
0x1419   : > { %3189 = vmatprep.subr.bf16.mxu1 %v3397_v4 }
0x14de   : > { %v1668_v26 = vpop.f32.mrb[36].mxu1 }
0x14df   : > { %v1674_v27 = vmul.f32 0.25, %v1668_v26  ;;  %v3153_v28 = vpop.f32.mrb[37].mxu1 }
0x14e0   : > { %v1671_v29 = vpop.f32.mrb[38].mxu1 }
0x14e1   : > { %v3154_v30 = vpop.f32.mrb[39].mxu1  ;;  %v1675_v31 = vsel %vm521_vm3, %v1674_v27, -inf  ;;  %v3303_v29 = vld [vmem:[%s3963_s9 + $0x40] sm:$0xff]  }
0x14e2   : > { %1676 = vmax.xlane.f32.xlu1 %v1675_v31  ;;  %v3304_v30 = vld [vmem:[%s3963_s9 + $0x48] sm:$0xff]   ;;  %v3305_v31 = vld [vmem:[%s3963_s9 + $0x50] sm:$0xff]  }
0x14e6   : > { %v1779_v32 = vpop.f32.mrb[40].mxu1 }
0x14e7   : > { %v1785_v33 = vmul.f32 0.25, %v1779_v32  ;;  %v3165_v34 = vpop.f32.mrb[41].mxu1  ;;  %v3306_v32 = vld [vmem:[%s3963_s9 + $0x58] sm:$0xff]  }
0x14e8   : > { %v1782_v35 = vpop.f32.mrb[42].mxu1 }
0x14e9   : > { %v3166_v36 = vpop.f32.mrb[43].mxu1  ;;  %v1786_v37 = vsel %vm521_vm3, %v1785_v33, -inf }
0x14ea   : > { %1787 = vmax.xlane.f32.xlu0 %v1786_v37 }
0x156f   : > { %v1677_v38 = vpop.xlane.xlu1 %1676 }
0x1570   : > { %v1678_v39 = vsub.f32 %v1674_v27, %v1677_v38 }
0x1572   : > { %v1679_v40 = vmul.f32 1.442695, %v1678_v39 }
0x1574   : > { %3355 = vpow2.f32 %v1679_v40 }
0x1577   : > { %v1788_v41 = vpop.xlane.xlu0 %1787 }
0x1578   : > { %v1789_v42 = vsub.f32 %v1785_v33, %v1788_v41  ;;  %v2862_v33 = vld [vmem:[%s3962_s8 + $0x2] ss:$0 sm:$0xff] }
0x157a   : > { %v1790_v43 = vmul.f32 1.442695, %v1789_v42 }
0x157c   : > { %3357 = vpow2.f32 %v1790_v43 }
0x157e   : > { %v3356_v44 = vpop.eup %3355 }
0x157f   : > { %v1681_v45 = vsel %vm521_vm3, %v3356_v44, 0.0 }
0x1580   : > { %1682 = vadd.xlane.f32.xlu0 %v1681_v45 }
0x1586   : > { %v3358_v46 = vpop.eup %3357 }
0x1587   : > { %v1792_v47 = vsel %vm521_vm3, %v3358_v46, 0.0 }
0x1588   : > { %1793 = vadd.xlane.f32.xlu1 %v1792_v47 }
0x1596   : > { %1687 = vrot.lane.b32.xlu0 %v1624_v0, %s3403_s16 }
0x1599   : > { %1798 = vrot.lane.b32.xlu1 %v1624_v0, %s3402_s15 }
0x160d   : > { %v1683_v48 = vpop.xlane.xlu0 %1682 }
0x160e   : > { %3359 = vrcp.f32 %v1683_v48 }
0x1611   : > { %v1688_v49 = vpop.permute.xlu0 %1687 }
0x1612   : > { %v1693_v50 = vsel %vm539_vm4, %v1688_v49, 0 }
0x1613   : > { %3156 = vmatpush3.bf16.msra.mxu0 %v1693_v50 }
0x1614   : > { %3167 = vmatprep.subr.bf16.mxu0 %v3397_v4 }
0x1615   : > { %v1794_v51 = vpop.xlane.xlu1 %1793 }
0x1616   : > { %3361 = vrcp.f32 %v1794_v51 }
0x1618   : > { %v3360_v52 = vpop.eup %3359 }
0x1619   : > { %v1685_v53 = vmul.f32 %v3360_v52, %v3356_v44  ;;  %v1799_v54 = vpop.permute.xlu1 %1798 }
0x161a   : > { %v1804_v56 = vsel %vm539_vm4, %v1799_v54, 0 }
0x161b   : > { %v1686_v55 = vpack.c.bf16 %v1685_v53, %v1685_v53 }
0x161d   : > { %3158 = vmatmul.mubr.msk.bf16.vlgmr.msra.gmra.mrb[32].mxu0 %vm521_vm3, %v1686_v55 }
0x161e   : > { %3168 = vmatpush3.bf16.msra.mxu0 %v1804_v56  ;;  %3169 = vmatprep.mubr.msk.bf16.mxu0 %vm3398_vm1, %v3397_v4 }
0x161f   : > { %3181 = vmatprep.subr.bf16.mxu0 %v3397_v4 }
0x1620   : > { %v3362_v57 = vpop.eup %3361 }
0x1621   : > { %v1796_v58 = vmul.f32 %v3362_v57, %v3358_v46 }
0x1623   : > { %v1797_v59 = vpack.c.bf16 %v1796_v58, %v1796_v58 }
0x1625   : > { %3170 = vmatmul.mubr.msk.bf16.vlgmr.msra.gmra.mrb[36].mxu0 %vm521_vm3, %v1797_v59  ;;  %v2880_v59 = vld [vmem:[%s3964_s10 + $0x2] ss:$0 sm:$0xff] }
0x1626   : > { %3185 = vmatprep.mubr.msk.bf16.mxu0 %vm3398_vm1, %v3397_v4  ;;  %3182 = vmatpush3.bf16.msra.mxu0 %v3301_v63 }
0x1627   : > { %3183 = vmatprep.subr.bf16.mxu0 %v3397_v4 }
0x16f0   : > { %v1729_v62 = vpop.f32.mrb[32].mxu0 }
0x16f1   : > { %v3159_v2 = vpop.f32.mrb[33].mxu0 }
0x16f2   : > { %v1732_v3 = vpop.f32.mrb[34].mxu0 }
0x16f3   : > { %v3160_v5 = vpop.f32.mrb[35].mxu0 }
0x16f8   : > { %v1840_v6 = vpop.f32.mrb[36].mxu0 }
0x16f9   : > { %1847 = vrot.lane.b32.xlu1 %v1840_v6, %s3404_s24  ;;  %v3171_v7 = vpop.f32.mrb[37].mxu0 }
0x16fa   : > { %v1843_v8 = vpop.f32.mrb[38].mxu0  ;;  %v3307_v7 = vld [vmem:[%s3956_s2 + $0x30] sm:$0xff]  }
0x16fb   : > { %v3172_v9 = vpop.f32.mrb[39].mxu0  ;;  %v3308_v8 = vld [vmem:[%s3956_s2 + $0x38] sm:$0xff]  }
0x176b   : > { %v1848_v10 = vpop.permute.xlu1 %1847 }
0x176c   : > { %v1850_v11 = vsel %vm473_vm2, %v1729_v62, %v1848_v10 }
0x176d   : > { %v1851_v12 = vpack.c.bf16 %v1850_v11, %v1850_v11 }
0x176f   : > { %3178 = vmatmul.mubr.msk.bf16.vlgmr.msra.gmra.mrb[44].mxu1 %vm385_vm0, %v1851_v12 }
0x1770   : > { %3197 = vmatprep.mubr.msk.bf16.mxu1 %vm3398_vm1, %v3397_v4  ;;  %3190 = vmatpush3.bf16.msra.mxu1 %v3303_v29 }
0x1771   : > { %3191 = vmatprep.subr.bf16.mxu1 %v3397_v4 }
0x1774   : > { %3192 = vmatpush3.bf16.msra.mxu1 %v3304_v30 }
0x1775   : > { %3193 = vmatprep.subr.bf16.mxu1 %v3397_v4 }
0x1778   : > { %3194 = vmatpush3.bf16.msra.mxu1 %v3305_v31 }
0x1779   : > { %3195 = vmatprep.subr.bf16.mxu1 %v3397_v4 }
0x177c   : > { %3196 = vmatpush3.bf16.msra.mxu1 %v3306_v32 }
0x177d   : > { %3215 = vmatprep.subr.bf16.mxu1 %v3397_v4 }
0x1842   : > { %v1906_v13 = vpop.f32.mrb[44].mxu1 }
0x1843   : > { %v1912_v15 = vadd.f32 %v1906_v13, %v3719_v1  ;;  %v3179_v16 = vpop.f32.mrb[45].mxu1  ;;  %v3302_v1 = vld [vmem:[%s3961_s7 + $0x28] sm:$0xff]   ;;  %v2882_v13 = vld [vmem:[%s3955_s1 + $0x3] ss:$0 sm:$0xff] }
0x1844   : > { %v1909_v17 = vpop.f32.mrb[46].mxu1  ;;  %3184 = vmatpush3.bf16.msra.mxu0 %v3302_v1 }
0x1845   : > { %v3788_v18 = vadd.f32 %v2854_v14, %v1912_v15  ;;  %v3180_v19 = vpop.f32.mrb[47].mxu1  ;;  %3201 = vmatprep.subr.bf16.mxu0 %v3397_v4  ;;  %v2888_v17 = vld [vmem:[%s3957_s3 + $0x3] ss:$0 sm:$0xff] }
0x1847   : > { %v1922_v20 = vmul.f32 %v3788_v18, %v3788_v18 }
0x1849   : > { %v1923_v0 = vsel %vm385_vm0, %v1922_v20, 0.0 }
0x184a   : > { %1924 = vadd.xlane.f32.xlu0 %v1923_v0 }
0x18d7   : > { %v1925_v21 = vpop.xlane.xlu0 %1924 }
0x18d8   : > { %v1926_v22 = vmul.f32 0.03125, %v1925_v21 }
0x18da   : > { %v1927_v23 = vadd.f32 1.1920929e-07, %v1926_v22 }
0x18dc   : > { %3363 = vrsqrt.f32 %v1927_v23 }
0x18e6   : > { %v3364_v24 = vpop.eup %3363 }
0x18e7   : > { %v1929_v26 = vmul.f32 %v3364_v24, %v3788_v18 }
0x18e9   : > { %v1938_v27 = vmul.f32 %v2856_v25, %v1929_v26 }
0x18eb   : > { %v1939_v28 = vpack.c.bf16 %v1938_v27, %v1938_v27 }
0x18ed   : > { %3186 = vmatmul.mubr.msk.bf16.vlgmr.msra.gmra.mrb[40].mxu0 %vm385_vm0, %v1939_v28 }
0x18ee   : > { %3205 = vmatprep.mubr.msk.bf16.mxu0 %vm3398_vm1, %v3397_v4  ;;  %3202 = vmatpush3.bf16.msra.mxu0 %v3307_v7 }
0x18ef   : > { %3203 = vmatprep.subr.bf16.mxu0 %v3397_v4 }
0x18f2   : > { %3204 = vmatpush3.bf16.msra.mxu0 %v3308_v8 }
0x18f3   : > { %3209 = vmatprep.subr.bf16.mxu0 %v3397_v4 }
0x19c0   : > { %v2002_v34 = vpop.f32.mrb[40].mxu0 }
0x19c1   : > { %v2003_v35 = vadd.f32 %v2862_v33, %v2002_v34  ;;  %v3187_v36 = vpop.f32.mrb[41].mxu0 }
0x19c2   : > { %v2005_v37 = vpop.f32.mrb[42].mxu0 }
0x19c3   : > { %2026 = vrot.lane.b32.xlu1 %v2003_v35, %s3403_s16  ;;  %v3188_v38 = vpop.f32.mrb[43].mxu0  ;;  %v2008_v39 = vand.u32 2147483647, %v2003_v35  ;;  %v2021_v51 = vmax.f32 %v2003_v35, 0.0 }
0x19c5   : > { %v2009_v40 = vsub.f32 0.0, %v2008_v39 }
0x19c7   : > { %v2010_v41 = vmul.f32 1.442695, %v2009_v40 }
0x19c9   : > { %3365 = vpow2.f32 %v2010_v41 }
0x19d3   : > { %v3366_v42 = vpop.eup %3365 }
0x19d4   : > { %v2012_v43 = vadd.f32 1.0, %v3366_v42  ;;  %v2015_v44 = vmul.f32 -0.5, %v3366_v42  ;;  %v2018_v47 = vand.u32 2147483647, %v3366_v42 }
0x19d6   : > { %3367 = vlog2.f32 %v2012_v43  ;;  %v2016_v46 = vadd.f32 1.0, %v2015_v44  ;;  %vm2019_vm8 = vcmp.lt.f32.partialorder %v2018_v47, 0.0004427343 }
0x19d8   : > { %v2017_v49 = vmul.f32 %v3366_v42, %v2016_v46 }
0x19e0   : > { %v3368_v45 = vpop.eup %3367 }
0x19e1   : > { %v2014_v48 = vmul.f32 0.6931472, %v3368_v45 }
0x19e3   : > { %v2020_v50 = vsel %vm2019_vm8, %v2017_v49, %v2014_v48 }
0x19e4   : > { %v2022_v52 = vadd.f32 %v2021_v51, %v2020_v50 }
0x19e6   : > { %3369 = vtanh.f32 %v2022_v52 }
0x19f0   : > { %v3370_v53 = vpop.eup %3369 }
0x19f1   : > { %v2024_v54 = vmul.f32 %v3370_v53, %v2003_v35 }
0x1a35   : > { %v2027_v55 = vpop.permute.xlu1 %2026 }
0x1a36   : > { %v2029_v56 = vmul.f32 %v2027_v55, %v2024_v54 }
0x1a38   : > { %v2030_v57 = vpack.c.bf16 %v2029_v56, %v2029_v56 }
0x1a3a   : > { %3198 = vmatmul.mubr.msk.bf16.vlgmr.msra.gmra.mrb[48].mxu1 %vm906_vm6, %v2030_v57 }
0x1a3b   : > { %3217 = vmatprep.mubr.msk.bf16.mxu1 %vm3398_vm1, %v3397_v4 }
0x1b0d   : > { %v2101_v58 = vpop.f32.mrb[48].mxu1 }
0x1b0e   : > { %v2107_v60 = vadd.f32 %v2101_v58, %v3788_v18  ;;  %v3199_v61 = vpop.f32.mrb[49].mxu1 }
0x1b0f   : > { %v2104_v62 = vpop.f32.mrb[50].mxu1  ;;  %v3310_v61 = vld [vmem:[%s3958_s4 + $0x38] sm:$0xff]  }
0x1b10   : > { %v3835_v2 = vadd.f32 %v2880_v59, %v2107_v60  ;;  %v3200_v3 = vpop.f32.mrb[51].mxu1  ;;  %v3309_v60 = vld [vmem:[%s3958_s4 + $0x30] sm:$0xff]  }
0x1b12   : > { %v2117_v5 = vmul.f32 %v3835_v2, %v3835_v2 }
0x1b14   : > { %v2118_v6 = vsel %vm385_vm0, %v2117_v5, 0.0 }
0x1b15   : > { %2119 = vadd.xlane.f32.xlu1 %v2118_v6 }
0x1ba2   : > { %v2120_v9 = vpop.xlane.xlu1 %2119 }
0x1ba3   : > { %v2121_v10 = vmul.f32 0.03125, %v2120_v9 }
0x1ba5   : > { %v2122_v11 = vadd.f32 1.1920929e-07, %v2121_v10 }
0x1ba7   : > { %3371 = vrsqrt.f32 %v2122_v11 }
0x1bb1   : > { %v3372_v12 = vpop.eup %3371 }
0x1bb2   : > { %v2124_v14 = vmul.f32 %v3372_v12, %v3835_v2 }
0x1bb4   : > { %v2133_v15 = vmul.f32 %v2882_v13, %v2124_v14 }
0x1bb6   : > { %v2134_v16 = vpack.c.bf16 %v2133_v15, %v2133_v15  ;;  %v2904_v15 = vld [vmem:[%s3959_s5 + $0x3] ss:$0 sm:$0xff] }
0x1bb8   : > { %3206 = vmatmul.mubr.msk.bf16.vlgmr.msra.gmra.mrb[44].mxu0 %vm385_vm0, %v2134_v16 }
0x1bb9   : > { %3211 = vmatprep.mubr.msk.bf16.mxu0 %vm3398_vm1, %v3397_v4 }
0x1c8b   : > { %v2197_v18 = vpop.f32.mrb[44].mxu0 }
0x1c8c   : > { %v2198_v19 = vadd.f32 %v2888_v17, %v2197_v18  ;;  %v3207_v20 = vpop.f32.mrb[45].mxu0 }
0x1c8d   : > { %v2200_v0 = vpop.f32.mrb[46].mxu0 }
0x1c8e   : > { %v2203_v63 = vpack.c.bf16 %v2198_v19, %v2198_v19  ;;  %v3208_v1 = vpop.f32.mrb[47].mxu0 }
0x1c8f   : > { %v3311_v1 = vld [vmem:[%s3961_s7 + $0x30] sm:$0xff]  }
0x1c90   : > { %2316 = vrot.lane.b32.xlu1 %v2203_v63, %s3399_s12  ;;  %2205 = vrot.lane.b32.xlu0 %v2203_v63, %s3400_s13 }
0x1c94   : > { %2314 = vrot.lane.b32.xlu0 %v2203_v63, %s3401_s14 }
0x1d02   : > { %v2206_v21 = vpop.permute.xlu0 %2205  ;;  %v2317_v23 = vpop.permute.xlu1 %2316 }
0x1d03   : > { %v2211_v22 = vsel %vm473_vm2, %v2206_v21, 0  ;;  %v2322_v24 = vsel %vm473_vm2, %v2317_v23, 0 }
0x1d04   : > { %3210 = vmatpush3.bf16.xpose.msra.mxu0 %v2211_v22 }
0x1d05   : > { %3221 = vmatprep.subr.bf16.mxu0 %v3397_v4 }
0x1d06   : > { %v2315_v25 = vpop.permute.xlu0 %2314 }
0x1d0b   : > { %3212 = vmatmul.mubr.msk.bf16.vlgmr.msra.gmra.mrb[48].mxu0 %vm473_vm2, %v2203_v63 }
0x1d0c   : > { %3222 = vmatpush3.bf16.xpose.msra.mxu0 %v2322_v24  ;;  %3223 = vmatprep.mubr.msk.bf16.mxu0 %vm3398_vm1, %v3397_v4 }
0x1d0d   : > { %3233 = vmatprep.subr.bf16.mxu0 %v3397_v4 }
0x1d13   : > { %3224 = vmatmul.mubr.msk.bf16.vlgmr.msra.gmra.mrb[52].mxu0 %vm473_vm2, %v2315_v25  ;;  %v2906_v25 = vld [vmem:[%s3960_s6 + $0x3] ss:$0 sm:$0xff] }
0x1d14   : > { %3237 = vmatprep.mubr.msk.bf16.mxu0 %vm3398_vm1, %v3397_v4  ;;  %3234 = vmatpush3.bf16.msra.mxu0 %v3309_v60 }
0x1d15   : > { %3235 = vmatprep.subr.bf16.mxu0 %v3397_v4 }
0x1d18   : > { %3236 = vmatpush3.bf16.msra.mxu0 %v3310_v61 }
0x1d19   : > { %3249 = vmatprep.subr.bf16.mxu0 %v3397_v4 }
0x1dde   : > { %v2247_v26 = vpop.f32.mrb[48].mxu0 }
0x1ddf   : > { %v2253_v27 = vmul.f32 0.25, %v2247_v26  ;;  %v3213_v28 = vpop.f32.mrb[49].mxu0 }
0x1de0   : > { %v2250_v29 = vpop.f32.mrb[50].mxu0 }
0x1de1   : > { %v3214_v30 = vpop.f32.mrb[51].mxu0  ;;  %v2254_v31 = vsel %vm521_vm3, %v2253_v27, -inf  ;;  %v3313_v29 = vld [vmem:[%s3963_s9 + $0x60] sm:$0xff]  }
0x1de2   : > { %2255 = vmax.xlane.f32.xlu0 %v2254_v31  ;;  %v3314_v30 = vld [vmem:[%s3963_s9 + $0x68] sm:$0xff]   ;;  %v3315_v31 = vld [vmem:[%s3963_s9 + $0x70] sm:$0xff]  }
0x1de6   : > { %v2358_v32 = vpop.f32.mrb[52].mxu0 }
0x1de7   : > { %v2364_v33 = vmul.f32 0.25, %v2358_v32  ;;  %v3225_v34 = vpop.f32.mrb[53].mxu0  ;;  %v3316_v32 = vld [vmem:[%s3963_s9 + $0x78] sm:$0xff]  }
0x1de8   : > { %v2361_v35 = vpop.f32.mrb[54].mxu0 }
0x1de9   : > { %v3226_v36 = vpop.f32.mrb[55].mxu0  ;;  %v2365_v37 = vsel %vm521_vm3, %v2364_v33, -inf }
0x1dea   : > { %2366 = vmax.xlane.f32.xlu1 %v2365_v37 }
0x1dfb   : > { %2266 = vrot.lane.b32.xlu1 %v2203_v63, %s3403_s16 }
0x1e6f   : > { %v2256_v38 = vpop.xlane.xlu0 %2255 }
0x1e70   : > { %v2257_v39 = vsub.f32 %v2253_v27, %v2256_v38 }
0x1e72   : > { %v2258_v40 = vmul.f32 1.442695, %v2257_v39 }
0x1e74   : > { %3373 = vpow2.f32 %v2258_v40 }
0x1e77   : > { %v2367_v41 = vpop.xlane.xlu1 %2366 }
0x1e78   : > { %v2368_v42 = vsub.f32 %v2364_v33, %v2367_v41  ;;  %v2912_v33 = vld [vmem:[%s3962_s8 + $0x3] ss:$0 sm:$0xff] }
0x1e7a   : > { %v2369_v43 = vmul.f32 1.442695, %v2368_v42 }
0x1e7b   : > { %v2267_v44 = vpop.permute.xlu1 %2266 }
0x1e7c   : > { %3375 = vpow2.f32 %v2369_v43  ;;  %v2272_v45 = vsel %vm539_vm4, %v2267_v44, 0 }
0x1e7d   : > { %3216 = vmatpush3.bf16.msra.mxu1 %v2272_v45 }
0x1e7e   : > { %v3374_v46 = vpop.eup %3373  ;;  %3227 = vmatprep.subr.bf16.mxu1 %v3397_v4 }
0x1e7f   : > { %v2260_v47 = vsel %vm521_vm3, %v3374_v46, 0.0 }
0x1e80   : > { %2261 = vadd.xlane.f32.xlu0 %v2260_v47 }
0x1e86   : > { %v3376_v48 = vpop.eup %3375 }
0x1e87   : > { %v2371_v49 = vsel %vm521_vm3, %v3376_v48, 0.0 }
0x1e88   : > { %2372 = vadd.xlane.f32.xlu0 %v2371_v49 }
0x1e9e   : > { %2377 = vrot.lane.b32.xlu0 %v2203_v63, %s3402_s15 }
0x1f0d   : > { %v2262_v50 = vpop.xlane.xlu0 %2261 }
0x1f0e   : > { %3377 = vrcp.f32 %v2262_v50 }
0x1f15   : > { %v2373_v51 = vpop.xlane.xlu0 %2372 }
0x1f16   : > { %3379 = vrcp.f32 %v2373_v51 }
0x1f18   : > { %v3378_v52 = vpop.eup %3377 }
0x1f19   : > { %v2264_v53 = vmul.f32 %v3378_v52, %v3374_v46  ;;  %v2378_v54 = vpop.permute.xlu0 %2377 }
0x1f1a   : > { %v2383_v56 = vsel %vm539_vm4, %v2378_v54, 0 }
0x1f1b   : > { %v2265_v55 = vpack.c.bf16 %v2264_v53, %v2264_v53 }
0x1f1d   : > { %3218 = vmatmul.mubr.msk.bf16.vlgmr.msra.gmra.mrb[52].mxu1 %vm521_vm3, %v2265_v55 }
0x1f1e   : > { %3228 = vmatpush3.bf16.msra.mxu1 %v2383_v56  ;;  %3229 = vmatprep.mubr.msk.bf16.mxu1 %vm3398_vm1, %v3397_v4 }
0x1f1f   : > { %3241 = vmatprep.subr.bf16.mxu1 %v3397_v4 }
0x1f20   : > { %v3380_v57 = vpop.eup %3379 }
0x1f21   : > { %v2375_v58 = vmul.f32 %v3380_v57, %v3376_v48 }
0x1f23   : > { %v2376_v59 = vpack.c.bf16 %v2375_v58, %v2375_v58  ;;  %v2930_v58 = vld [vmem:[%s3964_s10 + $0x3] ss:$0 sm:$0xff] }
0x1f25   : > { %3230 = vmatmul.mubr.msk.bf16.vlgmr.msra.gmra.mrb[56].mxu1 %vm521_vm3, %v2376_v59 }
0x1f26   : > { %3245 = vmatprep.mubr.msk.bf16.mxu1 %vm3398_vm1, %v3397_v4  ;;  %3242 = vmatpush3.bf16.msra.mxu1 %v3311_v1 }
0x1f27   : > { %3243 = vmatprep.subr.bf16.mxu1 %v3397_v4 }
0x1ff0   : > { %v2308_v62 = vpop.f32.mrb[52].mxu1 }
0x1ff1   : > { %v3219_v3 = vpop.f32.mrb[53].mxu1 }
0x1ff2   : > { %v2311_v5 = vpop.f32.mrb[54].mxu1 }
0x1ff3   : > { %v3220_v6 = vpop.f32.mrb[55].mxu1 }
0x1ff8   : > { %v2419_v7 = vpop.f32.mrb[56].mxu1 }
0x1ff9   : > { %2426 = vrot.lane.b32.xlu1 %v2419_v7, %s3404_s24  ;;  %v3231_v8 = vpop.f32.mrb[57].mxu1 }
0x1ffa   : > { %v2422_v9 = vpop.f32.mrb[58].mxu1 }
0x1ffb   : > { %v3232_v10 = vpop.f32.mrb[59].mxu1 }
0x206b   : > { %v2427_v11 = vpop.permute.xlu1 %2426 }
0x206c   : > { %v2429_v12 = vsel %vm473_vm2, %v2308_v62, %v2427_v11 }
0x206d   : > { %v2430_v13 = vpack.c.bf16 %v2429_v12, %v2429_v12 }
0x206f   : > { %3238 = vmatmul.mubr.msk.bf16.vlgmr.msra.gmra.mrb[56].mxu0 %vm385_vm0, %v2430_v13 }
0x2070   : > { %3257 = vmatprep.mubr.msk.bf16.mxu0 %vm3398_vm1, %v3397_v4  ;;  %3250 = vmatpush3.bf16.msra.mxu0 %v3313_v29 }
0x2071   : > { %3251 = vmatprep.subr.bf16.mxu0 %v3397_v4 }
0x2074   : > { %3252 = vmatpush3.bf16.msra.mxu0 %v3314_v30 }
0x2075   : > { %3253 = vmatprep.subr.bf16.mxu0 %v3397_v4 }
0x2078   : > { %3254 = vmatpush3.bf16.msra.mxu0 %v3315_v31 }
0x2079   : > { %3255 = vmatprep.subr.bf16.mxu0 %v3397_v4 }
0x207c   : > { %3256 = vmatpush3.bf16.msra.mxu0 %v3316_v32 }
0x2142   : > { %v2485_v14 = vpop.f32.mrb[56].mxu0 }
0x2143   : > { %v2491_v16 = vadd.f32 %v2485_v14, %v3835_v2  ;;  %v3239_v17 = vpop.f32.mrb[57].mxu0  ;;  %v3312_v2 = vld [vmem:[%s3961_s7 + $0x38] sm:$0xff]  }
0x2144   : > { %v2488_v18 = vpop.f32.mrb[58].mxu0  ;;  %3244 = vmatpush3.bf16.msra.mxu1 %v3312_v2 }
0x2145   : > { %v3904_v19 = vadd.f32 %v2904_v15, %v2491_v16  ;;  %v3240_v20 = vpop.f32.mrb[59].mxu0 }
0x2147   : > { %v2501_v0 = vmul.f32 %v3904_v19, %v3904_v19 }
0x2149   : > { %v2502_v63 = vsel %vm385_vm0, %v2501_v0, 0.0 }
0x214a   : > { %2503 = vadd.xlane.f32.xlu1 %v2502_v63 }
0x21d7   : > { %v2504_v21 = vpop.xlane.xlu1 %2503 }
0x21d8   : > { %v2505_v22 = vmul.f32 0.03125, %v2504_v21 }
0x21da   : > { %v2506_v23 = vadd.f32 1.1920929e-07, %v2505_v22 }
0x21dc   : > { %3381 = vrsqrt.f32 %v2506_v23 }
0x21e6   : > { %v3382_v24 = vpop.eup %3381 }
0x21e7   : > { %v2508_v26 = vmul.f32 %v3382_v24, %v3904_v19 }
0x21e9   : > { %v2517_v27 = vmul.f32 %v2906_v25, %v2508_v26 }
0x21eb   : > { %v2518_v28 = vpack.c.bf16 %v2517_v27, %v2517_v27 }
0x21ed   : > { %3246 = vmatmul.mubr.msk.bf16.vlgmr.msra.gmra.mrb[60].mxu1 %vm385_vm0, %v2518_v28 }
0x22c0   : > { %v2581_v34 = vpop.f32.mrb[60].mxu1 }
0x22c1   : > { %v2582_v35 = vadd.f32 %v2912_v33, %v2581_v34  ;;  %v3247_v36 = vpop.f32.mrb[61].mxu1 }
0x22c2   : > { %v2584_v37 = vpop.f32.mrb[62].mxu1 }
0x22c3   : > { %2605 = vrot.lane.b32.xlu0 %v2582_v35, %s3403_s16  ;;  %v3248_v38 = vpop.f32.mrb[63].mxu1  ;;  %v2587_v39 = vand.u32 2147483647, %v2582_v35  ;;  %v2600_v50 = vmax.f32 %v2582_v35, 0.0 }
0x22c5   : > { %v2588_v40 = vsub.f32 0.0, %v2587_v39 }
0x22c7   : > { %v2589_v41 = vmul.f32 1.442695, %v2588_v40 }
0x22c9   : > { %3383 = vpow2.f32 %v2589_v41 }
0x22d3   : > { %v3384_v4 = vpop.eup %3383 }
0x22d4   : > { %v2591_v42 = vadd.f32 1.0, %v3384_v4  ;;  %v2594_v43 = vmul.f32 -0.5, %v3384_v4  ;;  %v2597_v46 = vand.u32 2147483647, %v3384_v4 }
0x22d6   : > { %3385 = vlog2.f32 %v2591_v42  ;;  %v2595_v45 = vadd.f32 1.0, %v2594_v43  ;;  %vm2598_vm9 = vcmp.lt.f32.partialorder %v2597_v46, 0.0004427343 }
0x22d8   : > { %v2596_v48 = vmul.f32 %v3384_v4, %v2595_v45 }
0x22e0   : > { %v3386_v44 = vpop.eup %3385 }
0x22e1   : > { %v2593_v47 = vmul.f32 0.6931472, %v3386_v44 }
0x22e3   : > { %v2599_v49 = vsel %vm2598_vm9, %v2596_v48, %v2593_v47 }
0x22e4   : > { %v2601_v51 = vadd.f32 %v2600_v50, %v2599_v49 }
0x22e6   : > { %3387 = vtanh.f32 %v2601_v51 }
0x22f0   : > { %v3388_v52 = vpop.eup %3387 }
0x22f1   : > { %v2603_v53 = vmul.f32 %v3388_v52, %v2582_v35 }
0x2335   : > { %v2606_v54 = vpop.permute.xlu0 %2605 }
0x2336   : > { %v2608_v55 = vmul.f32 %v2606_v54, %v2603_v53 }
0x2338   : > { %v2609_v56 = vpack.c.bf16 %v2608_v55, %v2608_v55 }
0x233a   : > { %3258 = vmatmul.mubr.msk.bf16.vlgmr.msra.gmra.mrb[60].mxu0 %vm906_vm6, %v2609_v56 }
0x240d   : > { %v2680_v57 = vpop.f32.mrb[60].mxu0 }
0x240e   : > { %v2686_v59 = vadd.f32 %v2680_v57, %v3904_v19  ;;  %v3259_v60 = vpop.f32.mrb[61].mxu0 }
0x240f   : > { %v2683_v61 = vpop.f32.mrb[62].mxu0 }
0x2410   : > { %v2695_v62 = vadd.f32 %v2930_v58, %v2686_v59  ;;  %v3260_v3 = vpop.f32.mrb[63].mxu0 }
0x2412   : > { %2696 = vst.msk [vmem:[%s381_s21] sm:$0xff] %vm385_vm0, %v2695_v62 }
0x2413 PF: > { %s21_s17 = sadd.s32 1, %s3395_s17  }
0x2414   : > { %p18_p4 = scmp.ge.s32.totalorder %s21_s17, 4  }
0x2416   :  { %20 = sbr.rel (!%p18_p4) target bundleno = 1 (0x1), region = 124 }

</bundles_post_ra>
